<compile_context>
chip_gen: v7x
topology: tpu7x:2x2x1
jax: 0.10.0
libtpu: 0.0.40
codegen_flags: <defaults>
</compile_context>

<pallas_src>
import math

import jax
import jax.numpy as jnp
from jax import lax
from jax.experimental import pallas as pl
from jax.experimental.pallas import tpu as pltpu

SHARED_DIM = 128
SEN_DIM = 768
NUM_CLASSES = 2
GROUP = 128   # rows per independent attention group (one module forward call)


def _intra_attention(h_f32, qkv_w, la_w, b_qkv, b_la):
    """IntraAttention with fused QKV / fused (linear|aoa) weights."""
    f32, bf16 = jnp.float32, jnp.bfloat16
    d = SHARED_DIM
    h = h_f32.astype(bf16)

    # Fused Q|K|V projection: N=384 keeps the MXU feed full. 1/sqrt(d) is folded
    # into the K projection (K is only used inside the score matmul).
    qkv = jnp.dot(h, qkv_w, preferred_element_type=f32) + b_qkv              # [G, 3d] f32
    # Cast once; only the bf16 copies stay live downstream (shorter f32 ranges).
    q = qkv[:, :d].astype(bf16)
    k = qkv[:, d:2 * d].astype(bf16)
    v = qkv[:, 2 * d:].astype(bf16)

    # Q @ K^T as a transposed-RHS contraction (no explicit transpose on a packed
    # bf16 tile -> no XLU relayout; Mosaic folds it into the MXU feed).
    scores = lax.dot_general(q, k, dimension_numbers=(((1,), (1,)), ((), ())),
                             preferred_element_type=f32)                     # [G, G]

    # softmax over axis 1 (key axis); reciprocal on the EUP (free slot).
    m = jnp.max(scores, axis=1, keepdims=True)
    e = jnp.exp(scores - m)
    alpha = e * pl.reciprocal(jnp.sum(e, axis=1, keepdims=True), approx=True)

    v_ = jnp.dot(alpha.astype(bf16), v, preferred_element_type=f32)          # [G, d]

    # Single K=256 matmul: cat([V_, Q], 1) @ [wl | wa] — fills the 256-deep MXU
    # contraction on v6e/v7x; the [G, 256] bf16 concat is a small VMEM write.
    vq = jnp.concatenate([v_.astype(bf16), q], axis=1)                       # [G, 2d] bf16
    la = jnp.dot(vq, la_w, preferred_element_type=f32) + b_la                # [G, 3d]
    x1 = la[:, :d]
    a_half = la[:, d:2 * d]
    b_half = la[:, 2 * d:]
    return x1 * (a_half * jax.nn.sigmoid(b_half))                            # GLU gate


def fusion_kernel(sen_ref, sat_ref,
                  w1_ref, w2_ref,
                  sen_qkv_ref, sen_la_ref,
                  sat_qkv_ref, sat_la_ref,
                  wc_ref, bias_ref, out_ref):
    f32, bf16 = jnp.float32, jnp.bfloat16
    d = SHARED_DIM

    bias = bias_ref[...]                          # [8, 384] f32 slab (one DMA, resident)
    b1, b2 = bias[0:1, :d], bias[1:2, :d]
    b_sen_qkv, b_sen_la = bias[2:3, :], bias[3:4, :]
    b_sat_qkv, b_sat_la = bias[4:5, :], bias[5:6, :]
    bc = bias[6:7, :d]

    # Aligners: BatchNorm (eval) already folded into the linear weights/bias.
    # Inputs arrive in f32; cast to bf16 here on the VPU (no wrapper-side cast op).
    h_sen = jnp.maximum(
        jnp.dot(sen_ref[...].astype(bf16), w1_ref[...], preferred_element_type=f32) + b1,
        0.0)
    h_sat = jnp.maximum(
        jnp.dot(sat_ref[...].astype(bf16), w2_ref[...], preferred_element_type=f32) + b2,
        0.0)

    sen_att = _intra_attention(h_sen, sen_qkv_ref[...], sen_la_ref[...],
                               b_sen_qkv, b_sen_la)
    sat_att = _intra_attention(h_sat, sat_qkv_ref[...], sat_la_ref[...],
                               b_sat_qkv, b_sat_la)

    fused = sen_att + sat_att                     # Dropout in eval mode == identity
    logits = jnp.dot(fused.astype(bf16), wc_ref[...],
                     preferred_element_type=f32) + bc                        # [G, 128]
    out_ref[...] = logits.astype(out_ref.dtype)


def fusion_net_forward(sen, sat, kparams):
    """sen: [num_groups*GROUP, 768] f32, sat: [num_groups*GROUP, 128] f32.

    Each GROUP-row slice is one independent FusionNet forward (attention couples
    rows only within its group). Weights are DMA'd once (constant index_map) and
    stay VMEM-resident across the grid; per-group input/output tiles are
    double-buffered by the BlockSpec pipeline; the group axis is "parallel" so
    v7x shards groups across both TensorCores.
    """
    d = SHARED_DIM
    n = sen.shape[0]
    assert n % GROUP == 0 and sat.shape[0] == n
    num_groups = n // GROUP

    (w1f, w2f, sen_qkv_w, sen_la_w, sat_qkv_w, sat_la_w, wc_pad, bias_slab) = kparams

    def const_spec(arr):
        return pl.BlockSpec(arr.shape, lambda g: (0, 0))

    in_specs = [
        pl.BlockSpec((GROUP, SEN_DIM), lambda g: (g, 0)),   # sen group tile
        pl.BlockSpec((GROUP, d), lambda g: (g, 0)),         # sat group tile
        const_spec(w1f), const_spec(w2f),
        const_spec(sen_qkv_w), const_spec(sen_la_w),
        const_spec(sat_qkv_w), const_spec(sat_la_w),
        const_spec(wc_pad), const_spec(bias_slab),
    ]
    out_spec = pl.BlockSpec((GROUP, d), lambda g: (g, 0))

    # ~126 MFLOP, ~66k transcendentals, ~0.5 MB activation traffic per group; ~1 MB
    # of resident bf16 weights per call. Advisory only.
    weight_bytes = sum(int(w.size) * w.dtype.itemsize
                       for w in (w1f, w2f, sen_qkv_w, sen_la_w,
                                 sat_qkv_w, sat_la_w, wc_pad, bias_slab))
    act_bytes_per_group = GROUP * (SEN_DIM + d) * 4 + GROUP * d * 4
    cost = pl.CostEstimate(
        flops=int(1.26e8) * num_groups,
        transcendentals=66_000 * num_groups,
        bytes_accessed=weight_bytes + act_bytes_per_group * num_groups,
    )

    out = pl.pallas_call(
        fusion_kernel,
        out_shape=jax.ShapeDtypeStruct((n, d), jnp.float32),
        grid=(num_groups,),
        in_specs=in_specs,
        out_specs=out_spec,
        compiler_params=pltpu.CompilerParams(dimension_semantics=("parallel",)),
        cost_estimate=cost,
    )(sen.astype(jnp.float32), sat.astype(jnp.float32),
      w1f, w2f, sen_qkv_w, sen_la_w, sat_qkv_w, sat_la_w, wc_pad, bias_slab)
    return out[:, :NUM_CLASSES]


# ----------------------------------------------------------------------------
# Parameter construction (torch-style raw params) + host-side folding/fusion.
# ----------------------------------------------------------------------------
def make_raw_params(key):
    """Deterministic synthetic params (PyTorch Linear weights transposed to [in, out])."""
    keys = iter(jax.random.split(key, 64))

    def lin(in_f, out_f, scale=0.05):
        w = jax.random.normal(next(keys), (in_f, out_f), jnp.float32) * scale
        bias = jax.random.normal(next(keys), (1, out_f), jnp.float32) * scale
        return w, bias

    def bn(c, eps=1e-5):
        gamma = 1.0 + 0.1 * jax.random.normal(next(keys), (1, c), jnp.float32)
        beta = 0.1 * jax.random.normal(next(keys), (1, c), jnp.float32)
        running_mean = jnp.zeros((1, c), jnp.float32)
        running_var = jnp.ones((1, c), jnp.float32)
        scale = gamma / jnp.sqrt(running_var + eps)
        shift = beta - running_mean * scale
        return scale, shift

    d = SHARED_DIM
    w1, b1 = lin(SEN_DIM, d)
    bn1s, bn1t = bn(d)
    w2, b2 = lin(d, d)
    bn2s, bn2t = bn(d)

    def intra_params():
        wq, bq = lin(d, d)
        wk, bk = lin(d, d)
        wv, bv = lin(d, d)
        wl, bl = lin(2 * d, d)
        wa, ba = lin(2 * d, 2 * d)
        return (wq, bq, wk, bk, wv, bv, wl, bl, wa, ba)

    sen_intra = intra_params()
    sat_intra = intra_params()
    wc, bc = lin(d, NUM_CLASSES)

    return (w1, b1, bn1s, bn1t, w2, b2, bn2s, bn2t) + sen_intra + sat_intra + (wc, bc)


def prepare_kernel_params(raw):
    """Fold BN + score scale, fuse QKV and linear|aoa, pack biases, cast weights to bf16."""
    (w1, b1, bn1s, bn1t, w2, b2, bn2s, bn2t,
     sq_w, sq_b, sk_w, sk_b, sv_w, sv_b, sl_w, sl_b, sa_w, sa_b,
     tq_w, tq_b, tk_w, tk_b, tv_w, tv_b, tl_w, tl_b, ta_w, ta_b,
     wc, bc) = raw
    d = SHARED_DIM
    inv_sqrt_d = 1.0 / math.sqrt(d)

    # Fold BatchNorm (eval) into the aligner Linears.
    w1f = w1 * bn1s
    b1f = b1 * bn1s + bn1t
    w2f = w2 * bn2s
    b2f = b2 * bn2s + bn2t

    def fuse_branch(wq, bq, wk, bk, wv, bv, wl, bl, wa, ba):
        # Fold 1/sqrt(d) into K only (K appears solely inside the score matmul).
        qkv_w = jnp.concatenate([wq, wk * inv_sqrt_d, wv], axis=1)            # [d, 3d]
        qkv_b = jnp.concatenate([bq, bk * inv_sqrt_d, bv], axis=1)            # [1, 3d]
        la_w = jnp.concatenate([wl, wa], axis=1)                              # [2d, 3d]; rows = [V_ | Q]
        la_b = jnp.concatenate([bl, ba], axis=1)                              # [1, 3d]
        return qkv_w, la_w, qkv_b, la_b

    sen_qkv_w, sen_la_w, sen_qkv_b, sen_la_b = fuse_branch(
        sq_w, sq_b, sk_w, sk_b, sv_w, sv_b, sl_w, sl_b, sa_w, sa_b)
    sat_qkv_w, sat_la_w, sat_qkv_b, sat_la_b = fuse_branch(
        tq_w, tq_b, tk_w, tk_b, tv_w, tv_b, tl_w, tl_b, ta_w, ta_b)

    # Pad classifier to a lane-dense 128-wide output (wrapper slices [:, :2]).
    wc_pad = jnp.zeros((d, d), jnp.float32).at[:, :NUM_CLASSES].set(wc)
    bc_pad = jnp.zeros((1, d), jnp.float32).at[:, :NUM_CLASSES].set(bc)

    def row(vec):  # pad a [1, n] bias to a [1, 3d] slab row
        return jnp.pad(vec, ((0, 0), (0, 3 * d - vec.shape[1])))

    bias_slab = jnp.concatenate(
        [row(b1f), row(b2f), sen_qkv_b, sen_la_b, sat_qkv_b, sat_la_b,
         row(bc_pad), jnp.zeros((1, 3 * d), jnp.float32)], axis=0)            # [8, 3d] f32

    weights = (w1f, w2f, sen_qkv_w, sen_la_w, sat_qkv_w, sat_la_w, wc_pad)
    return tuple(w.astype(jnp.bfloat16) for w in weights) + (bias_slab,)


def fusion_net_reference(sen, sat, raw):
    """Faithful pure-JAX f32 reference of the original PyTorch module (eval mode),
    for a single attention group (2-D inputs)."""
    (w1, b1, bn1s, bn1t, w2, b2, bn2s, bn2t,
     sq_w, sq_b, sk_w, sk_b, sv_w, sv_b, sl_w, sl_b, sa_w, sa_b,
     tq_w, tq_b, tk_w, tk_b, tv_w, tv_b, tl_w, tl_b, ta_w, ta_b,
     wc, bc) = raw
    d = SHARED_DIM

    def intra(x, wq, bq, wk, bk, wv, bv, wl, bl, wa, ba):
        q = x @ wq + bq
        k = x @ wk + bk
        v = x @ wv + bv
        alpha = jax.nn.softmax((q @ k.T) / math.sqrt(d), axis=1)
        xc = jnp.concatenate([alpha @ v, q], axis=1)
        x1 = xc @ wl + bl
        aoa = xc @ wa + ba
        return x1 * (aoa[:, :d] * jax.nn.sigmoid(aoa[:, d:]))

    h_sen = jnp.maximum((sen @ w1 + b1) * bn1s + bn1t, 0.0)
    h_sat = jnp.maximum((sat @ w2 + b2) * bn2s + bn2t, 0.0)
    fused = (intra(h_sen, sq_w, sq_b, sk_w, sk_b, sv_w, sv_b, sl_w, sl_b, sa_w, sa_b)
             + intra(h_sat, tq_w, tq_b, tk_w, tk_b, tv_w, tv_b, tl_w, tl_b, ta_w, ta_b))
    return fused @ wc + bc


if __name__ == "__main__":
    key = jax.random.PRNGKey(0)
    k_sen, k_sat, k_par = jax.random.split(key, 3)

    NUM_GROUPS = 4                       # stream of independent 128-row forward batches
    n = NUM_GROUPS * GROUP
    sen = jax.random.normal(k_sen, (n, SEN_DIM), jnp.float32)
    sat = jax.random.normal(k_sat, (n, SHARED_DIM), jnp.float32)

    raw_params = make_raw_params(k_par)
    kernel_params = prepare_kernel_params(raw_params)

    logits = jax.block_until_ready(fusion_net_forward(sen, sat, kernel_params))
    assert logits.shape == (n, NUM_CLASSES)

    # Reference: each GROUP-row slice is one independent FusionNet forward.
    refs = [fusion_net_reference(sen[g * GROUP:(g + 1) * GROUP],
                                 sat[g * GROUP:(g + 1) * GROUP], raw_params)
            for g in range(NUM_GROUPS)]
    ref = jax.block_until_ready(jnp.concatenate(refs, axis=0))

    # bf16 matmul operands + approx reciprocal perturb vs. the f32 reference.
    assert jnp.allclose(logits, ref, atol=2e-2, rtol=2e-2), "kernel mismatch vs reference"

    print("KERNEL_OK")
</pallas_src>

<mosaic_0001>
module attributes {stable_mosaic.version = 11 : i64} {
  func.func @fusion_kernel(%arg0: i32, %arg1: memref<128x768xf32, #tpu.memory_space<vmem>>, %arg2: memref<128x128xf32, #tpu.memory_space<vmem>>, %arg3: memref<768x128xbf16, #tpu.memory_space<vmem>>, %arg4: memref<128x128xbf16, #tpu.memory_space<vmem>>, %arg5: memref<128x384xbf16, #tpu.memory_space<vmem>>, %arg6: memref<256x384xbf16, #tpu.memory_space<vmem>>, %arg7: memref<128x384xbf16, #tpu.memory_space<vmem>>, %arg8: memref<256x384xbf16, #tpu.memory_space<vmem>>, %arg9: memref<128x128xbf16, #tpu.memory_space<vmem>>, %arg10: memref<8x384xf32, #tpu.memory_space<vmem>>, %arg11: memref<128x128xf32, #tpu.memory_space<vmem>>) attributes {dimension_semantics = [#tpu.dimension_semantics<parallel>], iteration_bounds = array<i64: 4>, scalar_prefetch = 0 : i64, scratch_operands = 0 : i64, tpu.core_type = #tpu.core_type<tc>, window_params = [{transform_indices = @transform_0, window_bounds = array<i64: 128, 768>}, {transform_indices = @transform_1, window_bounds = array<i64: 128, 128>}, {pipeline_mode = #tpu.pipeline_mode<synchronous>, transform_indices = @transform_2, window_bounds = array<i64: 768, 128>}, {pipeline_mode = #tpu.pipeline_mode<synchronous>, transform_indices = @transform_3, window_bounds = array<i64: 128, 128>}, {pipeline_mode = #tpu.pipeline_mode<synchronous>, transform_indices = @transform_4, window_bounds = array<i64: 128, 384>}, {pipeline_mode = #tpu.pipeline_mode<synchronous>, transform_indices = @transform_5, window_bounds = array<i64: 256, 384>}, {pipeline_mode = #tpu.pipeline_mode<synchronous>, transform_indices = @transform_6, window_bounds = array<i64: 128, 384>}, {pipeline_mode = #tpu.pipeline_mode<synchronous>, transform_indices = @transform_7, window_bounds = array<i64: 256, 384>}, {pipeline_mode = #tpu.pipeline_mode<synchronous>, transform_indices = @transform_8, window_bounds = array<i64: 128, 128>}, {pipeline_mode = #tpu.pipeline_mode<synchronous>, transform_indices = @transform_9, window_bounds = array<i64: 8, 384>}, {transform_indices = @transform_10, window_bounds = array<i64: 128, 128>}]} {
    %c0 = arith.constant 0 : index
    %c0_0 = arith.constant 0 : index
    %0 = vector.load %arg10[%c0, %c0_0] : memref<8x384xf32, #tpu.memory_space<vmem>>, vector<8x384xf32>
    %1 = vector.extract_strided_slice %0 {offsets = [0, 0], sizes = [1, 128], strides = [1, 1]} : vector<8x384xf32> to vector<1x128xf32>
    %2 = vector.extract_strided_slice %0 {offsets = [1, 0], sizes = [1, 128], strides = [1, 1]} : vector<8x384xf32> to vector<1x128xf32>
    %3 = vector.extract_strided_slice %0 {offsets = [2, 0], sizes = [1, 384], strides = [1, 1]} : vector<8x384xf32> to vector<1x384xf32>
    %4 = vector.extract_strided_slice %0 {offsets = [3, 0], sizes = [1, 384], strides = [1, 1]} : vector<8x384xf32> to vector<1x384xf32>
    %5 = vector.extract_strided_slice %0 {offsets = [4, 0], sizes = [1, 384], strides = [1, 1]} : vector<8x384xf32> to vector<1x384xf32>
    %6 = vector.extract_strided_slice %0 {offsets = [5, 0], sizes = [1, 384], strides = [1, 1]} : vector<8x384xf32> to vector<1x384xf32>
    %7 = vector.extract_strided_slice %0 {offsets = [6, 0], sizes = [1, 128], strides = [1, 1]} : vector<8x384xf32> to vector<1x128xf32>
    %c0_1 = arith.constant 0 : index
    %c0_2 = arith.constant 0 : index
    %8 = vector.load %arg1[%c0_1, %c0_2] : memref<128x768xf32, #tpu.memory_space<vmem>>, vector<128x768xf32>
    %9 = arith.truncf %8 : vector<128x768xf32> to vector<128x768xbf16>
    %c0_3 = arith.constant 0 : index
    %c0_4 = arith.constant 0 : index
    %10 = vector.load %arg3[%c0_3, %c0_4] : memref<768x128xbf16, #tpu.memory_space<vmem>>, vector<768x128xbf16>
    %cst = arith.constant dense<0.000000e+00> : vector<128x128xf32>
    %11 = tpu.matmul %9, %10, %cst {dimension_numbers = #tpu.dot_dimension_numbers<[1], [0], [0], [1], [0, 0, 1, 1], [], []>} : vector<128x768xbf16>, vector<768x128xbf16>, vector<128x128xf32> -> vector<128x128xf32>
    %12 = vector.broadcast %1 : vector<1x128xf32> to vector<128x128xf32>
    %13 = arith.addf %11, %12 : vector<128x128xf32>
    %cst_5 = arith.constant 0.000000e+00 : f32
    %14 = vector.broadcast %cst_5 : f32 to vector<128x128xf32>
    %15 = arith.maximumf %13, %14 : vector<128x128xf32>
    %c0_6 = arith.constant 0 : index
    %c0_7 = arith.constant 0 : index
    %16 = vector.load %arg2[%c0_6, %c0_7] : memref<128x128xf32, #tpu.memory_space<vmem>>, vector<128x128xf32>
    %17 = arith.truncf %16 : vector<128x128xf32> to vector<128x128xbf16>
    %c0_8 = arith.constant 0 : index
    %c0_9 = arith.constant 0 : index
    %18 = vector.load %arg4[%c0_8, %c0_9] : memref<128x128xbf16, #tpu.memory_space<vmem>>, vector<128x128xbf16>
    %cst_10 = arith.constant dense<0.000000e+00> : vector<128x128xf32>
    %19 = tpu.matmul %17, %18, %cst_10 {dimension_numbers = #tpu.dot_dimension_numbers<[1], [0], [0], [1], [0, 0, 1, 1], [], []>} : vector<128x128xbf16>, vector<128x128xbf16>, vector<128x128xf32> -> vector<128x128xf32>
    %20 = vector.broadcast %2 : vector<1x128xf32> to vector<128x128xf32>
    %21 = arith.addf %19, %20 : vector<128x128xf32>
    %cst_11 = arith.constant 0.000000e+00 : f32
    %22 = vector.broadcast %cst_11 : f32 to vector<128x128xf32>
    %23 = arith.maximumf %21, %22 : vector<128x128xf32>
    %c0_12 = arith.constant 0 : index
    %c0_13 = arith.constant 0 : index
    %24 = vector.load %arg5[%c0_12, %c0_13] : memref<128x384xbf16, #tpu.memory_space<vmem>>, vector<128x384xbf16>
    %c0_14 = arith.constant 0 : index
    %c0_15 = arith.constant 0 : index
    %25 = vector.load %arg6[%c0_14, %c0_15] : memref<256x384xbf16, #tpu.memory_space<vmem>>, vector<256x384xbf16>
    %26 = arith.truncf %15 : vector<128x128xf32> to vector<128x128xbf16>
    %cst_16 = arith.constant dense<0.000000e+00> : vector<128x384xf32>
    %27 = tpu.matmul %26, %24, %cst_16 {dimension_numbers = #tpu.dot_dimension_numbers<[1], [0], [0], [1], [0, 0, 1, 1], [], []>} : vector<128x128xbf16>, vector<128x384xbf16>, vector<128x384xf32> -> vector<128x384xf32>
    %28 = vector.broadcast %3 : vector<1x384xf32> to vector<128x384xf32>
    %29 = arith.addf %27, %28 : vector<128x384xf32>
    %30 = vector.extract_strided_slice %29 {offsets = [0, 0], sizes = [128, 128], strides = [1, 1]} : vector<128x384xf32> to vector<128x128xf32>
    %31 = arith.truncf %30 : vector<128x128xf32> to vector<128x128xbf16>
    %32 = vector.extract_strided_slice %29 {offsets = [0, 128], sizes = [128, 128], strides = [1, 1]} : vector<128x384xf32> to vector<128x128xf32>
    %33 = arith.truncf %32 : vector<128x128xf32> to vector<128x128xbf16>
    %34 = vector.extract_strided_slice %29 {offsets = [0, 256], sizes = [128, 128], strides = [1, 1]} : vector<128x384xf32> to vector<128x128xf32>
    %35 = arith.truncf %34 : vector<128x128xf32> to vector<128x128xbf16>
    %cst_17 = arith.constant dense<0.000000e+00> : vector<128x128xf32>
    %36 = tpu.matmul %31, %33, %cst_17 {dimension_numbers = #tpu.dot_dimension_numbers<[1], [1], [0], [0], [0, 0, 1, 0], [], []>} : vector<128x128xbf16>, vector<128x128xbf16>, vector<128x128xf32> -> vector<128x128xf32>
    %cst_18 = arith.constant dense<0xFF800000> : vector<128xf32>
    %37 = vector.multi_reduction <maximumf>, %36, %cst_18 [1] : vector<128x128xf32> to vector<128xf32>
    %38 = vector.shape_cast %37 : vector<128xf32> to vector<128x1xf32>
    %39 = vector.broadcast %38 : vector<128x1xf32> to vector<128x128xf32>
    %40 = arith.subf %36, %39 : vector<128x128xf32>
    %41 = math.exp %40 : vector<128x128xf32>
    %cst_19 = arith.constant dense<0.000000e+00> : vector<128xf32>
    %42 = vector.multi_reduction <add>, %41, %cst_19 [1] : vector<128x128xf32> to vector<128xf32>
    %43 = vector.shape_cast %42 : vector<128xf32> to vector<128x1xf32>
    %44 = tpu.reciprocal %43 {approx = true} : vector<128x1xf32> -> vector<128x1xf32>
    %45 = vector.broadcast %44 : vector<128x1xf32> to vector<128x128xf32>
    %46 = arith.mulf %41, %45 : vector<128x128xf32>
    %47 = arith.truncf %46 : vector<128x128xf32> to vector<128x128xbf16>
    %cst_20 = arith.constant dense<0.000000e+00> : vector<128x128xf32>
    %48 = tpu.matmul %47, %35, %cst_20 {dimension_numbers = #tpu.dot_dimension_numbers<[1], [0], [0], [1], [0, 0, 1, 1], [], []>} : vector<128x128xbf16>, vector<128x128xbf16>, vector<128x128xf32> -> vector<128x128xf32>
    %49 = arith.truncf %48 : vector<128x128xf32> to vector<128x128xbf16>
    %50 = tpu.concatenate %49, %31 in 1 : vector<128x128xbf16>, vector<128x128xbf16> -> vector<128x256xbf16>
    %cst_21 = arith.constant dense<0.000000e+00> : vector<128x384xf32>
    %51 = tpu.matmul %50, %25, %cst_21 {dimension_numbers = #tpu.dot_dimension_numbers<[1], [0], [0], [1], [0, 0, 1, 1], [], []>} : vector<128x256xbf16>, vector<256x384xbf16>, vector<128x384xf32> -> vector<128x384xf32>
    %52 = vector.broadcast %4 : vector<1x384xf32> to vector<128x384xf32>
    %53 = arith.addf %51, %52 : vector<128x384xf32>
    %54 = vector.extract_strided_slice %53 {offsets = [0, 0], sizes = [128, 128], strides = [1, 1]} : vector<128x384xf32> to vector<128x128xf32>
    %55 = vector.extract_strided_slice %53 {offsets = [0, 128], sizes = [128, 128], strides = [1, 1]} : vector<128x384xf32> to vector<128x128xf32>
    %56 = vector.extract_strided_slice %53 {offsets = [0, 256], sizes = [128, 128], strides = [1, 1]} : vector<128x384xf32> to vector<128x128xf32>
    %57 = arith.negf %56 : vector<128x128xf32>
    %58 = math.exp %57 : vector<128x128xf32>
    %cst_22 = arith.constant 1.000000e+00 : f32
    %59 = vector.broadcast %cst_22 : f32 to vector<128x128xf32>
    %60 = arith.addf %59, %58 : vector<128x128xf32>
    %61 = arith.divf %59, %60 : vector<128x128xf32>
    %62 = arith.mulf %55, %61 : vector<128x128xf32>
    %63 = arith.mulf %54, %62 : vector<128x128xf32>
    %c0_23 = arith.constant 0 : index
    %c0_24 = arith.constant 0 : index
    %64 = vector.load %arg7[%c0_23, %c0_24] : memref<128x384xbf16, #tpu.memory_space<vmem>>, vector<128x384xbf16>
    %c0_25 = arith.constant 0 : index
    %c0_26 = arith.constant 0 : index
    %65 = vector.load %arg8[%c0_25, %c0_26] : memref<256x384xbf16, #tpu.memory_space<vmem>>, vector<256x384xbf16>
    %66 = arith.truncf %23 : vector<128x128xf32> to vector<128x128xbf16>
    %cst_27 = arith.constant dense<0.000000e+00> : vector<128x384xf32>
    %67 = tpu.matmul %66, %64, %cst_27 {dimension_numbers = #tpu.dot_dimension_numbers<[1], [0], [0], [1], [0, 0, 1, 1], [], []>} : vector<128x128xbf16>, vector<128x384xbf16>, vector<128x384xf32> -> vector<128x384xf32>
    %68 = vector.broadcast %5 : vector<1x384xf32> to vector<128x384xf32>
    %69 = arith.addf %67, %68 : vector<128x384xf32>
    %70 = vector.extract_strided_slice %69 {offsets = [0, 0], sizes = [128, 128], strides = [1, 1]} : vector<128x384xf32> to vector<128x128xf32>
    %71 = arith.truncf %70 : vector<128x128xf32> to vector<128x128xbf16>
    %72 = vector.extract_strided_slice %69 {offsets = [0, 128], sizes = [128, 128], strides = [1, 1]} : vector<128x384xf32> to vector<128x128xf32>
    %73 = arith.truncf %72 : vector<128x128xf32> to vector<128x128xbf16>
    %74 = vector.extract_strided_slice %69 {offsets = [0, 256], sizes = [128, 128], strides = [1, 1]} : vector<128x384xf32> to vector<128x128xf32>
    %75 = arith.truncf %74 : vector<128x128xf32> to vector<128x128xbf16>
    %cst_28 = arith.constant dense<0.000000e+00> : vector<128x128xf32>
    %76 = tpu.matmul %71, %73, %cst_28 {dimension_numbers = #tpu.dot_dimension_numbers<[1], [1], [0], [0], [0, 0, 1, 0], [], []>} : vector<128x128xbf16>, vector<128x128xbf16>, vector<128x128xf32> -> vector<128x128xf32>
    %cst_29 = arith.constant dense<0xFF800000> : vector<128xf32>
    %77 = vector.multi_reduction <maximumf>, %76, %cst_29 [1] : vector<128x128xf32> to vector<128xf32>
    %78 = vector.shape_cast %77 : vector<128xf32> to vector<128x1xf32>
    %79 = vector.broadcast %78 : vector<128x1xf32> to vector<128x128xf32>
    %80 = arith.subf %76, %79 : vector<128x128xf32>
    %81 = math.exp %80 : vector<128x128xf32>
    %cst_30 = arith.constant dense<0.000000e+00> : vector<128xf32>
    %82 = vector.multi_reduction <add>, %81, %cst_30 [1] : vector<128x128xf32> to vector<128xf32>
    %83 = vector.shape_cast %82 : vector<128xf32> to vector<128x1xf32>
    %84 = tpu.reciprocal %83 {approx = true} : vector<128x1xf32> -> vector<128x1xf32>
    %85 = vector.broadcast %84 : vector<128x1xf32> to vector<128x128xf32>
    %86 = arith.mulf %81, %85 : vector<128x128xf32>
    %87 = arith.truncf %86 : vector<128x128xf32> to vector<128x128xbf16>
    %cst_31 = arith.constant dense<0.000000e+00> : vector<128x128xf32>
    %88 = tpu.matmul %87, %75, %cst_31 {dimension_numbers = #tpu.dot_dimension_numbers<[1], [0], [0], [1], [0, 0, 1, 1], [], []>} : vector<128x128xbf16>, vector<128x128xbf16>, vector<128x128xf32> -> vector<128x128xf32>
    %89 = arith.truncf %88 : vector<128x128xf32> to vector<128x128xbf16>
    %90 = tpu.concatenate %89, %71 in 1 : vector<128x128xbf16>, vector<128x128xbf16> -> vector<128x256xbf16>
    %cst_32 = arith.constant dense<0.000000e+00> : vector<128x384xf32>
    %91 = tpu.matmul %90, %65, %cst_32 {dimension_numbers = #tpu.dot_dimension_numbers<[1], [0], [0], [1], [0, 0, 1, 1], [], []>} : vector<128x256xbf16>, vector<256x384xbf16>, vector<128x384xf32> -> vector<128x384xf32>
    %92 = vector.broadcast %6 : vector<1x384xf32> to vector<128x384xf32>
    %93 = arith.addf %91, %92 : vector<128x384xf32>
    %94 = vector.extract_strided_slice %93 {offsets = [0, 0], sizes = [128, 128], strides = [1, 1]} : vector<128x384xf32> to vector<128x128xf32>
    %95 = vector.extract_strided_slice %93 {offsets = [0, 128], sizes = [128, 128], strides = [1, 1]} : vector<128x384xf32> to vector<128x128xf32>
    %96 = vector.extract_strided_slice %93 {offsets = [0, 256], sizes = [128, 128], strides = [1, 1]} : vector<128x384xf32> to vector<128x128xf32>
    %97 = arith.negf %96 : vector<128x128xf32>
    %98 = math.exp %97 : vector<128x128xf32>
    %cst_33 = arith.constant 1.000000e+00 : f32
    %99 = vector.broadcast %cst_33 : f32 to vector<128x128xf32>
    %100 = arith.addf %99, %98 : vector<128x128xf32>
    %101 = arith.divf %99, %100 : vector<128x128xf32>
    %102 = arith.mulf %95, %101 : vector<128x128xf32>
    %103 = arith.mulf %94, %102 : vector<128x128xf32>
    %104 = arith.addf %63, %103 : vector<128x128xf32>
    %105 = arith.truncf %104 : vector<128x128xf32> to vector<128x128xbf16>
    %c0_34 = arith.constant 0 : index
    %c0_35 = arith.constant 0 : index
    %106 = vector.load %arg9[%c0_34, %c0_35] : memref<128x128xbf16, #tpu.memory_space<vmem>>, vector<128x128xbf16>
    %cst_36 = arith.constant dense<0.000000e+00> : vector<128x128xf32>
    %107 = tpu.matmul %105, %106, %cst_36 {dimension_numbers = #tpu.dot_dimension_numbers<[1], [0], [0], [1], [0, 0, 1, 1], [], []>} : vector<128x128xbf16>, vector<128x128xbf16>, vector<128x128xf32> -> vector<128x128xf32>
    %108 = vector.broadcast %7 : vector<1x128xf32> to vector<128x128xf32>
    %109 = arith.addf %107, %108 : vector<128x128xf32>
    %c0_37 = arith.constant 0 : index
    %c0_38 = arith.constant 0 : index
    %110 = vector.load %arg11[%c0_37, %c0_38] : memref<128x128xf32, #tpu.memory_space<vmem>>, vector<128x128xf32>
    tpu.vector_store %arg11[%c0_37, %c0_38], %109 {strides = array<i32>} : memref<128x128xf32, #tpu.memory_space<vmem>>, vector<128x128xf32>,
    return
  }
  func.func @transform_0(%arg0: i32) -> (i32, i32) {
    %c0_i32 = arith.constant 0 : i32
    %c0_i32_0 = arith.constant 0 : i32
    return %arg0, %c0_i32 : i32, i32
  }
  func.func @transform_1(%arg0: i32) -> (i32, i32) {
    %c0_i32 = arith.constant 0 : i32
    %c0_i32_0 = arith.constant 0 : i32
    return %arg0, %c0_i32 : i32, i32
  }
  func.func @transform_2(%arg0: i32) -> (i32, i32) {
    %c0_i32 = arith.constant 0 : i32
    %c0_i32_0 = arith.constant 0 : i32
    %c0_i32_1 = arith.constant 0 : i32
    return %c0_i32, %c0_i32_0 : i32, i32
  }
  func.func @transform_3(%arg0: i32) -> (i32, i32) {
    %c0_i32 = arith.constant 0 : i32
    %c0_i32_0 = arith.constant 0 : i32
    %c0_i32_1 = arith.constant 0 : i32
    return %c0_i32, %c0_i32_0 : i32, i32
  }
  func.func @transform_4(%arg0: i32) -> (i32, i32) {
    %c0_i32 = arith.constant 0 : i32
    %c0_i32_0 = arith.constant 0 : i32
    %c0_i32_1 = arith.constant 0 : i32
    return %c0_i32, %c0_i32_0 : i32, i32
  }
  func.func @transform_5(%arg0: i32) -> (i32, i32) {
    %c0_i32 = arith.constant 0 : i32
    %c0_i32_0 = arith.constant 0 : i32
    %c0_i32_1 = arith.constant 0 : i32
    return %c0_i32, %c0_i32_0 : i32, i32
  }
  func.func @transform_6(%arg0: i32) -> (i32, i32) {
    %c0_i32 = arith.constant 0 : i32
    %c0_i32_0 = arith.constant 0 : i32
    %c0_i32_1 = arith.constant 0 : i32
    return %c0_i32, %c0_i32_0 : i32, i32
  }
  func.func @transform_7(%arg0: i32) -> (i32, i32) {
    %c0_i32 = arith.constant 0 : i32
    %c0_i32_0 = arith.constant 0 : i32
    %c0_i32_1 = arith.constant 0 : i32
    return %c0_i32, %c0_i32_0 : i32, i32
  }
  func.func @transform_8(%arg0: i32) -> (i32, i32) {
    %c0_i32 = arith.constant 0 : i32
    %c0_i32_0 = arith.constant 0 : i32
    %c0_i32_1 = arith.constant 0 : i32
    return %c0_i32, %c0_i32_0 : i32, i32
  }
  func.func @transform_9(%arg0: i32) -> (i32, i32) {
    %c0_i32 = arith.constant 0 : i32
    %c0_i32_0 = arith.constant 0 : i32
    %c0_i32_1 = arith.constant 0 : i32
    return %c0_i32, %c0_i32_0 : i32, i32
  }
  func.func @transform_10(%arg0: i32) -> (i32, i32) {
    %c0_i32 = arith.constant 0 : i32
    %c0_i32_0 = arith.constant 0 : i32
    return %arg0, %c0_i32 : i32, i32
  }
}

</mosaic_0001>

<bundles_post_ra>
// kernel: tpu_custom_call.1
= control target key start
LH: loop header
LB: loop body
LE: loop exit
PB: predicated region body
PF: predicated region fallthrough
CT: control target
= control target key end

     0   :  { %s8395_s0 = inlined_call_operand.hbm [shape: f32[512,768], index: 0, kind: input, shape index: {}]   ;;  %s8396_s1 = inlined_call_operand.hbm [shape: f32[512,128], index: 1, kind: input, shape index: {}]   ;;  %s8397_s2 = inlined_call_operand.hbm [shape: bf16[768,128], index: 2, kind: input, shape index: {}]   ;;  %s8398_s3 = inlined_call_operand.hbm [shape: bf16[128,128], index: 3, kind: input, shape index: {}]   ;;  %s8399_s4 = inlined_call_operand.hbm [shape: bf16[128,384], index: 4, kind: input, shape index: {}]   ;;  %s8400_s5 = inlined_call_operand.hbm [shape: bf16[256,384], index: 5, kind: input, shape index: {}]   ;;  %s8401_s6 = inlined_call_operand.hbm [shape: bf16[128,384], index: 6, kind: input, shape index: {}]   ;;  %s8402_s7 = inlined_call_operand.hbm [shape: bf16[256,384], index: 7, kind: input, shape index: {}]   ;;  %s8403_s8 = inlined_call_operand.hbm [shape: bf16[128,128], index: 8, kind: input, shape index: {}]   ;;  %s8404_s9 = inlined_call_operand.hbm [shape: f32[8,384], index: 9, kind: input, shape index: {}]   ;;  %s8405_s10 = inlined_call_operand.hbm [shape: f32[512,128], index: 10, kind: output, shape index: {}]  }
   0x1   :  { %8413 = sst [smem:[#allocation29_spill]] %s8395_s0 }
   0x2   :  { %8414 = sst [smem:[#allocation30_spill]] %s8397_s2 }
   0x3   :  { %8415 = sst [smem:[#allocation31_spill]] %s8398_s3 }
   0x4   :  { %8416 = sst [smem:[#allocation32_spill]] %s8399_s4 }
   0x5   :  { %8417 = sst [smem:[#allocation33_spill]] %s8400_s5 }
   0x6   :  { %8418 = sst [smem:[#allocation34_spill]] %s8401_s6 }
   0x7   :  { %8419 = sst [smem:[#allocation35_spill]] %s8405_s10 }
   0x8   :  { %15 = vsyncpa [#allocation3], 0 }
   0x9   :  { %17 = vsyncpa [#allocation3 + $0x1], 0 }
   0xa   :  { %18 = vsyncpa [#allocation6], 0 }
   0xb   :  { %20 = vsyncpa [#allocation6 + $0x1], 0 }
   0xc   :  { %21 = vsyncpa [#allocation9], 0 }
   0xd   :  { %22 = vsyncpa [#allocation12], 0 }
   0xe   :  { %23 = vsyncpa [#allocation15], 0 }
   0xf   :  { %24 = vsyncpa [#allocation18], 0 }
  0x10   :  { %25 = vsyncpa [#allocation4], 0 }
  0x11   :  { %27 = vsyncpa [#allocation4 + $0x1], 0  ;;  %s6947_s13 = smov 0   ;;  %s6949_s14 = smov 0  }
  0x12   :  { %s6951_s15 = smov 0   ;;  %s6953_s16 = smov 0  }
  0x13 LB: > { %s6870_s17 = smov [#allocation7]   ;;  %s6968_s19 = sadd.s32 4294967295, %s6868_s16   ;;  %s6868_s16 = sphi %s6953_s16, %s8456_s16   ;;  %s6864_s15 = sphi %s6951_s15, %s8455_s15   ;;  %s6860_s14 = sphi %s6949_s14, %s8454_s14   ;;  %s6856_s13 = sphi %s6947_s13, %s8453_s13  }
  0x14   : > { %s296_s18 = sshll.u32 %s6870_s17, 4  ;;  %p4852_p0 = scmp.ge.s32.totalorder %s6868_s16, 1  ;;  %s6973_s18 = int_to_ptr.vmem [resolvable:$true] %s296_s18 }
  0x15   : > { %p8408_p1 = scmp.eq.s32.totalorder %s6968_s19, 0  ;;  %p284_p2 = scmp.lt.s32.totalorder %s6868_s16, 5 }
  0x16   : > { %s6871_s21 = smov [#allocation8]   ;;  %s6872_s24 = smov [#allocation11]  }
  0x17   : > { %p6975_p3 = pnand %p4852_p0, %p284_p2  ;;  %s309_s22 = sshll.u32 %s6871_s21, 4  ;;  %s6987_s22 = int_to_ptr.vmem [resolvable:$true] %s309_s22 }
  0x18   : > { %s6989_s25 = sshll.u32 %s6872_s24, 4  ;;  %s8423_s2 = sld [smem:[#allocation30_spill]]  ;;  %s336_s25 = int_to_ptr.vmem [resolvable:$true] %s6989_s25 }
  0x19   : > { %s8420_s20 = scalar_select %p6975_p3, 1, 0 }
  0x1a   : > { %p5871_p4 = pneg %p6975_p3 }
  0x1b   : > { %8421 = sst [smem:[#allocation28_spill]] %s8420_s20 }
  0x1c   : > { %p6983_p5 = pnand %p5871_p4, %p8408_p1 }
  0x1e   : > { %s6494_s28 = scalar_lea.hbm %s8423_s2, 6144  ;;  %p6999_p7 = pneg %p6983_p5 }
  0x1f   : > { %p6495_p6 = scmp.ne.s32.totalorder %s8423_s2, %s6494_s28  ;;  %p6501_p10 = scmp.lt.u32.totalorder %s6494_s28, %s8423_s2 }
  0x21   : > { %p6497_p8 = pnand %p6999_p7, %p6495_p6 }
  0x23   : > { %p6498_p9 = pneg %p6497_p8 }
  0x25   : > { %p6503_p11 = pnand %p6501_p10, %p6498_p9 }
  0x27   : > { %6506 = shalt.err (!%p6503_p11)
}
  0x28   : > { %s6507_s21 = scalar_lea.vmem %s6973_s18, 6144  ;;  %p6515_p2 = scmp.lt.s32.totalorder %s6973_s18, %s6973_s18 }
  0x29   : > { %p6508_p12 = scmp.ne.s32.totalorder %s6973_s18, %s6507_s21  ;;  %p6516_p4 = scmp.lt.s32.totalorder %s6507_s21, %s6507_s21 }
  0x2b   : > { %p6510_p13 = pnand %p6508_p12, %p6999_p7  ;;  %p6517_p6 = por %p6516_p4, %p6515_p2 }
  0x2d   : > { %p6511_p0 = pneg %p6510_p13 }
  0x2f   : > { %p6518_p8 = pnand %p6517_p6, %p6511_p0 }
  0x31   : > { %6521 = shalt.err (!%p6518_p8)
}
  0x32   : > { %s8410_s24 = smov 64   ;;  %s8411_s26 = smov 4  }
  0x33   : > { %5874 = dma.hbm_to_vmem [thread:$0]  (!%p6983_p5), %s8423_s2, 6144, %s6973_s18, [#allocation6], %s8410_s24, %s8410_s24, %s8411_s26  }
  0x34   : > { %s8425_s3 = sld [smem:[#allocation31_spill]] }
  0x3a   : > { %s6522_s12 = scalar_lea.hbm %s8425_s3, 1024 }
  0x3b   : > { %p6523_p9 = scmp.ne.s32.totalorder %s8425_s3, %s6522_s12  ;;  %p6529_p12 = scmp.lt.u32.totalorder %s6522_s12, %s8425_s3 }
  0x3d   : > { %p6525_p10 = pnand %p6523_p9, %p6999_p7 }
  0x3f   : > { %p6526_p11 = pneg %p6525_p10 }
  0x41   : > { %p6531_p13 = pnand %p6529_p12, %p6526_p11 }
  0x43   : > { %6534 = shalt.err (!%p6531_p13)
}
  0x44   : > { %s6535_s18 = scalar_lea.vmem %s6987_s22, 1024  ;;  %p6543_p6 = scmp.lt.s32.totalorder %s6987_s22, %s6987_s22 }
  0x45   : > { %p6536_p0 = scmp.ne.s32.totalorder %s6987_s22, %s6535_s18  ;;  %p6544_p8 = scmp.lt.s32.totalorder %s6535_s18, %s6535_s18 }
  0x47   : > { %p6538_p2 = pnand %p6536_p0, %p6999_p7  ;;  %p6545_p9 = por %p6544_p8, %p6543_p6 }
  0x49   : > { %p6539_p4 = pneg %p6538_p2 }
  0x4b   : > { %p6546_p10 = pnand %p6545_p9, %p6539_p4 }
  0x4d   : > { %6549 = shalt.err (!%p6546_p10)
}
  0x4e   : > { %5877 = dma.hbm_to_vmem [thread:$0]  (!%p6983_p5), %s8425_s3, 1024, %s6987_s22, [#allocation9], %s8410_s24, %s8410_s24, %s8411_s26  }
  0x4f   : > { %s8426_s5 = sld [smem:[#allocation33_spill]] }
  0x55   : > { %s6550_s29 = scalar_lea.hbm %s8426_s5, 6144 }
  0x56   : > { %p6551_p11 = scmp.ne.s32.totalorder %s8426_s5, %s6550_s29  ;;  %p6557_p0 = scmp.lt.u32.totalorder %s6550_s29, %s8426_s5 }
  0x58   : > { %p6553_p12 = pnand %p6551_p11, %p6999_p7 }
  0x5a   : > { %p6554_p13 = pneg %p6553_p12 }
  0x5c   : > { %p6559_p2 = pnand %p6557_p0, %p6554_p13 }
  0x5e   : > { %6562 = shalt.err (!%p6559_p2)
}
  0x5f   : > { %s6563_s18 = scalar_lea.vmem %s336_s25, 6144  ;;  %p6571_p9 = scmp.lt.s32.totalorder %s336_s25, %s336_s25 }
  0x60   : > { %p6564_p4 = scmp.ne.s32.totalorder %s336_s25, %s6563_s18  ;;  %p6572_p10 = scmp.lt.s32.totalorder %s6563_s18, %s6563_s18 }
  0x62   : > { %p6566_p6 = pnand %p6564_p4, %p6999_p7  ;;  %p6573_p1 = por %p6572_p10, %p6571_p9 }
  0x64   : > { %p6567_p8 = pneg %p6566_p6 }
  0x66   : > { %p6574_p3 = pnand %p6573_p1, %p6567_p8 }
  0x68   : > { %6577 = shalt.err (!%p6574_p3)
}
  0x69   : > { %s6875_s22 = smov 192   ;;  %s6876_s10 = smov 12  }
  0x6a   : > { %5883 = dma.hbm_to_vmem [thread:$0]  (!%p6983_p5), %s8426_s5, 6144, %s336_s25, [#allocation12], %s6875_s22, %s6875_s22, %s6876_s10  }
  0x6b   : > { %s6877_s28 = smov [#allocation14]   ;;  %s6878_s30 = smov [#allocation10]  }
  0x6c   : > { %s361_s29 = sshll.u32 %s6877_s28, 4  ;;  %s322_s12 = sshll.u32 %s6878_s30, 4  ;;  %s362_s29 = int_to_ptr.vmem [resolvable:$true] %s361_s29  ;;  %s323_s12 = int_to_ptr.vmem [resolvable:$true] %s322_s12 }
  0x6d   : > { %s6578_s18 = scalar_lea.hbm %s8402_s7, 6144 }
  0x6e   : > { %p6579_p1 = scmp.ne.s32.totalorder %s8402_s7, %s6578_s18  ;;  %p6585_p12 = scmp.lt.u32.totalorder %s6578_s18, %s8402_s7 }
  0x70   : > { %p6581_p3 = pnand %p6579_p1, %p6999_p7 }
  0x72   : > { %p6582_p11 = pneg %p6581_p3 }
  0x74   : > { %p6587_p13 = pnand %p6585_p12, %p6582_p11 }
  0x76   : > { %6590 = shalt.err (!%p6587_p13)
}
  0x77   : > { %s6591_s25 = scalar_lea.vmem %s362_s29, 6144  ;;  %p6599_p6 = scmp.lt.s32.totalorder %s362_s29, %s362_s29 }
  0x78   : > { %p6592_p0 = scmp.ne.s32.totalorder %s362_s29, %s6591_s25  ;;  %p6600_p8 = scmp.lt.s32.totalorder %s6591_s25, %s6591_s25 }
  0x7a   : > { %p6594_p2 = pnand %p6592_p0, %p6999_p7  ;;  %p6601_p9 = por %p6600_p8, %p6599_p6 }
  0x7c   : > { %p6595_p4 = pneg %p6594_p2 }
  0x7e   : > { %p6602_p10 = pnand %p6601_p9, %p6595_p4 }
  0x80   : > { %6605 = shalt.err (!%p6602_p10)
}
  0x81   : > { %5889 = dma.hbm_to_vmem [thread:$0]  (!%p6983_p5), %s8402_s7, 6144, %s362_s29, [#allocation15], %s6875_s22, %s6875_s22, %s6876_s10  }
  0x82   : > { %s8427_s4 = sld [smem:[#allocation32_spill]] }
  0x88   : > { %s6606_s20 = scalar_lea.hbm %s8427_s4, 3072 }
  0x89   : > { %p6607_p1 = scmp.ne.s32.totalorder %s8427_s4, %s6606_s20  ;;  %p6613_p12 = scmp.lt.u32.totalorder %s6606_s20, %s8427_s4 }
  0x8b   : > { %p6609_p3 = pnand %p6607_p1, %p6999_p7 }
  0x8d   : > { %p6610_p11 = pneg %p6609_p3 }
  0x8f   : > { %p6615_p13 = pnand %p6613_p12, %p6610_p11 }
  0x91   : > { %6618 = shalt.err (!%p6615_p13)
}
  0x92   : > { %s6619_s21 = scalar_lea.vmem %s323_s12, 3072  ;;  %p6627_p6 = scmp.lt.s32.totalorder %s323_s12, %s323_s12 }
  0x93   : > { %p6620_p0 = scmp.ne.s32.totalorder %s323_s12, %s6619_s21  ;;  %p6628_p8 = scmp.lt.s32.totalorder %s6619_s21, %s6619_s21 }
  0x95   : > { %p6622_p2 = pnand %p6620_p0, %p6999_p7  ;;  %p6629_p9 = por %p6628_p8, %p6627_p6 }
  0x97   : > { %p6623_p4 = pneg %p6622_p2 }
  0x99   : > { %p6630_p10 = pnand %p6629_p9, %p6623_p4 }
  0x9b   : > { %6633 = shalt.err (!%p6630_p10)
}
  0x9c   : > { %5880 = dma.hbm_to_vmem [thread:$0]  (!%p6983_p5), %s8427_s4, 3072, %s323_s12, [#allocation9], %s6875_s22, %s6875_s22, %s6876_s10  }
  0x9d   : > { %s6879_s25 = smov [#allocation13]   ;;  %s6880_s3 = smov [#allocation16]  }
  0x9e   : > { %s348_s2 = sshll.u32 %s6879_s25, 4  ;;  %s374_s24 = sshll.u32 %s6880_s3, 4  ;;  %s349_s2 = int_to_ptr.vmem [resolvable:$true] %s348_s2  ;;  %s375_s24 = int_to_ptr.vmem [resolvable:$true] %s374_s24 }
  0x9f   : > { %s8428_s6 = sld [smem:[#allocation34_spill]] }
  0xa5   : > { %s6634_s27 = scalar_lea.hbm %s8428_s6, 3072 }
  0xa6   : > { %p6635_p1 = scmp.ne.s32.totalorder %s8428_s6, %s6634_s27  ;;  %p6641_p12 = scmp.lt.u32.totalorder %s6634_s27, %s8428_s6 }
  0xa8   : > { %p6637_p3 = pnand %p6635_p1, %p6999_p7 }
  0xaa   : > { %p6638_p11 = pneg %p6637_p3 }
  0xac   : > { %p6643_p13 = pnand %p6641_p12, %p6638_p11 }
  0xae   : > { %6646 = shalt.err (!%p6643_p13)
}
  0xaf   : > { %s6647_s12 = scalar_lea.vmem %s349_s2, 3072  ;;  %p6655_p6 = scmp.lt.s32.totalorder %s349_s2, %s349_s2 }
  0xb0   : > { %p6648_p0 = scmp.ne.s32.totalorder %s349_s2, %s6647_s12  ;;  %p6656_p8 = scmp.lt.s32.totalorder %s6647_s12, %s6647_s12 }
  0xb2   : > { %p6650_p2 = pnand %p6648_p0, %p6999_p7  ;;  %p6657_p9 = por %p6656_p8, %p6655_p6 }
  0xb4   : > { %p6651_p4 = pneg %p6650_p2 }
  0xb6   : > { %p6658_p10 = pnand %p6657_p9, %p6651_p4 }
  0xb8   : > { %6661 = shalt.err (!%p6658_p10)
}
  0xb9   : > { %5886 = dma.hbm_to_vmem [thread:$0]  (!%p6983_p5), %s8428_s6, 3072, %s349_s2, [#allocation12], %s6875_s22, %s6875_s22, %s6876_s10  }
  0xba   : > { %s6662_s26 = scalar_lea.hbm %s8403_s8, 1024 }
  0xbb   : > { %p6663_p1 = scmp.ne.s32.totalorder %s8403_s8, %s6662_s26  ;;  %p6669_p12 = scmp.lt.u32.totalorder %s6662_s26, %s8403_s8 }
  0xbd   : > { %p6665_p3 = pnand %p6663_p1, %p6999_p7 }
  0xbf   : > { %p6666_p11 = pneg %p6665_p3 }
  0xc1   : > { %p6671_p13 = pnand %p6669_p12, %p6666_p11 }
  0xc3   : > { %6674 = shalt.err (!%p6671_p13)
}
  0xc4   : > { %s6675_s17 = scalar_lea.vmem %s375_s24, 1024  ;;  %p6683_p6 = scmp.lt.s32.totalorder %s375_s24, %s375_s24 }
  0xc5   : > { %p6676_p0 = scmp.ne.s32.totalorder %s375_s24, %s6675_s17  ;;  %p6684_p8 = scmp.lt.s32.totalorder %s6675_s17, %s6675_s17 }
  0xc7   : > { %p6678_p2 = pnand %p6676_p0, %p6999_p7  ;;  %p6685_p9 = por %p6684_p8, %p6683_p6 }
  0xc9   : > { %p6679_p4 = pneg %p6678_p2 }
  0xcb   : > { %p6686_p10 = pnand %p6685_p9, %p6679_p4 }
  0xcd   : > { %6689 = shalt.err (!%p6686_p10)
}
  0xce   : > { %s8429_s22 = smov 4   ;;  %s8430_s10 = smov 64  }
  0xcf   : > { %5892 = dma.hbm_to_vmem [thread:$0]  (!%p6983_p5), %s8403_s8, 1024, %s375_s24, [#allocation15], %s8430_s10, %s8430_s10, %s8429_s22  }
  0xd0   : > { %s6881_s12 = smov [#allocation17]   ;;  %s6690_s3 = scalar_lea.hbm %s8404_s9, 384 }
  0xd1   : > { %s388_s29 = sshll.u32 %s6881_s12, 4  ;;  %p6691_p1 = scmp.ne.s32.totalorder %s8404_s9, %s6690_s3  ;;  %s389_s29 = int_to_ptr.vmem [resolvable:$true] %s388_s29 }
  0xd2   : > { %p6697_p12 = scmp.lt.u32.totalorder %s6690_s3, %s8404_s9 }
  0xd3   : > { %p6693_p3 = pnand %p6691_p1, %p6999_p7 }
  0xd5   : > { %p6694_p11 = pneg %p6693_p3 }
  0xd7   : > { %p6699_p13 = pnand %p6697_p12, %p6694_p11 }
  0xd9   : > { %6702 = shalt.err (!%p6699_p13)
}
  0xda   : > { %s6703_s24 = scalar_lea.vmem %s389_s29, 384  ;;  %p6711_p6 = scmp.lt.s32.totalorder %s389_s29, %s389_s29 }
  0xdb   : > { %p6704_p0 = scmp.ne.s32.totalorder %s389_s29, %s6703_s24  ;;  %p6712_p8 = scmp.lt.s32.totalorder %s6703_s24, %s6703_s24 }
  0xdd   : > { %p6706_p2 = pnand %p6704_p0, %p6999_p7  ;;  %p6713_p9 = por %p6712_p8, %p6711_p6 }
  0xdf   : > { %p6707_p4 = pneg %p6706_p2 }
  0xe1   : > { %p6714_p10 = pnand %p6713_p9, %p6707_p4 }
  0xe3   : > { %6717 = shalt.err (!%p6714_p10)
}
  0xe4   : > { %5895 = dma.hbm_to_vmem [thread:$0]  (!%p6983_p5), %s8404_s9, 384, %s389_s29, [#allocation18]  }
  0xe5   : > { %s4851_s11 = sadd.s32 4294967294, %s6868_s16   ;;  %s7175_s23 = sadd.s32 1, %s6868_s16  }
  0xe6   : > { %s37_s22 = ssub.s32 %s6868_s16, %s7175_s23  ;;  %s40_s10 = sadd.s32 1, %s6864_s15 }
  0xe7   : > { %p38_p7 = scmp.eq.s32.totalorder %s37_s22, 0  ;;  %p47_p1 = scmp.ne.s32.totalorder %s6864_s15, %s6860_s14 }
  0xe8   : > { %p48_p3 = scmp.eq.s32.totalorder %s6868_s16, 0  ;;  %p53_p11 = scmp.ne.s32.totalorder %s6860_s14, %s6856_s13 }
  0xe9   : > { %s7186_s2 = scalar_select %p38_p7, %s6864_s15, %s40_s10  }
  0xea   : > { %p49_p12 = por %p48_p3, %p47_p1  ;;  %p8431_p13 = scmp.eq.s32.totalorder %s6968_s19, 0 }
  0xeb   : > { %p271_p5 = scmp.eq.s32.totalorder %s6968_s19, 3  ;;  %p277_p2 = scmp.eq.s32.totalorder %s4851_s11, 3 }
  0xec   : > { %p7190_p0 = por %p8431_p13, %p53_p11  ;;  %p5915_p4 = scmp.lt.s32.totalorder %s6868_s16, 4 }
  0xed   : > { %s7197_s12 = sand.u32 1, %s6864_s15   ;;  %p7199_p6 = por %p271_p5, %p47_p1 }
  0xee   : > { %p7203_p8 = por %p277_p2, %p53_p11  ;;  %s5830_s25 = smul.u32 768, %s7197_s12 }
  0xef   : > { %s8433_s29 = scalar_select %p7199_p6, 1, 0 }
  0xf0   : > { %s8434_s18 = scalar_select %p7203_p8, 1, 0 }
  0xf1   : > { %s5831_s3 = smul.u32 12288, %s6868_s16  ;;  %p7209_p9 = pnand %p5915_p4, %p49_p12 }
  0xf2   : > { %s8436_s0 = sld [smem:[#allocation29_spill]]  ;;  %s403_s24 = scalar_lea.vmem [#allocation2], %s5830_s25 }
  0xf3   : > { %s411_s30 = sshll.u32 %s403_s24, 4  ;;  %s400_s11 = scalar_lea.sflag [#allocation3], %s7197_s12  ;;  %s7218_s30 = int_to_ptr.vmem [resolvable:$true] %s411_s30 }
  0xf4   : > { %p6720_p7 = pneg %p7209_p9 }
  0xf8   : > { %s7216_s28 = scalar_lea.hbm %s8436_s0, %s5831_s3  ;;  %s6723_s20 = scalar_lea.hbm %s8436_s0, 49152 }
  0xf9   : > { %s6718_s22 = scalar_lea.hbm %s7216_s28, 12288  ;;  %p6724_p11 = scmp.lt.u32.totalorder %s7216_s28, %s8436_s0 }
  0xfa   : > { %p6719_p10 = scmp.ne.s32.totalorder %s7216_s28, %s6718_s22  ;;  %p6725_p12 = scmp.lt.u32.totalorder %s6723_s20, %s6718_s22 }
  0xfb   : > { %p6727_p5 = scmp.lt.u32.totalorder %s6718_s22, %s7216_s28 }
  0xfc   : > { %p6721_p1 = pnand %p6720_p7, %p6719_p10  ;;  %p6726_p13 = por %p6725_p12, %p6724_p11 }
  0xfe   : > { %p6722_p3 = pneg %p6721_p1  ;;  %p6728_p2 = por %p6727_p5, %p6726_p13 }
 0x100   : > { %p6729_p4 = pnand %p6728_p2, %p6722_p3 }
 0x102   : > { %6732 = shalt.err (!%p6729_p4)
}
 0x103   : > { %s6733_s25 = scalar_lea.vmem %s7218_s30, 12288  ;;  %s6882_s24 = smov [#allocation2]  }
 0x104   : > { %p6734_p10 = scmp.ne.s32.totalorder %s7218_s30, %s6733_s25  ;;  %s6738_s10 = sshll.u32 %s6882_s24, 4  ;;  %s6739_s10 = int_to_ptr.vmem [resolvable:$false] %s6738_s10 }
 0x105   : > { %s6740_s4 = scalar_lea.vmem %s6739_s10, 24576  ;;  %p6741_p6 = scmp.lt.s32.totalorder %s7218_s30, %s6739_s10 }
 0x106   : > { %p6736_p1 = pnand %p6734_p10, %p6720_p7  ;;  %p6742_p11 = scmp.lt.s32.totalorder %s6740_s4, %s6733_s25 }
 0x108   : > { %p6737_p8 = pneg %p6736_p1  ;;  %p6743_p12 = por %p6742_p11, %p6741_p6 }
 0x10a   : > { %p6744_p13 = pnand %p6743_p12, %p6737_p8 }
 0x10c   : > { %6747 = shalt.err (!%p6744_p13)
}
 0x10d   : > { %s6883_s22 = smov 768   ;;  %s6884_s3 = smov 48  }
 0x10e   : > { %5899 = dma.hbm_to_vmem [thread:$0]  (!%p7209_p9), %s7216_s28, 12288, %s7218_s30, %s400_s11, %s6883_s22, %s6883_s22, %s6884_s3  }
 0x10f   : > { %s4865_s20 = sshll.u32 %s7197_s12, 7  ;;  %s5124_s27 = sshll.u32 %s6868_s16, 11 }
 0x110   : > { %s7254_s10 = scalar_lea.hbm %s8396_s1, %s5124_s27  ;;  %s425_s4 = scalar_lea.vmem [#allocation5], %s4865_s20 }
 0x111   : > { %s432_s17 = sshll.u32 %s425_s4, 4  ;;  %s8437_s0 = sand.u32 1, %s6868_s16   ;;  %s7256_s17 = int_to_ptr.vmem [resolvable:$true] %s432_s17 }
 0x112   : > { %s7260_s5 = scalar_lea.sflag [#allocation6], %s8437_s0  ;;  %s6748_s6 = scalar_lea.hbm %s7254_s10, 2048 }
 0x113   : > { %p6749_p6 = scmp.ne.s32.totalorder %s7254_s10, %s6748_s6  ;;  %s6753_s30 = scalar_lea.hbm %s8396_s1, 8192 }
 0x114   : > { %p6754_p5 = scmp.lt.u32.totalorder %s7254_s10, %s8396_s1  ;;  %p6755_p2 = scmp.lt.u32.totalorder %s6753_s30, %s6748_s6 }
 0x115   : > { %p6751_p8 = pnand %p6749_p6, %p6720_p7  ;;  %p6757_p10 = scmp.lt.u32.totalorder %s6748_s6, %s7254_s10 }
 0x116   : > { %p6756_p4 = por %p6755_p2, %p6754_p5 }
 0x117   : > { %p6752_p3 = pneg %p6751_p8 }
 0x118   : > { %p6758_p1 = por %p6757_p10, %p6756_p4 }
 0x11a   : > { %p6759_p11 = pnand %p6758_p1, %p6752_p3 }
 0x11c   : > { %6762 = shalt.err (!%p6759_p11)
}
 0x11d   : > { %s6763_s0 = scalar_lea.vmem %s7256_s17, 2048  ;;  %s6885_s3 = smov [#allocation5]  }
 0x11e   : > { %p6764_p12 = scmp.ne.s32.totalorder %s7256_s17, %s6763_s0  ;;  %s6768_s20 = sshll.u32 %s6885_s3, 4  ;;  %s6769_s20 = int_to_ptr.vmem [resolvable:$false] %s6768_s20 }
 0x11f   : > { %s6770_s27 = scalar_lea.vmem %s6769_s20, 4096  ;;  %p6771_p8 = scmp.lt.s32.totalorder %s7256_s17, %s6769_s20 }
 0x120   : > { %p6766_p13 = pnand %p6764_p12, %p6720_p7  ;;  %p6772_p5 = scmp.lt.s32.totalorder %s6770_s27, %s6763_s0 }
 0x122   : > { %p6767_p6 = pneg %p6766_p13  ;;  %p6773_p2 = por %p6772_p5, %p6771_p8 }
 0x124   : > { %p6774_p4 = pnand %p6773_p2, %p6767_p6 }
 0x126   : > { %6777 = shalt.err (!%p6774_p4)
}
 0x127   : > { %s6886_s6 = smov 128   ;;  %s6887_s24 = smov 8  }
 0x128   : > { %5902 = dma.hbm_to_vmem [thread:$0]  (!%p7209_p9), %s7254_s10, 2048, %s7256_s17, %s7260_s5, %s6886_s6, %s6886_s6, %s6887_s24  }
 0x129   : > { %s8438_s25 = sld [smem:[#allocation28_spill]] }
 0x12f   : > { %p8439_p7 = scmp.ne.s32.totalorder %s8438_s25, 0 }
 0x130   : > { %s7289_s4 = sand.u32 (!%p8439_p7), 1, %s6860_s14  }
 0x131   : > { %444 = sbr.rel (%p8439_p7) target bundleno = 3327 (0xcff), region = 60  ;;  %s447_s28 = scalar_lea.sflag (!%p8439_p7), [#allocation3], %s7289_s4 }
 0x132   : > { %s5832_s12 = smul.u32 (!%p8439_p7), 768, %s7289_s4 }
 0x134   : > { %s7293_s30 = scalar_lea.vmem (!%p8439_p7), [#allocation2], %s5832_s12 }
 0x138   : > { %6823 = dma.done.wait (%p7190_p0), %s447_s28, 12288  }
 0x139   : > { %6825 = vsyncadd (%p7190_p0), %s447_s28, 4294955008  ;;  %s455_s5 = sand.u32 1, %s6968_s19   ;;  %s4869_s26 = sshll.u32 %s7289_s4, 7 }
 0x13a   : > { %s456_s17 = scalar_lea.sflag [#allocation6], %s455_s5  ;;  %s7303_s10 = scalar_lea.vmem [#allocation5], %s4869_s26 }
 0x13b   : > { %6827 = dma.done.wait (%p7190_p0), %s456_s17, 2048  }
 0x13c   : > { %6829 = vsyncadd (%p7190_p0), %s456_s17, 4294965248  ;;  %p8440_p9 = scmp.eq.s32.totalorder %s6968_s19, 0 }
 0x13e   : > { %6831 = dma.done.wait (%p8440_p9), [#allocation6], 6144   ;;  %p8441_p3 = pmov %p8440_p9 }
 0x140   : > { %6833 = vsyncadd (%p8441_p3), [#allocation6], 4294961152  ;;  %p8442_p10 = pmov %p8441_p3 }
 0x141   : > { %p8443_p1 = pmov %p8441_p3 }
 0x142   : > { %6835 = dma.done.wait (%p8442_p10), [#allocation9], 4096  }
 0x143   : > { %6837 = vsyncadd (%p8443_p1), [#allocation9], 4294963200  ;;  %p8444_p11 = pmov %p8443_p1 }
 0x144   : > { %p8445_p12 = pmov %p8443_p1 }
 0x145   : > { %6839 = dma.done.wait (%p8444_p11), [#allocation12], 9216  }
 0x146   : > { %6841 = vsyncadd (%p8445_p12), [#allocation12], 4294958080  ;;  %p8446_p0 = pmov %p8443_p1 }
 0x148   : > { %6843 = dma.done.wait (%p8446_p0), [#allocation15], 7168   ;;  %p8447_p13 = pmov %p8446_p0 }
 0x149   : > { %p8448_p6 = pmov %p8446_p0 }
 0x14a   : > { %6845 = vsyncadd (%p8447_p13), [#allocation15], 4294960128 }
 0x14b   : > { %6847 = dma.done.wait (%p8448_p6), [#allocation18], 384   ;;  %p8449_p8 = pmov %p8446_p0 }
 0x14c   : > { %v5976_v0 = vld [vmem:[#allocation7 + $0x40] sm:$0xff]   ;;  %v5980_v4 = vld [vmem:[#allocation7 + $0x48] sm:$0xff]   ;;  %v5984_v8 = vld [vmem:[#allocation7 + $0x50] sm:$0xff]   ;;  %s8327_s21 = scalar_lea.vmem [#allocation19], %s4869_s26  ;;  %s5125_s11 = sshll.u32 %s6968_s19, 11 }
 0x14d   : > { %6849 = vsyncadd (%p8449_p8), [#allocation18], 4294966912  ;;  %v5977_v1 = vld [vmem:[#allocation7] sm:$0xff]   ;;  %5126 = vmatprep.subr.bf16.mxu0 %v5976_v0  ;;  %v5981_v5 = vld [vmem:[#allocation7 + $0x8] sm:$0xff]   ;;  %s4679_s22 = sshll.u32 %s8327_s21, 4  ;;  %s8450_s20 = sld [smem:[#allocation35_spill]]  ;;  %s8349_s22 = int_to_ptr.vmem [resolvable:$true] %s4679_s22 }
 0x14e   : > { %v5978_v2 = vld [vmem:[#allocation7 + $0xc0] sm:$0xff]   ;;  %5127 = vmatpush3.bf16.msra.mxu0 %v5977_v1  ;;  %v5982_v6 = vld [vmem:[#allocation7 + $0xc8] sm:$0xff]   ;;  %v5985_v9 = vld [vmem:[#allocation7 + $0x10] sm:$0xff]   ;;  %s4666_s19 = scalar_lea.sflag [#allocation4], %s7289_s4  ;;  %s6778_s6 = scalar_lea.vmem %s8349_s22, 2048 }
 0x14f   : > { %v5979_v3 = vld [vmem:[#allocation7 + $0x80] sm:$0xff]   ;;  %5190 = vmatprep.subr.bf16.mxu1 %v5978_v2  ;;  %5128 = vmatprep.subr.bf16.mxu0 %v5980_v4  ;;  %v5983_v7 = vld [vmem:[#allocation7 + $0x88] sm:$0xff]   ;;  %v5986_v10 = vld [vmem:[#allocation7 + $0xd0] sm:$0xff]   ;;  %p6779_p5 = scmp.ne.s32.totalorder %s8349_s22, %s6778_s6  ;;  %p8451_p2 = scmp.ne.s32.totalorder %s8433_s29, 0 }
 0x150   : > { %5191 = vmatpush3.bf16.msra.mxu1 %v5979_v3  ;;  %v5987_v11 = vld [vmem:[#allocation7 + $0x90] sm:$0xff]   ;;  %v5988_v12 = vld [vmem:[#allocation7 + $0x58] sm:$0xff]   ;;  %v5992_v16 = vld [vmem:[#allocation7 + $0x60] sm:$0xff]   ;;  %s6889_s24 = smov [#allocation19]  }
 0x151   : > { %5192 = vmatprep.subr.bf16.mxu1 %v5982_v6  ;;  %v5989_v13 = vld [vmem:[#allocation7 + $0x18] sm:$0xff]   ;;  %v5993_v17 = vld [vmem:[#allocation7 + $0x20] sm:$0xff]   ;;  %v5996_v20 = vld [vmem:[#allocation7 + $0x68] sm:$0xff]   ;;  %p6780_p4 = pnand %p6779_p5, %p8451_p2  ;;  %s6782_s25 = sshll.u32 %s6889_s24, 4  ;;  %s6783_s25 = int_to_ptr.vmem [resolvable:$false] %s6782_s25 }
 0x152   : > { %5129 = vmatpush3.bf16.msra.mxu0 %v5981_v5  ;;  %v5990_v14 = vld [vmem:[#allocation7 + $0xd8] sm:$0xff]   ;;  %v5994_v18 = vld [vmem:[#allocation7 + $0xe0] sm:$0xff]   ;;  %v5997_v21 = vld [vmem:[#allocation7 + $0x28] sm:$0xff]   ;;  %s6784_s12 = scalar_lea.vmem %s6783_s25, 4096  ;;  %p6785_p9 = scmp.lt.s32.totalorder %s8349_s22, %s6783_s25 }
 0x153   : > { %5130 = vmatprep.subr.bf16.mxu0 %v5984_v8  ;;  %v5991_v15 = vld [vmem:[#allocation7 + $0x98] sm:$0xff]   ;;  %v5995_v19 = vld [vmem:[#allocation7 + $0xa0] sm:$0xff]   ;;  %v5998_v22 = vld [vmem:[#allocation7 + $0xe8] sm:$0xff]   ;;  %s8347_s27 = scalar_lea.hbm %s8450_s20, %s5125_s11  ;;  %p6781_p7 = pneg %p6780_p4 }
 0x154   : > { %5193 = vmatpush3.bf16.msra.mxu1 %v5983_v7  ;;  %v5999_v23 = vld [vmem:[#allocation7 + $0xa8] sm:$0xff]   ;;  %v6000_v24 = vld [vmem:[#allocation7 + $0x70] sm:$0xff]   ;;  %v6004_v28 = vld [vmem:[#allocation7 + $0x78] sm:$0xff]   ;;  %p6786_p3 = scmp.lt.s32.totalorder %s6784_s12, %s6778_s6 }
 0x155   : > { %5194 = vmatprep.subr.bf16.mxu1 %v5986_v10  ;;  %v6001_v25 = vld [vmem:[#allocation7 + $0x30] sm:$0xff]   ;;  %v6005_v29 = vld [vmem:[#allocation7 + $0x38] sm:$0xff]   ;;  %v541_v31 = vld [vmem:[%s7293_s30 + $0x8] sm:$0xff] }
 0x156   : > { %5131 = vmatpush3.bf16.msra.mxu0 %v5985_v9  ;;  %v6002_v26 = vld [vmem:[#allocation7 + $0xf0] sm:$0xff]   ;;  %v6006_v30 = vld [vmem:[#allocation7 + $0xf8] sm:$0xff]   ;;  %v540_v35 = vld [vmem:[%s7293_s30] sm:$0xff]  ;;  %p6787_p10 = por %p6786_p3, %p6785_p9 }
 0x157   : > { %5132 = vmatprep.subr.bf16.mxu0 %v5988_v12  ;;  %v6003_v27 = vld [vmem:[#allocation7 + $0xb0] sm:$0xff]   ;;  %v547_v32 = vld [vmem:[%s7293_s30 + $0x38] sm:$0xff]  ;;  %v6008_v38 = vld [vmem:[#allocation7 + $0x140] sm:$0xff]  }
 0x158   : > { %5195 = vmatpush3.bf16.msra.mxu1 %v5987_v11  ;;  %v637_v33 = vpack.c.bf16 %v547_v32, %v541_v31  ;;  %v6007_v34 = vld [vmem:[#allocation7 + $0xb8] sm:$0xff]   ;;  %v546_v36 = vld [vmem:[%s7293_s30 + $0x30] sm:$0xff]  ;;  %v549_v40 = vld [vmem:[%s7293_s30 + $0x48] sm:$0xff]  ;;  %p6788_p1 = pnand %p6787_p10, %p6781_p7 }
 0x159   : > { %5196 = vmatprep.subr.bf16.mxu1 %v5990_v14  ;;  %v636_v37 = vpack.c.bf16 %v546_v36, %v540_v35  ;;  %v543_v39 = vld [vmem:[%s7293_s30 + $0x18] sm:$0xff]  ;;  %v6009_v42 = vld [vmem:[#allocation7 + $0x100] sm:$0xff]   ;;  %v542_v43 = vld [vmem:[%s7293_s30 + $0x10] sm:$0xff] }
 0x15a   : > { %5133 = vmatpush3.bf16.msra.mxu0 %v5989_v13  ;;  %1104 = vmatprep.mubr.bf16.mxu0 %v637_v33  ;;  %v639_v41 = vpack.c.bf16 %v549_v40, %v543_v39  ;;  %v548_v44 = vld [vmem:[%s7293_s30 + $0x40] sm:$0xff]  ;;  %v553_v45 = vld [vmem:[%s7293_s30 + $0x68] sm:$0xff]  ;;  %v559_v47 = vld [vmem:[%s7293_s30 + $0x98] sm:$0xff] }
 0x15b   : > { %5134 = vmatprep.subr.bf16.mxu0 %v5992_v16  ;;  %v638_v46 = vpack.c.bf16 %v548_v44, %v542_v43  ;;  %v552_v48 = vld [vmem:[%s7293_s30 + $0x60] sm:$0xff]  ;;  %v558_v49 = vld [vmem:[%s7293_s30 + $0x90] sm:$0xff]  ;;  %v643_v50 = vpack.c.bf16 %v559_v47, %v553_v45  ;;  %v6010_v51 = vld [vmem:[#allocation7 + $0x148] sm:$0xff]  }
 0x15c   : > { %5197 = vmatpush3.bf16.msra.mxu1 %v5991_v15  ;;  %1201 = vmatprep.mubr.bf16.mxu1 %v639_v41  ;;  %v555_v52 = vld [vmem:[%s7293_s30 + $0x78] sm:$0xff]  ;;  %v561_v53 = vld [vmem:[%s7293_s30 + $0xa8] sm:$0xff]  ;;  %v642_v54 = vpack.c.bf16 %v558_v49, %v552_v48  ;;  %v554_v57 = vld [vmem:[%s7293_s30 + $0x70] sm:$0xff] }
 0x15d   : > { %5198 = vmatprep.subr.bf16.mxu1 %v5994_v18  ;;  %v645_v55 = vpack.c.bf16 %v561_v53, %v555_v52  ;;  %v6011_v56 = vld [vmem:[#allocation7 + $0x108] sm:$0xff]   ;;  %v560_v58 = vld [vmem:[%s7293_s30 + $0xa0] sm:$0xff]  ;;  %v571_v60 = vld [vmem:[%s7293_s30 + $0xf8] sm:$0xff] }
 0x15e   : > { %5135 = vmatpush3.bf16.msra.mxu0 %v5993_v17  ;;  %v565_v59 = vld [vmem:[%s7293_s30 + $0xc8] sm:$0xff]  ;;  %v644_v62 = vpack.c.bf16 %v560_v58, %v554_v57  ;;  %v6012_v63 = vld [vmem:[#allocation7 + $0x150] sm:$0xff]   ;;  %v567_v0 = vld [vmem:[%s7293_s30 + $0xd8] sm:$0xff] }
 0x15f   : > { %5136 = vmatprep.subr.bf16.mxu0 %v5996_v20  ;;  %v649_v61 = vpack.c.bf16 %v571_v60, %v565_v59  ;;  %v573_v1 = vld [vmem:[%s7293_s30 + $0x108] sm:$0xff]  ;;  %v564_v2 = vld [vmem:[%s7293_s30 + $0xc0] sm:$0xff]  ;;  %v570_v3 = vld [vmem:[%s7293_s30 + $0xf0] sm:$0xff] }
 0x160   : > { %5199 = vmatpush3.bf16.msra.mxu1 %v5995_v19  ;;  %v651_v4 = vpack.c.bf16 %v573_v1, %v567_v0  ;;  %v6013_v5 = vld [vmem:[#allocation7 + $0x110] sm:$0xff]   ;;  %v577_v7 = vld [vmem:[%s7293_s30 + $0x128] sm:$0xff]  ;;  %v583_v8 = vld [vmem:[%s7293_s30 + $0x158] sm:$0xff]  ;;  %v648_v10 = vpack.c.bf16 %v570_v3, %v564_v2 }
 0x161   : > { %5200 = vmatprep.subr.bf16.mxu1 %v5998_v22  ;;  %v566_v6 = vld [vmem:[%s7293_s30 + $0xd0] sm:$0xff]  ;;  %v572_v9 = vld [vmem:[%s7293_s30 + $0x100] sm:$0xff]  ;;  %v6014_v11 = vld [vmem:[#allocation7 + $0x158] sm:$0xff]   ;;  %v655_v14 = vpack.c.bf16 %v583_v8, %v577_v7 }
 0x162   : > { %5137 = vmatpush3.bf16.msra.mxu0 %v5997_v21  ;;  %v579_v12 = vld [vmem:[%s7293_s30 + $0x138] sm:$0xff]  ;;  %v585_v13 = vld [vmem:[%s7293_s30 + $0x168] sm:$0xff]  ;;  %v650_v16 = vpack.c.bf16 %v572_v9, %v566_v6  ;;  %v576_v17 = vld [vmem:[%s7293_s30 + $0x120] sm:$0xff] }
 0x163   : > { %5138 = vmatprep.subr.bf16.mxu0 %v6000_v24  ;;  %v6015_v15 = vld [vmem:[#allocation7 + $0x118] sm:$0xff]   ;;  %v657_v18 = vpack.c.bf16 %v585_v13, %v579_v12  ;;  %v6016_v19 = vld [vmem:[#allocation7 + $0x160] sm:$0xff]   ;;  %v582_v20 = vld [vmem:[%s7293_s30 + $0x150] sm:$0xff] }
 0x164   : > { %5201 = vmatpush3.bf16.msra.mxu1 %v5999_v23  ;;  %v589_v21 = vld [vmem:[%s7293_s30 + $0x188] sm:$0xff]  ;;  %v595_v22 = vld [vmem:[%s7293_s30 + $0x1b8] sm:$0xff]  ;;  %v6017_v23 = vld [vmem:[#allocation7 + $0x120] sm:$0xff]  }
 0x165   : > { %5202 = vmatprep.subr.bf16.mxu1 %v6002_v26  ;;  %v578_v24 = vld [vmem:[%s7293_s30 + $0x130] sm:$0xff]  ;;  %v584_v26 = vld [vmem:[%s7293_s30 + $0x160] sm:$0xff]  ;;  %v6019_v32 = vld [vmem:[#allocation7 + $0x128] sm:$0xff]  }
 0x166   : > { %5139 = vmatpush3.bf16.msra.mxu0 %v6001_v25  ;;  %v654_v25 = vpack.c.bf16 %v582_v20, %v576_v17  ;;  %v656_v31 = vpack.c.bf16 %v584_v26, %v578_v24  ;;  %v588_v33 = vld [vmem:[%s7293_s30 + $0x180] sm:$0xff]  ;;  %v594_v35 = vld [vmem:[%s7293_s30 + $0x1b0] sm:$0xff]  ;;  %v601_v36 = vld [vmem:[%s7293_s30 + $0x1e8] sm:$0xff] }
 0x167   : > { %5140 = vmatprep.subr.bf16.mxu0 %v6004_v28  ;;  %v661_v28 = vpack.c.bf16 %v595_v22, %v589_v21  ;;  %v6021_v39 = vld [vmem:[#allocation7 + $0x130] sm:$0xff]   ;;  %v660_v40 = vpack.c.bf16 %v594_v35, %v588_v33  ;;  %v603_v44 = vld [vmem:[%s7293_s30 + $0x1f8] sm:$0xff]  ;;  %v609_v45 = vld [vmem:[%s7293_s30 + $0x228] sm:$0xff] }
 0x168   : > { %5203 = vmatpush3.bf16.msra.mxu1 %v6003_v27  ;;  %v591_v27 = vld [vmem:[%s7293_s30 + $0x198] sm:$0xff]  ;;  %v590_v41 = vld [vmem:[%s7293_s30 + $0x190] sm:$0xff]  ;;  %v669_v48 = vpack.c.bf16 %v609_v45, %v603_v44  ;;  %v613_v52 = vld [vmem:[%s7293_s30 + $0x248] sm:$0xff] }
 0x169   : > { %5204 = vmatprep.subr.bf16.mxu1 %v6006_v30  ;;  %v6018_v30 = vld [vmem:[#allocation7 + $0x168] sm:$0xff]   ;;  %v6023_v49 = vld [vmem:[#allocation7 + $0x138] sm:$0xff]   ;;  %v614_v0 = vld [vmem:[%s7293_s30 + $0x250] sm:$0xff] }
 0x16a   : > { %5141 = vmatpush3.bf16.msra.mxu0 %v6005_v29  ;;  %v597_v29 = vld [vmem:[%s7293_s30 + $0x1c8] sm:$0xff]  ;;  %v619_v53 = vld [vmem:[%s7293_s30 + $0x278] sm:$0xff]  ;;  %v620_v3 = vld [vmem:[%s7293_s30 + $0x280] sm:$0xff] }
 0x16b   : > { %5254 = vmatprep.subr.bf16.mxu0 %v6008_v38  ;;  %v6020_v38 = vld [vmem:[#allocation7 + $0x170] sm:$0xff]   ;;  %v673_v57 = vpack.c.bf16 %v619_v53, %v613_v52  ;;  %v615_v58 = vld [vmem:[%s7293_s30 + $0x258] sm:$0xff]  ;;  %v621_v59 = vld [vmem:[%s7293_s30 + $0x288] sm:$0xff] }
 0x16c   : > { %5205 = vmatpush3.bf16.msra.mxu1 %v6007_v34  ;;  %v663_v34 = vpack.c.bf16 %v597_v29, %v591_v27  ;;  %v625_v1 = vld [vmem:[%s7293_s30 + $0x2a8] sm:$0xff]  ;;  %v631_v2 = vld [vmem:[%s7293_s30 + $0x2d8] sm:$0xff]  ;;  %v6024_v7 = vld [vmem:[#allocation8] sm:$0xff]  }
 0x16d   : > { %1105 = vmatmul.mubr.bf16.vlgmr.msra.gmra.mrb[0].mxu0 %v636_v37  ;;  %v607_v37 = vld [vmem:[%s7293_s30 + $0x218] sm:$0xff]  ;;  %v679_v8 = vpack.c.bf16 %v631_v2, %v625_v1  ;;  %v6025_v9 = vld [vmem:[#allocation8 + $0x8] sm:$0xff]   ;;  %5574 = vmatprep.subr.bf16.mxu1 %v6024_v7  ;;  %v630_v12 = vld [vmem:[%s7293_s30 + $0x2d0] sm:$0xff] }
 0x16e   : > { %5255 = vmatpush3.bf16.msra.mxu0 %v6009_v42  ;;  %1112 = vmatprep.mubr.bf16.mxu0 %v643_v50  ;;  %v596_v42 = vld [vmem:[%s7293_s30 + $0x1c0] sm:$0xff]  ;;  %v667_v43 = vpack.c.bf16 %v607_v37, %v601_v36  ;;  %v6026_v13 = vld [vmem:[#allocation8 + $0x10] sm:$0xff]   ;;  %v557_v24 = vld [vmem:[%s7293_s30 + $0x88] sm:$0xff] }
 0x16f   : > { %1202 = vmatmul.mubr.bf16.vlgmr.msra.gmra.mrb[0].mxu1 %v638_v46  ;;  %5256 = vmatprep.subr.bf16.mxu0 %v6010_v51  ;;  %v6022_v46 = vld [vmem:[#allocation7 + $0x178] sm:$0xff]   ;;  %v662_v47 = vpack.c.bf16 %v596_v42, %v590_v41  ;;  %v600_v50 = vld [vmem:[%s7293_s30 + $0x1e0] sm:$0xff]  ;;  %v606_v51 = vld [vmem:[%s7293_s30 + $0x210] sm:$0xff] }
 0x170   : > { %1209 = vmatprep.mubr.bf16.mxu1 %v645_v55  ;;  %v602_v55 = vld [vmem:[%s7293_s30 + $0x1f0] sm:$0xff]  ;;  %5575 = vmatpush3.bf16.msra.mxu1 %v6024_v7  ;;  %v544_v22 = vld [vmem:[%s7293_s30 + $0x20] sm:$0xff]  ;;  %v581_v36 = vld [vmem:[%s7293_s30 + $0x148] sm:$0xff] }
 0x171   : > { %5576 = vmatprep.subr.bf16.mxu1 %v6025_v9  ;;  %v626_v17 = vld [vmem:[%s7293_s30 + $0x2b0] sm:$0xff]  ;;  %v587_v37 = vld [vmem:[%s7293_s30 + $0x178] sm:$0xff]  ;;  %v593_v42 = vld [vmem:[%s7293_s30 + $0x1a8] sm:$0xff] }
 0x172   : > { %5257 = vmatpush3.bf16.msra.mxu0 %v6011_v56  ;;  %v608_v56 = vld [vmem:[%s7293_s30 + $0x220] sm:$0xff]  ;;  %v562_v29 = vld [vmem:[%s7293_s30 + $0xb0] sm:$0xff]  ;;  %v6031_v7 = vld [vmem:[#allocation8 + $0x38] sm:$0xff]  }
 0x173   : > { %5258 = vmatprep.subr.bf16.mxu0 %v6012_v63  ;;  %v668_v60 = vpack.c.bf16 %v608_v56, %v602_v55  ;;  %v618_v63 = vld [vmem:[%s7293_s30 + $0x270] sm:$0xff]  ;;  %v604_v53 = vld [vmem:[%s7293_s30 + $0x200] sm:$0xff]  ;;  %v617_v55 = vld [vmem:[%s7293_s30 + $0x268] sm:$0xff] }
 0x174   : > { %5577 = vmatpush3.bf16.msra.mxu1 %v6025_v9  ;;  %v574_v35 = vld [vmem:[%s7293_s30 + $0x110] sm:$0xff]  ;;  %v623_v56 = vld [vmem:[%s7293_s30 + $0x298] sm:$0xff]  ;;  %v1380_v9 = vld [vmem:[%s7303_s10 + $0x8] sm:$0xff] }
 0x175   : > { %1113 = vmatmul.mubr.bf16.gmra.mrb[4].mxu0 %v642_v54  ;;  %v666_v54 = vpack.c.bf16 %v606_v51, %v600_v50  ;;  %5578 = vmatprep.subr.bf16.mxu1 %v6026_v13  ;;  %v586_v41 = vld [vmem:[%s7293_s30 + $0x170] sm:$0xff]  ;;  %v6027_v50 = vld [vmem:[#allocation8 + $0x18] sm:$0xff]  }
 0x176   : > { %1120 = vmatprep.mubr.bf16.mxu0 %v649_v61  ;;  %5259 = vmatpush3.bf16.msra.mxu0 %v6013_v5  ;;  %v675_v61 = vpack.c.bf16 %v621_v59, %v615_v58  ;;  %v633_v5 = vld [vmem:[%s7293_s30 + $0x2e8] sm:$0xff]  ;;  %v677_v59 = vpack.c.bf16 %v623_v56, %v617_v55  ;;  %v6888_v55 = vmov 0   ;;  %v6063_v56 = vld [vmem:[#allocation10 + $0xb0] ss:$12 sps:$4 sm:$0xff]  }
 0x177   : > { %1210 = vmatmul.mubr.bf16.gmra.mrb[4].mxu1 %v644_v62  ;;  %5260 = vmatprep.subr.bf16.mxu0 %v6014_v11  ;;  %v612_v62 = vld [vmem:[%s7293_s30 + $0x240] sm:$0xff] }
 0x178   : > { %1217 = vmatprep.mubr.bf16.mxu1 %v651_v4  ;;  %v627_v4 = vld [vmem:[%s7293_s30 + $0x2b8] sm:$0xff]  ;;  %v672_v6 = vpack.c.bf16 %v618_v63, %v612_v62  ;;  %v624_v11 = vld [vmem:[%s7293_s30 + $0x2a0] sm:$0xff]  ;;  %5579 = vmatpush3.bf16.msra.mxu1 %v6026_v13  ;;  %v629_v62 = vld [vmem:[%s7293_s30 + $0x2c8] sm:$0xff] }
 0x179   : > { %5580 = vmatprep.subr.bf16.mxu1 %v6027_v50  ;;  %v635_v63 = vld [vmem:[%s7293_s30 + $0x2f8] sm:$0xff] }
 0x17a   : > { %5261 = vmatpush3.bf16.msra.mxu0 %v6015_v15  ;;  %v545_v15 = vld [vmem:[%s7293_s30 + $0x28] sm:$0xff]  ;;  %v683_v2 = vpack.c.bf16 %v635_v63, %v629_v62 }
 0x17b   : > { %5262 = vmatprep.subr.bf16.mxu0 %v6016_v19  ;;  %v678_v19 = vpack.c.bf16 %v630_v12, %v624_v11  ;;  %v1381_v11 = vld [vmem:[%s7303_s10 + $0x10] sm:$0xff]  ;;  %v1382_v12 = vld [vmem:[%s7303_s10 + $0x18] sm:$0xff] }
 0x17c   : > { %5581 = vmatpush3.bf16.msra.mxu1 %v6027_v50  ;;  %v1396_v13 = vpack.c.bf16 %v1382_v12, %v1381_v11  ;;  %v6054_v50 = vld [vmem:[#allocation10 + $0x90] ss:$12 sps:$4 sm:$0xff]  }
 0x17d   : > { %1121 = vmatmul.mubr.bf16.gmra.mrb[8].mxu0 %v648_v10  ;;  %v674_v10 = vpack.c.bf16 %v620_v3, %v614_v0  ;;  %v6029_v0 = vld [vmem:[#allocation8 + $0x28] sm:$0xff]   ;;  %v628_v3 = vld [vmem:[%s7293_s30 + $0x2c0] sm:$0xff] }
 0x17e   : > { %1128 = vmatprep.mubr.bf16.mxu0 %v655_v14  ;;  %5263 = vmatpush3.bf16.msra.mxu0 %v6017_v23  ;;  %v681_v14 = vpack.c.bf16 %v633_v5, %v627_v4  ;;  %v550_v23 = vld [vmem:[%s7293_s30 + $0x50] sm:$0xff] }
 0x17f   : > { %1218 = vmatmul.mubr.bf16.gmra.mrb[8].mxu1 %v650_v16  ;;  %5264 = vmatprep.subr.bf16.mxu0 %v6018_v30  ;;  %v551_v16 = vld [vmem:[%s7293_s30 + $0x58] sm:$0xff]  ;;  %v640_v26 = vpack.c.bf16 %v550_v23, %v544_v22  ;;  %v569_v30 = vld [vmem:[%s7293_s30 + $0xe8] sm:$0xff]  ;;  %v634_v4 = vld [vmem:[%s7293_s30 + $0x2f0] sm:$0xff] }
 0x180   : > { %1225 = vmatprep.mubr.bf16.mxu1 %v657_v18  ;;  %v632_v18 = vld [vmem:[%s7293_s30 + $0x2e0] sm:$0xff]  ;;  %v641_v20 = vpack.c.bf16 %v551_v16, %v545_v15  ;;  %v6030_v5 = vld [vmem:[#allocation8 + $0x30] sm:$0xff]  }
 0x181   : > { %v680_v21 = vpack.c.bf16 %v632_v18, %v626_v17  ;;  %v6032_v15 = vld [vmem:[#allocation10] ss:$12 sps:$4 sm:$0xff]   ;;  %v6035_v22 = vld [vmem:[#allocation10 + $0x18] ss:$12 sps:$4 sm:$0xff]  }
 0x182   : > { %5265 = vmatpush3.bf16.msra.mxu0 %v6019_v32  ;;  %v1383_v16 = vld [vmem:[%s7303_s10 + $0x20] sm:$0xff]  ;;  %v1384_v17 = vld [vmem:[%s7303_s10 + $0x28] sm:$0xff] }
 0x183   : > { %5266 = vmatprep.subr.bf16.mxu0 %v6020_v38  ;;  %v1397_v18 = vpack.c.bf16 %v1384_v17, %v1383_v16 }
 0x185   : > { %1129 = vmatmul.mubr.bf16.gmra.mrb[12].mxu0 %v654_v25  ;;  %v563_v25 = vld [vmem:[%s7293_s30 + $0xb8] sm:$0xff] }
 0x186   : > { %1136 = vmatprep.mubr.bf16.mxu0 %v661_v28  ;;  %5267 = vmatpush3.bf16.msra.mxu0 %v6021_v39  ;;  %v647_v27 = vpack.c.bf16 %v563_v25, %v557_v24  ;;  %v556_v28 = vld [vmem:[%s7293_s30 + $0x80] sm:$0xff]  ;;  %v659_v39 = vpack.c.bf16 %v587_v37, %v581_v36  ;;  %v6041_v25 = vld [vmem:[#allocation10 + $0x8] ss:$12 sps:$4 sm:$0xff]  }
 0x187   : > { %1226 = vmatmul.mubr.bf16.gmra.mrb[12].mxu1 %v656_v31  ;;  %5268 = vmatprep.subr.bf16.mxu0 %v6022_v46  ;;  %v575_v31 = vld [vmem:[%s7293_s30 + $0x118] sm:$0xff]  ;;  %v646_v32 = vpack.c.bf16 %v562_v29, %v556_v28  ;;  %v592_v46 = vld [vmem:[%s7293_s30 + $0x1a0] sm:$0xff]  ;;  %v1388_v28 = vld [vmem:[%s7303_s10 + $0x48] sm:$0xff] }
 0x188   : > { %1233 = vmatprep.mubr.bf16.mxu1 %v663_v34  ;;  %v653_v33 = vpack.c.bf16 %v575_v31, %v569_v30  ;;  %v568_v34 = vld [vmem:[%s7293_s30 + $0xe0] sm:$0xff]  ;;  %v6044_v30 = vld [vmem:[#allocation10 + $0x4c] ss:$12 sps:$4 sm:$0xff]  }
 0x189   : > { %v652_v38 = vpack.c.bf16 %v574_v35, %v568_v34  ;;  %v6040_v24 = vld [vmem:[#allocation10 + $0x34] ss:$12 sps:$4 sm:$0xff]   ;;  %v1390_v34 = vld [vmem:[%s7303_s10 + $0x58] sm:$0xff]  ;;  %v6048_v36 = vld [vmem:[#allocation10 + $0x64] ss:$12 sps:$4 sm:$0xff]  }
 0x18a   : > { %5269 = vmatpush3.bf16.msra.mxu0 %v6023_v49  ;;  %v611_v49 = vld [vmem:[%s7293_s30 + $0x238] sm:$0xff]  ;;  %v6045_v31 = vld [vmem:[#allocation10 + $0x20] ss:$12 sps:$4 sm:$0xff]  }
 0x18b   : > { %5606 = vmatprep.subr.bf16.mxu0 %v6041_v25  ;;  %v6049_v37 = vld [vmem:[#allocation10 + $0x38] ss:$12 sps:$4 sm:$0xff]  }
 0x18d   : > { %1137 = vmatmul.mubr.bf16.gmra.mrb[16].mxu0 %v660_v40  ;;  %v580_v40 = vld [vmem:[%s7293_s30 + $0x140] sm:$0xff] }
 0x18e   : > { %1144 = vmatprep.mubr.bf16.mxu0 %v667_v43  ;;  %v599_v43 = vld [vmem:[%s7293_s30 + $0x1d8] sm:$0xff]  ;;  %v658_v44 = vpack.c.bf16 %v586_v41, %v580_v40  ;;  %v1392_v40 = vld [vmem:[%s7303_s10 + $0x68] sm:$0xff] }
 0x18f   : > { %1234 = vmatmul.mubr.bf16.gmra.mrb[16].mxu1 %v662_v47  ;;  %v665_v45 = vpack.c.bf16 %v599_v43, %v593_v42  ;;  %v598_v47 = vld [vmem:[%s7293_s30 + $0x1d0] sm:$0xff]  ;;  %v6052_v42 = vld [vmem:[#allocation10 + $0x7c] ss:$12 sps:$4 sm:$0xff]  }
 0x190   : > { %1241 = vmatprep.mubr.bf16.mxu1 %v669_v48  ;;  %v605_v48 = vld [vmem:[%s7293_s30 + $0x208] sm:$0xff]  ;;  %v664_v51 = vpack.c.bf16 %v598_v47, %v592_v46  ;;  %v6053_v43 = vld [vmem:[#allocation10 + $0x50] ss:$12 sps:$4 sm:$0xff]  }
 0x191   : > { %v671_v52 = vpack.c.bf16 %v611_v49, %v605_v48  ;;  %v1394_v46 = vld [vmem:[%s7303_s10 + $0x78] sm:$0xff]  ;;  %v6056_v48 = vld [vmem:[#allocation10 + $0x94] ss:$12 sps:$4 sm:$0xff]  }
 0x192   : > { %v6057_v49 = vld [vmem:[#allocation10 + $0x68] ss:$12 sps:$4 sm:$0xff]  }
 0x195   : > { %1145 = vmatmul.mubr.bf16.gmra.mrb[20].mxu0 %v666_v54  ;;  %v610_v54 = vld [vmem:[%s7293_s30 + $0x230] sm:$0xff] }
 0x196   : > { %1152 = vmatprep.mubr.bf16.mxu0 %v673_v57  ;;  %v6028_v57 = vld [vmem:[#allocation8 + $0x20] sm:$0xff]   ;;  %v670_v58 = vpack.c.bf16 %v610_v54, %v604_v53  ;;  %v6058_v53 = vld [vmem:[#allocation10 + $0xa8] ss:$12 sps:$4 sm:$0xff]  }
 0x197   : > { %1242 = vmatmul.mubr.bf16.gmra.mrb[20].mxu1 %v668_v60  ;;  %5582 = vmatprep.subr.bf16.mxu1 %v6028_v57  ;;  %v616_v60 = vld [vmem:[%s7293_s30 + $0x260] sm:$0xff] }
 0x198   : > { %1249 = vmatprep.mubr.bf16.mxu1 %v675_v61  ;;  %5583 = vmatpush3.bf16.msra.mxu1 %v6028_v57  ;;  %v622_v61 = vld [vmem:[%s7293_s30 + $0x290] sm:$0xff]  ;;  %v6062_v54 = vld [vmem:[#allocation10 + $0x98] ss:$12 sps:$4 sm:$0xff]   ;;  %v780_v57 = vlaneseq }
 0x199   : > { %v676_v1 = vpack.c.bf16 %v622_v61, %v616_v60  ;;  %5584 = vmatprep.subr.bf16.mxu1 %v6029_v0  ;;  %v7445_v60 = vld [vmem:[#allocation17] sm:$0xff] }
 0x19c   : > { %5585 = vmatpush3.bf16.msra.mxu1 %v6029_v0 }
 0x19d   : > { %1153 = vmatmul.mubr.bf16.gmra.mrb[24].mxu0 %v672_v6  ;;  %v682_v6 = vpack.c.bf16 %v634_v4, %v628_v3  ;;  %5586 = vmatprep.subr.bf16.mxu1 %v6030_v5 }
 0x19e   : > { %1160 = vmatprep.mubr.bf16.mxu0 %v679_v8  ;;  %v1379_v8 = vld [vmem:[%s7303_s10] sm:$0xff] }
 0x19f   : > { %1250 = vmatmul.mubr.bf16.gmra.mrb[24].mxu1 %v674_v10  ;;  %v1395_v10 = vpack.c.bf16 %v1380_v9, %v1379_v8 }
 0x1a0   : > { %1257 = vmatprep.mubr.bf16.mxu1 %v681_v14  ;;  %5587 = vmatpush3.bf16.msra.mxu1 %v6030_v5  ;;  %v6034_v14 = vld [vmem:[#allocation10 + $0x4] ss:$12 sps:$4 sm:$0xff]  }
 0x1a1   : > { %5588 = vmatprep.subr.bf16.mxu1 %v6031_v7 }
 0x1a4   : > { %5589 = vmatpush3.bf16.msra.mxu1 %v6031_v7 }
 0x1a5   : > { %1161 = vmatmul.mubr.bf16.gmra.mrb[28].mxu0 %v678_v19  ;;  %1828 = vmatprep.subr.bf16.mxu1 %v6034_v14  ;;  %v6037_v19 = vld [vmem:[#allocation10 + $0x1c] ss:$12 sps:$4 sm:$0xff]  }
 0x1a6   : > { %1298 = vmatprep.mubr.bf16.mxu0 %v641_v20  ;;  %v1385_v20 = vld [vmem:[%s7303_s10 + $0x30] sm:$0xff] }
 0x1a7   : > { %1258 = vmatmul.mubr.bf16.gmra.mrb[28].mxu1 %v680_v21  ;;  %v1386_v21 = vld [vmem:[%s7303_s10 + $0x38] sm:$0xff] }
 0x1a8   : > { %5590 = vmatprep.mubr.bf16.mxu1 %v1395_v10  ;;  %v1398_v23 = vpack.c.bf16 %v1386_v21, %v1385_v20 }
 0x1ad   : > { %1299 = vmatmul.mubr.bf16.vlgmr.msra.gmra.mrb[32].mxu0 %v640_v26  ;;  %v6038_v26 = vld [vmem:[#allocation10 + $0x30] ss:$12 sps:$4 sm:$0xff]  }
 0x1ae   : > { %1306 = vmatprep.mubr.bf16.mxu0 %v647_v27  ;;  %5607 = vmatpush3.bf16.msra.mxu0 %v6041_v25  ;;  %v1387_v27 = vld [vmem:[%s7303_s10 + $0x40] sm:$0xff] }
 0x1af   : > { %5591 = vmatmul.mubr.bf16.vlgmr.msra.gmra.mrb[32].mxu1 %v1396_v13  ;;  %v1399_v29 = vpack.c.bf16 %v1388_v28, %v1387_v27  ;;  %5608 = vmatprep.subr.bf16.mxu0 %v6045_v31 }
 0x1b0   : > { %1829 = vmatpush1.bf16.msra.mxu1 %v6032_v15  ;;  %5594 = vmatprep.mubr.bf16.mxu1 %v1397_v18 }
 0x1b1   : > { %1830 = vmatprep.subr.bf16.mxu1 %v6037_v19 }
 0x1b2   : > { %5609 = vmatpush3.bf16.msra.mxu0 %v6045_v31 }
 0x1b3   : > { %5610 = vmatprep.subr.bf16.mxu0 %v6049_v37 }
 0x1b4   : > { %1831 = vmatpush1.bf16.msra.mxu1 %v6035_v22 }
 0x1b5   : > { %1307 = vmatmul.mubr.bf16.gmra.mrb[36].mxu0 %v646_v32  ;;  %1832 = vmatprep.subr.bf16.mxu1 %v6040_v24  ;;  %v1389_v32 = vld [vmem:[%s7303_s10 + $0x50] sm:$0xff] }
 0x1b6   : > { %1314 = vmatprep.mubr.bf16.mxu0 %v653_v33  ;;  %v6042_v33 = vld [vmem:[#allocation10 + $0x48] ss:$12 sps:$4 sm:$0xff]   ;;  %v1400_v35 = vpack.c.bf16 %v1390_v34, %v1389_v32  ;;  %5611 = vmatpush3.bf16.msra.mxu0 %v6049_v37 }
 0x1b7   : > { %5595 = vmatmul.mubr.bf16.gmra.mrb[36].mxu1 %v1398_v23  ;;  %5612 = vmatprep.subr.bf16.mxu0 %v6053_v43 }
 0x1b8   : > { %1833 = vmatpush1.bf16.msra.mxu1 %v6038_v26  ;;  %5598 = vmatprep.mubr.bf16.mxu1 %v1399_v29 }
 0x1b9   : > { %1834 = vmatprep.subr.bf16.mxu1 %v6044_v30 }
 0x1ba   : > { %5613 = vmatpush3.bf16.msra.mxu0 %v6053_v43 }
 0x1bb   : > { %5614 = vmatprep.subr.bf16.mxu0 %v6057_v49 }
 0x1bc   : > { %1835 = vmatpush1.bf16.msra.mxu1 %v6042_v33 }
 0x1bd   : > { %1315 = vmatmul.mubr.bf16.gmra.mrb[40].mxu0 %v652_v38  ;;  %v6046_v38 = vld [vmem:[#allocation10 + $0x60] ss:$12 sps:$4 sm:$0xff]   ;;  %1836 = vmatprep.subr.bf16.mxu1 %v6048_v36 }
 0x1be   : > { %1322 = vmatprep.mubr.bf16.mxu0 %v659_v39  ;;  %v1391_v39 = vld [vmem:[%s7303_s10 + $0x60] sm:$0xff]  ;;  %5615 = vmatpush3.bf16.msra.mxu0 %v6057_v49 }
 0x1bf   : > { %5599 = vmatmul.mubr.bf16.gmra.mrb[40].mxu1 %v1400_v35  ;;  %v1401_v41 = vpack.c.bf16 %v1392_v40, %v1391_v39 }
 0x1c0   : > { %1837 = vmatpush1.bf16.msra.mxu1 %v6046_v38 }
 0x1c1   : > { %5602 = vmatprep.mubr.bf16.mxu1 %v1401_v41  ;;  %1838 = vmatprep.subr.bf16.mxu1 %v6052_v42 }
 0x1c5   : > { %1323 = vmatmul.mubr.bf16.gmra.mrb[44].mxu0 %v658_v44  ;;  %v1393_v44 = vld [vmem:[%s7303_s10 + $0x70] sm:$0xff] }
 0x1c6   : > { %1330 = vmatprep.mubr.bf16.mxu0 %v665_v45  ;;  %v6050_v45 = vld [vmem:[#allocation10 + $0x78] ss:$12 sps:$4 sm:$0xff]   ;;  %v1402_v47 = vpack.c.bf16 %v1394_v46, %v1393_v44 }
 0x1c7   : > { %1839 = vmatpush1.bf16.msra.mxu1 %v6050_v45 }
 0x1c8   : > { %5603 = vmatmul.mubr.bf16.gmra.mrb[44].mxu1 %v1402_v47  ;;  %1840 = vmatprep.subr.bf16.mxu1 %v6056_v48 }
 0x1c9   : > { %1860 = vmatprep.mubr.bf16.mxu1 %v6888_v55 }
 0x1cb   : > { %1841 = vmatpush1.bf16.msra.mxu1 %v6054_v50 }
 0x1cd   : > { %1331 = vmatmul.mubr.bf16.gmra.mrb[48].mxu0 %v664_v51  ;;  %v6060_v51 = vld [vmem:[#allocation10 + $0xac] ss:$12 sps:$4 sm:$0xff]  }
 0x1ce   : > { %1338 = vmatprep.mubr.bf16.mxu0 %v671_v52  ;;  %v6061_v52 = vld [vmem:[#allocation10 + $0x80] ss:$12 sps:$4 sm:$0xff]   ;;  %1842 = vmatprep.subr.bf16.mxu1 %v6060_v51 }
 0x1cf   : > { %5616 = vmatprep.subr.bf16.mxu0 %v6061_v52  ;;  %1843 = vmatpush1.bf16.msra.mxu1 %v6058_v53 }
 0x1d0   : > { %5617 = vmatpush3.bf16.msra.mxu0 %v6061_v52 }
 0x1d1   : > { %5618 = vmatprep.subr.bf16.mxu0 %v6062_v54 }
 0x1d4   : > { %5619 = vmatpush3.bf16.msra.mxu0 %v6062_v54 }
 0x1d5   : > { %1339 = vmatmul.mubr.bf16.gmra.mrb[52].mxu0 %v670_v58  ;;  %5620 = vmatprep.subr.bf16.mxu0 %v6063_v56  ;;  %v7442_v58 = vshrl.u32 %v780_v57, 7 }
 0x1d6   : > { %1346 = vmatprep.mubr.bf16.mxu0 %v677_v59 }
 0x1d7   : > { %v782_v59 = vsub.s32 0, %v7442_v58 }
 0x1d8   : > { %5621 = vmatpush3.bf16.msra.mxu0 %v6063_v56 }
 0x1d9   : > { %v7448_v62 = vrot.slane %v7445_v60, %v782_v59 }
 0x1dd   : > { %1347 = vmatmul.mubr.bf16.gmra.mrb[56].mxu0 %v676_v1 }
 0x1de   : > { %1354 = vmatprep.mubr.bf16.mxu0 %v683_v2 }
 0x1e5   : > { %1355 = vmatmul.mubr.bf16.gmra.mrb[60].mxu0 %v682_v6 }
 0x240   : > { %v5142_v61 = vpop.f32.mrb[0].mxu0 }
 0x241   : > { %v5143_v63 = vpop.f32.mrb[1].mxu0 }
 0x242   : > { %v5144_v0 = vadd.f32 %v5143_v63, %v5142_v61  ;;  %v5145_v1 = vpop.f32.mrb[2].mxu0  ;;  %v5206_v2 = vpop.f32.mrb[0].mxu1 }
 0x243   : > { %v5146_v3 = vpop.f32.mrb[3].mxu0  ;;  %v5207_v6 = vpop.f32.mrb[1].mxu1 }
 0x244   : > { %v1107_v4 = vadd.f32 %v5144_v0, %v7448_v62  ;;  %v5147_v5 = vadd.f32 %v5146_v3, %v5145_v1  ;;  %v5208_v7 = vadd.f32 %v5207_v6, %v5206_v2  ;;  %v5209_v8 = vpop.f32.mrb[2].mxu1 }
 0x245   : > { %v5210_v10 = vpop.f32.mrb[3].mxu1 }
 0x246   : > { %v1110_v9 = vadd.f32 %v5147_v5, %v7448_v62  ;;  %v7452_v11 = vadd.f32 %v5208_v7, %v1107_v4  ;;  %v5211_v12 = vadd.f32 %v5210_v10, %v5209_v8 }
 0x248   : > { %v5148_v13 = vpop.f32.mrb[4].mxu0  ;;  %v7454_v14 = vadd.f32 %v5211_v12, %v1110_v9 }
 0x249   : > { %v5149_v15 = vpop.f32.mrb[5].mxu0 }
 0x24a   : > { %v5150_v16 = vadd.f32 %v5149_v15, %v5148_v13  ;;  %v5151_v17 = vpop.f32.mrb[6].mxu0  ;;  %v5212_v18 = vpop.f32.mrb[4].mxu1 }
 0x24b   : > { %v5152_v19 = vpop.f32.mrb[7].mxu0  ;;  %v5213_v22 = vpop.f32.mrb[5].mxu1 }
 0x24c   : > { %v1115_v20 = vadd.f32 %v5150_v16, %v7448_v62  ;;  %v5153_v21 = vadd.f32 %v5152_v19, %v5151_v17  ;;  %v5214_v23 = vadd.f32 %v5213_v22, %v5212_v18  ;;  %v5215_v24 = vpop.f32.mrb[6].mxu1 }
 0x24d   : > { %v5216_v26 = vpop.f32.mrb[7].mxu1 }
 0x24e   : > { %v1118_v25 = vadd.f32 %v5153_v21, %v7448_v62  ;;  %v7458_v27 = vadd.f32 %v5214_v23, %v1115_v20  ;;  %v5217_v28 = vadd.f32 %v5216_v26, %v5215_v24 }
 0x250   : > { %v5154_v29 = vpop.f32.mrb[8].mxu0  ;;  %v7460_v30 = vadd.f32 %v5217_v28, %v1118_v25 }
 0x251   : > { %v5155_v31 = vpop.f32.mrb[9].mxu0 }
 0x252   : > { %v5156_v32 = vadd.f32 %v5155_v31, %v5154_v29  ;;  %v5157_v33 = vpop.f32.mrb[10].mxu0  ;;  %v5218_v34 = vpop.f32.mrb[8].mxu1 }
 0x253   : > { %v5158_v35 = vpop.f32.mrb[11].mxu0  ;;  %v5219_v38 = vpop.f32.mrb[9].mxu1 }
 0x254   : > { %v1123_v36 = vadd.f32 %v5156_v32, %v7448_v62  ;;  %v5159_v37 = vadd.f32 %v5158_v35, %v5157_v33  ;;  %v5220_v39 = vadd.f32 %v5219_v38, %v5218_v34  ;;  %v5221_v40 = vpop.f32.mrb[10].mxu1 }
 0x255   : > { %v5222_v42 = vpop.f32.mrb[11].mxu1 }
 0x256   : > { %v1126_v41 = vadd.f32 %v5159_v37, %v7448_v62  ;;  %v7464_v43 = vadd.f32 %v5220_v39, %v1123_v36  ;;  %v5223_v44 = vadd.f32 %v5222_v42, %v5221_v40 }
 0x258   : > { %v5160_v45 = vpop.f32.mrb[12].mxu0  ;;  %v7466_v46 = vadd.f32 %v5223_v44, %v1126_v41 }
 0x259   : > { %v5161_v47 = vpop.f32.mrb[13].mxu0 }
 0x25a   : > { %v5162_v48 = vadd.f32 %v5161_v47, %v5160_v45  ;;  %v5163_v49 = vpop.f32.mrb[14].mxu0  ;;  %v5224_v50 = vpop.f32.mrb[12].mxu1 }
 0x25b   : > { %v5164_v51 = vpop.f32.mrb[15].mxu0  ;;  %v5225_v54 = vpop.f32.mrb[13].mxu1 }
 0x25c   : > { %v1131_v52 = vadd.f32 %v5162_v48, %v7448_v62  ;;  %v5165_v53 = vadd.f32 %v5164_v51, %v5163_v49  ;;  %v5226_v56 = vadd.f32 %v5225_v54, %v5224_v50  ;;  %v5227_v57 = vpop.f32.mrb[14].mxu1 }
 0x25d   : > { %v5228_v61 = vpop.f32.mrb[15].mxu1 }
 0x25e   : > { %v1134_v59 = vadd.f32 %v5165_v53, %v7448_v62  ;;  %v7470_v63 = vadd.f32 %v5226_v56, %v1131_v52  ;;  %v5229_v0 = vadd.f32 %v5228_v61, %v5227_v57 }
 0x260   : > { %v5166_v1 = vpop.f32.mrb[16].mxu0  ;;  %v7472_v2 = vadd.f32 %v5229_v0, %v1134_v59 }
 0x261   : > { %v5167_v3 = vpop.f32.mrb[17].mxu0 }
 0x262   : > { %v5168_v4 = vadd.f32 %v5167_v3, %v5166_v1  ;;  %v5169_v5 = vpop.f32.mrb[18].mxu0  ;;  %v5230_v6 = vpop.f32.mrb[16].mxu1 }
 0x263   : > { %v5170_v7 = vpop.f32.mrb[19].mxu0  ;;  %v5231_v10 = vpop.f32.mrb[17].mxu1 }
 0x264   : > { %v1139_v8 = vadd.f32 %v5168_v4, %v7448_v62  ;;  %v5171_v9 = vadd.f32 %v5170_v7, %v5169_v5  ;;  %v5232_v12 = vadd.f32 %v5231_v10, %v5230_v6  ;;  %v5233_v13 = vpop.f32.mrb[18].mxu1 }
 0x265   : > { %v5234_v16 = vpop.f32.mrb[19].mxu1 }
 0x266   : > { %v1142_v15 = vadd.f32 %v5171_v9, %v7448_v62  ;;  %v7476_v17 = vadd.f32 %v5232_v12, %v1139_v8  ;;  %v5235_v18 = vadd.f32 %v5234_v16, %v5233_v13 }
 0x268   : > { %v5172_v19 = vpop.f32.mrb[20].mxu0  ;;  %v7478_v20 = vadd.f32 %v5235_v18, %v1142_v15 }
 0x269   : > { %v5173_v21 = vpop.f32.mrb[21].mxu0 }
 0x26a   : > { %v5174_v22 = vadd.f32 %v5173_v21, %v5172_v19  ;;  %v5175_v23 = vpop.f32.mrb[22].mxu0  ;;  %v5236_v24 = vpop.f32.mrb[20].mxu1 }
 0x26b   : > { %v5176_v25 = vpop.f32.mrb[23].mxu0  ;;  %v5237_v29 = vpop.f32.mrb[21].mxu1 }
 0x26c   : > { %v1147_v26 = vadd.f32 %v5174_v22, %v7448_v62  ;;  %v5177_v28 = vadd.f32 %v5176_v25, %v5175_v23  ;;  %v5238_v31 = vadd.f32 %v5237_v29, %v5236_v24  ;;  %v5239_v32 = vpop.f32.mrb[22].mxu1 }
 0x26d   : > { %v5240_v34 = vpop.f32.mrb[23].mxu1 }
 0x26e   : > { %v1150_v33 = vadd.f32 %v5177_v28, %v7448_v62  ;;  %v7482_v35 = vadd.f32 %v5238_v31, %v1147_v26  ;;  %v5241_v36 = vadd.f32 %v5240_v34, %v5239_v32 }
 0x270   : > { %v5178_v37 = vpop.f32.mrb[24].mxu0  ;;  %v7484_v38 = vadd.f32 %v5241_v36, %v1150_v33 }
 0x271   : > { %v5179_v39 = vpop.f32.mrb[25].mxu0 }
 0x272   : > { %v5180_v40 = vadd.f32 %v5179_v39, %v5178_v37  ;;  %v5181_v41 = vpop.f32.mrb[26].mxu0  ;;  %v5242_v42 = vpop.f32.mrb[24].mxu1 }
 0x273   : > { %v5182_v44 = vpop.f32.mrb[27].mxu0  ;;  %v5243_v48 = vpop.f32.mrb[25].mxu1 }
 0x274   : > { %v1155_v45 = vadd.f32 %v5180_v40, %v7448_v62  ;;  %v5183_v47 = vadd.f32 %v5182_v44, %v5181_v41  ;;  %v5244_v49 = vadd.f32 %v5243_v48, %v5242_v42  ;;  %v5245_v50 = vpop.f32.mrb[26].mxu1 }
 0x275   : > { %v5246_v52 = vpop.f32.mrb[27].mxu1 }
 0x276   : > { %v1158_v51 = vadd.f32 %v5183_v47, %v7448_v62  ;;  %v7488_v53 = vadd.f32 %v5244_v49, %v1155_v45  ;;  %v5247_v54 = vadd.f32 %v5246_v52, %v5245_v50 }
 0x278   : > { %v5184_v56 = vpop.f32.mrb[28].mxu0  ;;  %v7490_v57 = vadd.f32 %v5247_v54, %v1158_v51 }
 0x279   : > { %v5185_v59 = vpop.f32.mrb[29].mxu0 }
 0x27a   : > { %v5186_v61 = vadd.f32 %v5185_v59, %v5184_v56  ;;  %v5187_v0 = vpop.f32.mrb[30].mxu0  ;;  %v5248_v1 = vpop.f32.mrb[28].mxu1 }
 0x27b   : > { %v5188_v3 = vpop.f32.mrb[31].mxu0  ;;  %v5249_v6 = vpop.f32.mrb[29].mxu1 }
 0x27c   : > { %v1163_v4 = vadd.f32 %v5186_v61, %v7448_v62  ;;  %v5189_v5 = vadd.f32 %v5188_v3, %v5187_v0  ;;  %v5250_v7 = vadd.f32 %v5249_v6, %v5248_v1  ;;  %v5251_v8 = vpop.f32.mrb[30].mxu1 }
 0x27d   : > { %v5252_v10 = vpop.f32.mrb[31].mxu1 }
 0x27e   : > { %v1166_v9 = vadd.f32 %v5189_v5, %v7448_v62  ;;  %v7494_v12 = vadd.f32 %v5250_v7, %v1163_v4  ;;  %v5253_v13 = vadd.f32 %v5252_v10, %v5251_v8 }
 0x280   : > { %v5270_v15 = vpop.f32.mrb[32].mxu0  ;;  %v7496_v16 = vadd.f32 %v5253_v13, %v1166_v9 }
 0x281   : > { %v5271_v18 = vpop.f32.mrb[33].mxu0 }
 0x282   : > { %v5272_v19 = vadd.f32 %v5271_v18, %v5270_v15  ;;  %v5273_v21 = vpop.f32.mrb[34].mxu0 }
 0x283   : > { %v5274_v22 = vpop.f32.mrb[35].mxu0 }
 0x284   : > { %v1301_v23 = vadd.f32 %v5272_v19, %v7452_v11  ;;  %v5275_v24 = vadd.f32 %v5274_v22, %v5273_v21 }
 0x286   : > { %v1304_v25 = vadd.f32 %v5275_v24, %v7454_v14  ;;  %v1363_v26 = vmax.f32 %v1301_v23, 0.0 }
 0x288   : > { %v1364_v28 = vmax.f32 %v1304_v25, 0.0  ;;  %v5276_v29 = vpop.f32.mrb[36].mxu0 }
 0x289   : > { %v5277_v62 = vpop.f32.mrb[37].mxu0 }
 0x28a   : > { %v1680_v31 = vpack.c.bf16 %v1364_v28, %v1363_v26  ;;  %v5278_v32 = vadd.f32 %v5277_v62, %v5276_v29  ;;  %v5279_v33 = vpop.f32.mrb[38].mxu0 }
 0x28b   : > { %v5280_v34 = vpop.f32.mrb[39].mxu0 }
 0x28c   : > { %v1309_v36 = vadd.f32 %v5278_v32, %v7458_v27  ;;  %v5281_v37 = vadd.f32 %v5280_v34, %v5279_v33  ;;  %1861 = vmatmul.mubr.bf16.vlgmr.msra.gmra.mrb[48].mxu1 %v1680_v31  ;;  %5622 = vmatprep.mubr.bf16.mxu0 %v1680_v31 }
 0x28d   : > { %1870 = vmatprep.mubr.bf16.mxu1 %v6888_v55 }
 0x28e   : > { %v1312_v11 = vadd.f32 %v5281_v37, %v7460_v30  ;;  %v1365_v39 = vmax.f32 %v1309_v36, 0.0 }
 0x290   : > { %v1366_v40 = vmax.f32 %v1312_v11, 0.0  ;;  %v5282_v14 = vpop.f32.mrb[40].mxu0  ;;  %v1421_v11 = vsub.s32 1, %v7442_v58 }
 0x291   : > { %v5283_v41 = vpop.f32.mrb[41].mxu0 }
 0x292   : > { %v5284_v42 = vadd.f32 %v5283_v41, %v5282_v14  ;;  %v5285_v44 = vpop.f32.mrb[42].mxu0  ;;  %v1681_v45 = vpack.c.bf16 %v1366_v40, %v1365_v39 }
 0x293   : > { %v5286_v47 = vpop.f32.mrb[43].mxu0 }
 0x294   : > { %v1317_v48 = vadd.f32 %v5284_v42, %v7464_v43  ;;  %v5287_v49 = vadd.f32 %v5286_v47, %v5285_v44  ;;  %1871 = vmatmul.mubr.bf16.gmra.mrb[52].mxu1 %v1681_v45  ;;  %5623 = vmatmul.mubr.bf16.vlgmr.msra.gmra.mrb[64].mxu0 %v1681_v45  ;;  %v7520_v45 = vrot.slane %v7445_v60, %v1421_v11 }
 0x295   : > { %1880 = vmatprep.mubr.bf16.mxu1 %v6888_v55 }
 0x296   : > { %v1320_v27 = vadd.f32 %v5287_v49, %v7466_v46  ;;  %v1367_v50 = vmax.f32 %v1317_v48, 0.0 }
 0x298   : > { %v1368_v51 = vmax.f32 %v1320_v27, 0.0  ;;  %v5288_v30 = vpop.f32.mrb[44].mxu0 }
 0x299   : > { %v5289_v52 = vpop.f32.mrb[45].mxu0 }
 0x29a   : > { %v5290_v54 = vadd.f32 %v5289_v52, %v5288_v30  ;;  %v5291_v56 = vpop.f32.mrb[46].mxu0  ;;  %v1682_v59 = vpack.c.bf16 %v1368_v51, %v1367_v50 }
 0x29b   : > { %v5292_v61 = vpop.f32.mrb[47].mxu0 }
 0x29c   : > { %v1325_v0 = vadd.f32 %v5290_v54, %v7470_v63  ;;  %v5293_v1 = vadd.f32 %v5292_v61, %v5291_v56  ;;  %1881 = vmatmul.mubr.bf16.gmra.mrb[56].mxu1 %v1682_v59  ;;  %5626 = vmatprep.mubr.bf16.mxu0 %v1682_v59 }
 0x29d   : > { %1890 = vmatprep.mubr.bf16.mxu1 %v6888_v55 }
 0x29e   : > { %v1328_v43 = vadd.f32 %v5293_v1, %v7472_v2  ;;  %v1369_v3 = vmax.f32 %v1325_v0, 0.0 }
 0x2a0   : > { %v1370_v4 = vmax.f32 %v1328_v43, 0.0  ;;  %v5294_v46 = vpop.f32.mrb[48].mxu0 }
 0x2a1   : > { %v5295_v5 = vpop.f32.mrb[49].mxu0 }
 0x2a2   : > { %v5296_v6 = vadd.f32 %v5295_v5, %v5294_v46  ;;  %v5297_v7 = vpop.f32.mrb[50].mxu0  ;;  %v1683_v8 = vpack.c.bf16 %v1370_v4, %v1369_v3 }
 0x2a3   : > { %v5298_v9 = vpop.f32.mrb[51].mxu0 }
 0x2a4   : > { %v1333_v10 = vadd.f32 %v5296_v6, %v7476_v17  ;;  %v5299_v13 = vadd.f32 %v5298_v9, %v5297_v7  ;;  %1891 = vmatmul.mubr.bf16.gmra.mrb[60].mxu1 %v1683_v8  ;;  %5627 = vmatmul.mubr.bf16.gmra.mrb[68].mxu0 %v1683_v8 }
 0x2a5   : > { %1900 = vmatprep.mubr.bf16.mxu1 %v6888_v55 }
 0x2a6   : > { %v1336_v63 = vadd.f32 %v5299_v13, %v7478_v20  ;;  %v1371_v15 = vmax.f32 %v1333_v10, 0.0 }
 0x2a8   : > { %v1372_v18 = vmax.f32 %v1336_v63, 0.0  ;;  %v5300_v2 = vpop.f32.mrb[52].mxu0 }
 0x2a9   : > { %v5301_v19 = vpop.f32.mrb[53].mxu0 }
 0x2aa   : > { %v5302_v21 = vadd.f32 %v5301_v19, %v5300_v2  ;;  %v5303_v22 = vpop.f32.mrb[54].mxu0  ;;  %v1684_v23 = vpack.c.bf16 %v1372_v18, %v1371_v15 }
 0x2ab   : > { %v5304_v24 = vpop.f32.mrb[55].mxu0 }
 0x2ac   : > { %v1341_v25 = vadd.f32 %v5302_v21, %v7482_v35  ;;  %v5305_v26 = vadd.f32 %v5304_v24, %v5303_v22  ;;  %1901 = vmatmul.mubr.bf16.gmra.mrb[64].mxu1 %v1684_v23  ;;  %5630 = vmatprep.mubr.bf16.mxu0 %v1684_v23 }
 0x2ad   : > { %1910 = vmatprep.mubr.bf16.mxu1 %v6888_v55 }
 0x2ae   : > { %v1344_v17 = vadd.f32 %v5305_v26, %v7484_v38  ;;  %v1373_v28 = vmax.f32 %v1341_v25, 0.0 }
 0x2b0   : > { %v1374_v29 = vmax.f32 %v1344_v17, 0.0  ;;  %v5306_v20 = vpop.f32.mrb[56].mxu0 }
 0x2b1   : > { %v5307_v62 = vpop.f32.mrb[57].mxu0 }
 0x2b2   : > { %v5308_v31 = vadd.f32 %v5307_v62, %v5306_v20  ;;  %v5309_v32 = vpop.f32.mrb[58].mxu0  ;;  %v1685_v33 = vpack.c.bf16 %v1374_v29, %v1373_v28 }
 0x2b3   : > { %v5310_v34 = vpop.f32.mrb[59].mxu0 }
 0x2b4   : > { %v1349_v36 = vadd.f32 %v5308_v31, %v7488_v53  ;;  %v5311_v37 = vadd.f32 %v5310_v34, %v5309_v32  ;;  %1911 = vmatmul.mubr.bf16.gmra.mrb[68].mxu1 %v1685_v33  ;;  %5631 = vmatmul.mubr.bf16.gmra.mrb[72].mxu0 %v1685_v33 }
 0x2b5   : > { %1920 = vmatprep.mubr.bf16.mxu1 %v6888_v55 }
 0x2b6   : > { %v1352_v35 = vadd.f32 %v5311_v37, %v7490_v57  ;;  %v1375_v38 = vmax.f32 %v1349_v36, 0.0  ;;  %v5592_v57 = vpop.f32.mrb[32].mxu1 }
 0x2b7   : > { %v1514_v27 = vadd.f32 %v5592_v57, %v7520_v45  ;;  %v1505_v50 = vpop.f32.mrb[33].mxu1  ;;  %v1690_v57 = vsub.s32 2, %v7442_v58 }
 0x2b8   : > { %v1376_v39 = vmax.f32 %v1352_v35, 0.0  ;;  %v5312_v40 = vpop.f32.mrb[60].mxu0  ;;  %v1506_v51 = vadd.f32 %v1505_v50, %v7520_v45  ;;  %v5593_v30 = vpop.f32.mrb[34].mxu1 }
 0x2b9   : > { %v5313_v14 = vpop.f32.mrb[61].mxu0  ;;  %v1570_v56 = vmax.f32 %v1514_v27, 0.0  ;;  %v1517_v59 = vadd.f32 %v5593_v30, %v7520_v45  ;;  %v7559_v27 = vrot.slane %v7445_v60, %v1690_v57 }
 0x2ba   : > { %v5314_v41 = vadd.f32 %v5313_v14, %v5312_v40  ;;  %v5315_v42 = vpop.f32.mrb[62].mxu0  ;;  %v1686_v44 = vpack.c.bf16 %v1376_v39, %v1375_v38  ;;  %v1568_v61 = vmax.f32 %v1506_v51, 0.0 }
 0x2bb   : > { %v5316_v53 = vpop.f32.mrb[63].mxu0  ;;  %v1571_v43 = vmax.f32 %v1517_v59, 0.0 }
 0x2bc   : > { %v1357_v47 = vadd.f32 %v5314_v41, %v7494_v12  ;;  %v5317_v48 = vadd.f32 %v5316_v53, %v5315_v42  ;;  %1921 = vmatmul.mubr.bf16.gmra.mrb[72].mxu1 %v1686_v44  ;;  %5634 = vmatprep.mubr.bf16.mxu0 %v1686_v44  ;;  %v1508_v12 = vpop.f32.mrb[35].mxu1 }
 0x2bd   : > { %1930 = vmatprep.mubr.bf16.mxu1 %v6888_v55  ;;  %v1509_v0 = vadd.f32 %v1508_v12, %v7520_v45  ;;  %v5596_v46 = vpop.f32.mrb[36].mxu1 }
 0x2be   : > { %v1360_v49 = vadd.f32 %v5317_v48, %v7496_v16  ;;  %v1377_v52 = vmax.f32 %v1357_v47, 0.0  ;;  %v7529_v16 = vpack.c.bf16 %v1571_v43, %v1570_v56  ;;  %v1530_v5 = vadd.f32 %v5596_v46, %v7520_v45  ;;  %v1521_v6 = vpop.f32.mrb[37].mxu1 }
 0x2bf   : > { %v1569_v3 = vmax.f32 %v1509_v0, 0.0  ;;  %v1522_v7 = vadd.f32 %v1521_v6, %v7520_v45  ;;  %v5597_v8 = vpop.f32.mrb[38].mxu1 }
 0x2c0   : > { %v1378_v54 = vmax.f32 %v1360_v49, 0.0  ;;  %v1574_v9 = vmax.f32 %v1530_v5, 0.0  ;;  %v1533_v10 = vadd.f32 %v5597_v8, %v7520_v45  ;;  %v1524_v13 = vpop.f32.mrb[39].mxu1  ;;  %v538_v49 = vld [vmem:[#allocation17 + $0x8] sm:$0xff] }
 0x2c1   : > { %v7531_v4 = vpack.c.bf16 %v1569_v3, %v1568_v61  ;;  %v1572_v63 = vmax.f32 %v1522_v7, 0.0  ;;  %v1525_v15 = vadd.f32 %v1524_v13, %v7520_v45  ;;  %v5600_v22 = vpop.f32.mrb[40].mxu1  ;;  %v7561_v51 = vrot.slane %v538_v49, %v1690_v57  ;;  %v539_v61 = vld [vmem:[#allocation17 + $0x10] sm:$0xff] }
 0x2c2   : > { %v1687_v1 = vpack.c.bf16 %v1378_v54, %v1377_v52  ;;  %v1575_v18 = vmax.f32 %v1533_v10, 0.0  ;;  %v1546_v23 = vadd.f32 %v5600_v22, %v7520_v45  ;;  %v1537_v24 = vpop.f32.mrb[41].mxu1  ;;  %v7570_v60 = vrot.slane %v539_v61, %v1690_v57 }
 0x2c3   : > { %v1573_v2 = vmax.f32 %v1525_v15, 0.0  ;;  %v1538_v25 = vadd.f32 %v1537_v24, %v7520_v45  ;;  %v5601_v26 = vpop.f32.mrb[42].mxu1 }
 0x2c4   : > { %1931 = vmatmul.mubr.bf16.gmra.mrb[76].mxu1 %v1687_v1  ;;  %5635 = vmatmul.mubr.bf16.gmra.mrb[76].mxu0 %v1687_v1  ;;  %v7537_v19 = vpack.c.bf16 %v1575_v18, %v1574_v9  ;;  %v1578_v17 = vmax.f32 %v1546_v23, 0.0  ;;  %v1549_v28 = vadd.f32 %v5601_v26, %v7520_v45  ;;  %v1540_v29 = vpop.f32.mrb[43].mxu1 }
 0x2c5   : > { %v7539_v21 = vpack.c.bf16 %v1573_v2, %v1572_v63  ;;  %v1576_v20 = vmax.f32 %v1538_v25, 0.0  ;;  %v1541_v62 = vadd.f32 %v1540_v29, %v7520_v45  ;;  %v5604_v36 = vpop.f32.mrb[44].mxu1 }
 0x2c6   : > { %v1579_v31 = vmax.f32 %v1549_v28, 0.0  ;;  %v1562_v37 = vadd.f32 %v5604_v36, %v7520_v45  ;;  %v1553_v35 = vpop.f32.mrb[45].mxu1 }
 0x2c7   : > { %v1577_v32 = vmax.f32 %v1541_v62, 0.0  ;;  %v1554_v11 = vadd.f32 %v1553_v35, %v7520_v45  ;;  %v5605_v38 = vpop.f32.mrb[46].mxu1 }
 0x2c8   : > { %v7545_v33 = vpack.c.bf16 %v1579_v31, %v1578_v17  ;;  %v1582_v39 = vmax.f32 %v1562_v37, 0.0  ;;  %v1565_v40 = vadd.f32 %v5605_v38, %v7520_v45  ;;  %v1556_v14 = vpop.f32.mrb[47].mxu1 }
 0x2c9   : > { %v7547_v34 = vpack.c.bf16 %v1577_v32, %v1576_v20  ;;  %v1580_v41 = vmax.f32 %v1554_v11, 0.0  ;;  %v1557_v42 = vadd.f32 %v1556_v14, %v7520_v45 }
 0x2ca   : > { %v1583_v44 = vmax.f32 %v1565_v40, 0.0 }
 0x2cb   : > { %v1581_v53 = vmax.f32 %v1557_v42, 0.0 }
 0x2cc   : > { %v7553_v47 = vpack.c.bf16 %v1583_v44, %v1582_v39 }
 0x2cd   : > { %v7555_v48 = vpack.c.bf16 %v1581_v53, %v1580_v41 }
 0x35f   : > { %v1862_v50 = vpop.f32.mrb[48].mxu1 }
 0x360   : > { %v1864_v30 = vpop.f32.mrb[49].mxu1  ;;  %v1863_v54 = vadd.f32 %v1862_v50, %v7559_v27 }
 0x361   : > { %v1866_v52 = vpop.f32.mrb[50].mxu1  ;;  %v1865_v59 = vadd.f32 %v1864_v30, %v7561_v51 }
 0x362   : > { %v1867_v45 = vadd.f32 %v1866_v52, %v7559_v27  ;;  %v1868_v56 = vpop.f32.mrb[51].mxu1 }
 0x363   : > { %v1869_v12 = vadd.f32 %v1868_v56, %v7561_v51 }
 0x364   : > { %v7567_v0 = vpack.c.bf16 %v1867_v45, %v1863_v54 }
 0x365   : > { %v2046_v1 = vpack.c.bf16 %v1869_v12, %v1865_v59 }
 0x366   : > { %5654 = vmatprep.mubr.bf16.mxu1 %v7567_v0 }
 0x367   : > { %v1872_v43 = vpop.f32.mrb[52].mxu1  ;;  %v5624_v3 = vpop.f32.mrb[64].mxu0  ;;  %5638 = vmatprep.subr.bf16.mxu1 %v2046_v1 }
 0x368   : > { %v1873_v46 = vadd.f32 %v1872_v43, %v7559_v27  ;;  %v1874_v5 = vpop.f32.mrb[53].mxu1  ;;  %v1975_v6 = vpop.f32.mrb[65].mxu0  ;;  %5639 = vmatpush3.bf16.xpose.msra.mxu1 %v2046_v1  ;;  %v1984_v9 = vadd.f32 %v5624_v3, %v7570_v60 }
 0x369   : > { %v1876_v7 = vpop.f32.mrb[54].mxu1  ;;  %v5625_v8 = vpop.f32.mrb[66].mxu0  ;;  %v1875_v18 = vadd.f32 %v1874_v5, %v7561_v51  ;;  %v1976_v2 = vadd.f32 %v1975_v6, %v7570_v60 }
 0x36a   : > { %v1877_v10 = vadd.f32 %v1876_v7, %v7559_v27  ;;  %v1987_v13 = vadd.f32 %v5625_v8, %v7570_v60  ;;  %v1878_v63 = vpop.f32.mrb[55].mxu1  ;;  %v1978_v15 = vpop.f32.mrb[67].mxu0 }
 0x36b   : > { %v1879_v22 = vadd.f32 %v1878_v63, %v7561_v51  ;;  %v1979_v23 = vadd.f32 %v1978_v15, %v7570_v60 }
 0x36c   : > { %v7580_v24 = vpack.c.bf16 %v1877_v10, %v1873_v46  ;;  %v2055_v25 = vpack.c.bf16 %v1987_v13, %v1984_v9 }
 0x36d   : > { %v2047_v26 = vpack.c.bf16 %v1879_v22, %v1875_v18  ;;  %v2054_v17 = vpack.c.bf16 %v1979_v23, %v1976_v2 }
 0x36f   : > { %v1882_v28 = vpop.f32.mrb[56].mxu1  ;;  %5640 = vmatprep.subr.bf16.mxu1 %v2047_v26  ;;  %5670 = vmatprep.subr.bf16.mxu0 %v2054_v17 }
 0x370   : > { %v1883_v29 = vadd.f32 %v1882_v28, %v7559_v27  ;;  %v1884_v20 = vpop.f32.mrb[57].mxu1  ;;  %5641 = vmatpush3.bf16.xpose.msra.mxu1 %v2047_v26  ;;  %5671 = vmatpush3.bf16.msra.mxu0 %v2054_v17 }
 0x371   : > { %v1886_v62 = vpop.f32.mrb[58].mxu1  ;;  %5672 = vmatprep.subr.bf16.mxu0 %v2055_v25  ;;  %v1885_v36 = vadd.f32 %v1884_v20, %v7561_v51 }
 0x372   : > { %v1887_v31 = vadd.f32 %v1886_v62, %v7559_v27  ;;  %v1888_v32 = vpop.f32.mrb[59].mxu1 }
 0x373   : > { %v1889_v37 = vadd.f32 %v1888_v32, %v7561_v51 }
 0x374   : > { %v7586_v35 = vpack.c.bf16 %v1887_v31, %v1883_v29  ;;  %5673 = vmatpush3.bf16.msra.mxu0 %v2055_v25 }
 0x375   : > { %v2048_v11 = vpack.c.bf16 %v1889_v37, %v1885_v36 }
 0x377   : > { %v1892_v38 = vpop.f32.mrb[60].mxu1  ;;  %v5628_v39 = vpop.f32.mrb[68].mxu0  ;;  %5642 = vmatprep.subr.bf16.mxu1 %v2048_v11 }
 0x378   : > { %v1893_v40 = vadd.f32 %v1892_v38, %v7559_v27  ;;  %v1894_v14 = vpop.f32.mrb[61].mxu1  ;;  %v1991_v41 = vpop.f32.mrb[69].mxu0  ;;  %5643 = vmatpush3.bf16.xpose.msra.mxu1 %v2048_v11  ;;  %v2000_v53 = vadd.f32 %v5628_v39, %v7570_v60 }
 0x379   : > { %v1896_v42 = vpop.f32.mrb[62].mxu1  ;;  %v5629_v44 = vpop.f32.mrb[70].mxu0  ;;  %v1895_v52 = vadd.f32 %v1894_v14, %v7561_v51  ;;  %v1992_v54 = vadd.f32 %v1991_v41, %v7570_v60 }
 0x37a   : > { %v1897_v57 = vadd.f32 %v1896_v42, %v7559_v27  ;;  %v2003_v49 = vadd.f32 %v5629_v44, %v7570_v60  ;;  %v1898_v50 = vpop.f32.mrb[63].mxu1  ;;  %v1994_v30 = vpop.f32.mrb[71].mxu0 }
 0x37b   : > { %v1899_v45 = vadd.f32 %v1898_v50, %v7561_v51  ;;  %v1995_v56 = vadd.f32 %v1994_v30, %v7570_v60 }
 0x37c   : > { %v7596_v59 = vpack.c.bf16 %v1897_v57, %v1893_v40  ;;  %v2057_v12 = vpack.c.bf16 %v2003_v49, %v2000_v53 }
 0x37d   : > { %v2049_v61 = vpack.c.bf16 %v1899_v45, %v1895_v52  ;;  %v2056_v1 = vpack.c.bf16 %v1995_v56, %v1992_v54 }
 0x37f   : > { %v1902_v43 = vpop.f32.mrb[64].mxu1  ;;  %5644 = vmatprep.subr.bf16.mxu1 %v2049_v61  ;;  %5674 = vmatprep.subr.bf16.mxu0 %v2056_v1 }
 0x380   : > { %v1903_v3 = vadd.f32 %v1902_v43, %v7559_v27  ;;  %v1904_v46 = vpop.f32.mrb[65].mxu1  ;;  %5645 = vmatpush3.bf16.xpose.msra.mxu1 %v2049_v61  ;;  %5675 = vmatpush3.bf16.msra.mxu0 %v2056_v1 }
 0x381   : > { %v1906_v5 = vpop.f32.mrb[66].mxu1  ;;  %5676 = vmatprep.subr.bf16.mxu0 %v2057_v12  ;;  %v1905_v8 = vadd.f32 %v1904_v46, %v7561_v51 }
 0x382   : > { %v1907_v6 = vadd.f32 %v1906_v5, %v7559_v27  ;;  %v1908_v7 = vpop.f32.mrb[67].mxu1 }
 0x383   : > { %v1909_v9 = vadd.f32 %v1908_v7, %v7561_v51 }
 0x384   : > { %v7602_v10 = vpack.c.bf16 %v1907_v6, %v1903_v3  ;;  %5677 = vmatpush3.bf16.msra.mxu0 %v2057_v12 }
 0x385   : > { %v2050_v13 = vpack.c.bf16 %v1909_v9, %v1905_v8 }
 0x387   : > { %v1912_v63 = vpop.f32.mrb[68].mxu1  ;;  %v5632_v15 = vpop.f32.mrb[72].mxu0  ;;  %5646 = vmatprep.subr.bf16.mxu1 %v2050_v13 }
 0x388   : > { %v1913_v18 = vadd.f32 %v1912_v63, %v7559_v27  ;;  %v1914_v2 = vpop.f32.mrb[69].mxu1  ;;  %v2007_v22 = vpop.f32.mrb[73].mxu0  ;;  %5647 = vmatpush3.bf16.xpose.msra.mxu1 %v2050_v13  ;;  %v2016_v26 = vadd.f32 %v5632_v15, %v7570_v60 }
 0x389   : > { %v1916_v23 = vpop.f32.mrb[70].mxu1  ;;  %v5633_v25 = vpop.f32.mrb[74].mxu0  ;;  %v1915_v62 = vadd.f32 %v1914_v2, %v7561_v51  ;;  %v2008_v31 = vadd.f32 %v2007_v22, %v7570_v60 }
 0x38a   : > { %v1917_v17 = vadd.f32 %v1916_v23, %v7559_v27  ;;  %v2019_v28 = vadd.f32 %v5633_v25, %v7570_v60  ;;  %v1918_v29 = vpop.f32.mrb[71].mxu1  ;;  %v2010_v20 = vpop.f32.mrb[75].mxu0 }
 0x38b   : > { %v1919_v32 = vadd.f32 %v1918_v29, %v7561_v51  ;;  %v2011_v36 = vadd.f32 %v2010_v20, %v7570_v60 }
 0x38c   : > { %v7612_v37 = vpack.c.bf16 %v1917_v17, %v1913_v18  ;;  %v2059_v11 = vpack.c.bf16 %v2019_v28, %v2016_v26 }
 0x38d   : > { %v2051_v38 = vpack.c.bf16 %v1919_v32, %v1915_v62  ;;  %v2058_v39 = vpack.c.bf16 %v2011_v36, %v2008_v31 }
 0x38f   : > { %v1922_v40 = vpop.f32.mrb[72].mxu1  ;;  %5648 = vmatprep.subr.bf16.mxu1 %v2051_v38  ;;  %5678 = vmatprep.subr.bf16.mxu0 %v2058_v39 }
 0x390   : > { %v1923_v14 = vadd.f32 %v1922_v40, %v7559_v27  ;;  %v1924_v41 = vpop.f32.mrb[73].mxu1  ;;  %5649 = vmatpush3.bf16.xpose.msra.mxu1 %v2051_v38  ;;  %5679 = vmatpush3.bf16.msra.mxu0 %v2058_v39 }
 0x391   : > { %v1926_v42 = vpop.f32.mrb[74].mxu1  ;;  %5680 = vmatprep.subr.bf16.mxu0 %v2059_v11  ;;  %v1925_v57 = vadd.f32 %v1924_v41, %v7561_v51 }
 0x392   : > { %v1927_v44 = vadd.f32 %v1926_v42, %v7559_v27  ;;  %v1928_v53 = vpop.f32.mrb[75].mxu1 }
 0x393   : > { %v1929_v49 = vadd.f32 %v1928_v53, %v7561_v51 }
 0x394   : > { %v7618_v50 = vpack.c.bf16 %v1927_v44, %v1923_v14  ;;  %5681 = vmatpush3.bf16.msra.mxu0 %v2059_v11 }
 0x395   : > { %v2052_v30 = vpack.c.bf16 %v1929_v49, %v1925_v57 }
 0x397   : > { %v1932_v52 = vpop.f32.mrb[76].mxu1  ;;  %v5636_v54 = vpop.f32.mrb[76].mxu0  ;;  %5650 = vmatprep.subr.bf16.mxu1 %v2052_v30 }
 0x398   : > { %v1933_v45 = vadd.f32 %v1932_v52, %v7559_v27  ;;  %v1934_v56 = vpop.f32.mrb[77].mxu1  ;;  %v2023_v12 = vpop.f32.mrb[77].mxu0  ;;  %5651 = vmatpush3.bf16.xpose.msra.mxu1 %v2052_v30  ;;  %v2032_v43 = vadd.f32 %v5636_v54, %v7570_v60 }
 0x399   : > { %v1936_v61 = vpop.f32.mrb[78].mxu1  ;;  %v5637_v1 = vpop.f32.mrb[78].mxu0  ;;  %v1935_v7 = vadd.f32 %v1934_v56, %v7561_v51  ;;  %v2024_v8 = vadd.f32 %v2023_v12, %v7570_v60 }
 0x39a   : > { %v1937_v3 = vadd.f32 %v1936_v61, %v7559_v27  ;;  %v2035_v46 = vadd.f32 %v5637_v1, %v7570_v60  ;;  %v1938_v5 = vpop.f32.mrb[79].mxu1  ;;  %v2026_v6 = vpop.f32.mrb[79].mxu0 }
 0x39b   : > { %v1939_v9 = vadd.f32 %v1938_v5, %v7561_v51  ;;  %v2027_v13 = vadd.f32 %v2026_v6, %v7570_v60 }
 0x39c   : > { %v7628_v63 = vpack.c.bf16 %v1937_v3, %v1933_v45  ;;  %v2061_v15 = vpack.c.bf16 %v2035_v46, %v2032_v43 }
 0x39d   : > { %v2053_v18 = vpack.c.bf16 %v1939_v9, %v1935_v7  ;;  %v2060_v2 = vpack.c.bf16 %v2027_v13, %v2024_v8 }
 0x39f   : > { %5652 = vmatprep.subr.bf16.mxu1 %v2053_v18  ;;  %5682 = vmatprep.subr.bf16.mxu0 %v2060_v2 }
 0x3a0   : > { %5653 = vmatpush3.bf16.xpose.msra.mxu1 %v2053_v18  ;;  %5683 = vmatpush3.bf16.msra.mxu0 %v2060_v2 }
 0x3a1   : > { %5684 = vmatprep.subr.bf16.mxu0 %v2061_v15 }
 0x3a4   : > { %5685 = vmatpush3.bf16.msra.mxu0 %v2061_v15 }
 0x3a7   : > { %5655 = vmatmul.mubr.bf16.vlgmr.msra.gmra.mrb[80].mxu1 %v7580_v24 }
 0x3a8   : > { %5658 = vmatprep.mubr.bf16.mxu1 %v7586_v35 }
 0x3af   : > { %5659 = vmatmul.mubr.bf16.gmra.mrb[84].mxu1 %v7596_v59 }
 0x3b0   : > { %5662 = vmatprep.mubr.bf16.mxu1 %v7602_v10 }
 0x3b7   : > { %5663 = vmatmul.mubr.bf16.gmra.mrb[88].mxu1 %v7612_v37 }
 0x3b8   : > { %5666 = vmatprep.mubr.bf16.mxu1 %v7618_v50 }
 0x3bf   : > { %5667 = vmatmul.mubr.bf16.gmra.mrb[92].mxu1 %v7628_v63 }
 0x3c0   : > { %2829 = vmatprep.mubr.bf16.mxu1 %v7567_v0 }
 0x47a   : > { %v5656_v27 = vpop.f32.mrb[80].mxu1 }
 0x47b   : > { %2163 = vmax.xlane.f32.xlu1 %v5656_v27  ;;  %v2096_v51 = vpop.f32.mrb[81].mxu1 }
 0x47c   : > { %2159 = vmax.xlane.f32.xlu0 %v2096_v51  ;;  %v5657_v60 = vpop.f32.mrb[82].mxu1 }
 0x47d   : > { %v2099_v22 = vpop.f32.mrb[83].mxu1 }
 0x47f   : > { %2165 = vmax.xlane.f32.xlu1 %v5657_v60 }
 0x480   : > { %2161 = vmax.xlane.f32.xlu0 %v2099_v22 }
 0x482   : > { %v5660_v23 = vpop.f32.mrb[84].mxu1 }
 0x483   : > { %v2112_v25 = vpop.f32.mrb[85].mxu1 }
 0x484   : > { %2167 = vmax.xlane.f32.xlu0 %v2112_v25  ;;  %v5661_v26 = vpop.f32.mrb[86].mxu1 }
 0x485   : > { %v2115_v17 = vpop.f32.mrb[87].mxu1 }
 0x486   : > { %2169 = vmax.xlane.f32.xlu1 %v2115_v17 }
 0x488   : > { %2171 = vmax.xlane.f32.xlu0 %v5660_v23 }
 0x48a   : > { %2173 = vmax.xlane.f32.xlu1 %v5661_v26  ;;  %v7638_v28 = vpop.f32.mrb[88].mxu1 }
 0x48b   : > { %v2128_v29 = vpop.f32.mrb[89].mxu1 }
 0x48c   : > { %2175 = vmax.xlane.f32.xlu0 %v2128_v29  ;;  %v7640_v20 = vpop.f32.mrb[90].mxu1 }
 0x48d   : > { %v2131_v62 = vpop.f32.mrb[91].mxu1 }
 0x48e   : > { %2177 = vmax.xlane.f32.xlu1 %v2131_v62 }
 0x490   : > { %2179 = vmax.xlane.f32.xlu0 %v7638_v28 }
 0x492   : > { %2181 = vmax.xlane.f32.xlu1 %v7640_v20  ;;  %v7644_v31 = vpop.f32.mrb[92].mxu1 }
 0x493   : > { %v7646_v32 = vpop.f32.mrb[93].mxu1 }
 0x494   : > { %2183 = vmax.xlane.f32.xlu0 %v7646_v32  ;;  %v7649_v36 = vpop.f32.mrb[94].mxu1 }
 0x495   : > { %v7651_v11 = vpop.f32.mrb[95].mxu1 }
 0x496   : > { %2185 = vmax.xlane.f32.xlu1 %v7651_v11 }
 0x498   : > { %2187 = vmax.xlane.f32.xlu0 %v7644_v31 }
 0x49a   : > { %2189 = vmax.xlane.f32.xlu1 %v7649_v36 }
 0x508   : > { %v2164_v38 = vpop.xlane.xlu1 %2163 }
 0x509   : > { %v2193_v39 = vsub.f32 %v5656_v27, %v2164_v38  ;;  %v2160_v40 = vpop.xlane.xlu0 %2159 }
 0x50a   : > { %v2191_v14 = vsub.f32 %v2096_v51, %v2160_v40 }
 0x50b   : > { %v2211_v44 = vmul.f32 1.442695, %v2193_v39 }
 0x50c   : > { %v2207_v41 = vmul.f32 1.442695, %v2191_v14  ;;  %v2166_v42 = vpop.xlane.xlu1 %2165 }
 0x50d   : > { %v2194_v53 = vsub.f32 %v5657_v60, %v2166_v42  ;;  %v2162_v57 = vpop.xlane.xlu0 %2161 }
 0x50e   : > { %6232 = vpow2.f32 %v2207_v41  ;;  %v2192_v49 = vsub.f32 %v2099_v22, %v2162_v57 }
 0x50f   : > { %6234 = vpow2.f32 %v2211_v44  ;;  %v2213_v52 = vmul.f32 1.442695, %v2194_v53 }
 0x510   : > { %v2209_v30 = vmul.f32 1.442695, %v2192_v49 }
 0x511   : > { %v2168_v54 = vpop.xlane.xlu0 %2167 }
 0x512   : > { %6236 = vpow2.f32 %v2209_v30  ;;  %v2195_v45 = vsub.f32 %v2112_v25, %v2168_v54 }
 0x513   : > { %v2170_v56 = vpop.xlane.xlu1 %2169  ;;  %6238 = vpow2.f32 %v2213_v52 }
 0x514   : > { %v2215_v12 = vmul.f32 1.442695, %v2195_v45  ;;  %v2196_v61 = vsub.f32 %v2115_v17, %v2170_v56 }
 0x515   : > { %v2172_v1 = vpop.xlane.xlu0 %2171 }
 0x516   : > { %6240 = vpow2.f32 %v2215_v12  ;;  %v2217_v43 = vmul.f32 1.442695, %v2196_v61  ;;  %v2197_v3 = vsub.f32 %v5660_v23, %v2172_v1 }
 0x517   : > { %v2174_v46 = vpop.xlane.xlu1 %2173 }
 0x518   : > { %v7656_v5 = vpop.eup %6232  ;;  %v2219_v6 = vmul.f32 1.442695, %v2197_v3  ;;  %v2198_v7 = vsub.f32 %v5661_v26, %v2174_v46  ;;  %6242 = vpow2.f32 %v2217_v43  ;;  %v6066_v43 = vld [vmem:[#allocation11 + $0x4] ss:$12 sps:$4 sm:$0xff]   ;;  %v6091_v3 = vld [vmem:[#allocation11 + $0xc8] ss:$12 sps:$4 sm:$0xff]  }
 0x519   : > { %v2176_v8 = vpop.xlane.xlu0 %2175  ;;  %2239 = vadd.xlane.f32.xlu0 %v7656_v5  ;;  %v7659_v15 = vpop.eup %6234  ;;  %2684 = vmatprep.subr.bf16.mxu0 %v6066_v43  ;;  %v6092_v46 = vld [vmem:[#allocation11 + $0x8] ss:$12 sps:$4 sm:$0xff]  }
 0x51a   : > { %6244 = vpow2.f32 %v2219_v6  ;;  %v2221_v9 = vmul.f32 1.442695, %v2198_v7  ;;  %v2199_v13 = vsub.f32 %v2128_v29, %v2176_v8  ;;  %5382 = vmatprep.subr.bf16.mxu1 %v6091_v3  ;;  %v6096_v6 = vld [vmem:[#allocation11 + $0xe0] ss:$12 sps:$4 sm:$0xff]   ;;  %v6101_v8 = vld [vmem:[#allocation11 + $0xf8] ss:$12 sps:$4 sm:$0xff]  }
 0x51b   : > { %v2178_v18 = vpop.xlane.xlu1 %2177  ;;  %5383 = vmatpush3.bf16.msra.mxu1 %v6092_v46  ;;  %v6097_v7 = vld [vmem:[#allocation11 + $0x20] ss:$12 sps:$4 sm:$0xff]  }
 0x51c   : > { %v7661_v2 = vpop.eup %6236  ;;  %v2223_v27 = vmul.f32 1.442695, %v2199_v13  ;;  %v2200_v51 = vsub.f32 %v2131_v62, %v2178_v18  ;;  %6246 = vpow2.f32 %v2221_v9  ;;  %5384 = vmatprep.subr.bf16.mxu1 %v6096_v6  ;;  %v6102_v9 = vld [vmem:[#allocation11 + $0x38] ss:$12 sps:$4 sm:$0xff]   ;;  %v6106_v13 = vld [vmem:[#allocation11 + $0x110] ss:$12 sps:$4 sm:$0xff]  }
 0x51d   : > { %v2180_v60 = vpop.xlane.xlu0 %2179  ;;  %2243 = vadd.xlane.f32.xlu0 %v7659_v15  ;;  %2241 = vadd.xlane.f32.xlu1 %v7661_v2  ;;  %v7666_v25 = vpop.eup %6238  ;;  %v6107_v18 = vld [vmem:[#allocation11 + $0x50] ss:$12 sps:$4 sm:$0xff]  }
 0x51e   : > { %6248 = vpow2.f32 %v2223_v27  ;;  %v2225_v22 = vmul.f32 1.442695, %v2200_v51  ;;  %v2201_v23 = vsub.f32 %v7638_v28, %v2180_v60  ;;  %v6111_v27 = vld [vmem:[#allocation11 + $0x128] ss:$12 sps:$4 sm:$0xff]   ;;  %v6116_v60 = vld [vmem:[#allocation11 + $0x140] ss:$12 sps:$4 sm:$0xff]  }
 0x51f   : > { %v2182_v26 = vpop.xlane.xlu1 %2181  ;;  %5385 = vmatpush3.bf16.msra.mxu1 %v6097_v7  ;;  %v6112_v51 = vld [vmem:[#allocation11 + $0x68] ss:$12 sps:$4 sm:$0xff]  }
 0x520   : > { %v7668_v17 = vpop.eup %6240  ;;  %v2227_v29 = vmul.f32 1.442695, %v2201_v23  ;;  %v2202_v38 = vsub.f32 %v7640_v20, %v2182_v26  ;;  %6250 = vpow2.f32 %v2225_v22  ;;  %5386 = vmatprep.subr.bf16.mxu1 %v6101_v8  ;;  %v6117_v22 = vld [vmem:[#allocation11 + $0x80] ss:$12 sps:$4 sm:$0xff]   ;;  %v6121_v23 = vld [vmem:[#allocation11 + $0x158] ss:$12 sps:$4 sm:$0xff]  }
 0x521   : > { %2247 = vadd.xlane.f32.xlu0 %v7668_v17  ;;  %v2184_v62 = vpop.xlane.xlu0 %2183  ;;  %2245 = vadd.xlane.f32.xlu1 %v7666_v25  ;;  %v6122_v26 = vld [vmem:[#allocation11 + $0x98] ss:$12 sps:$4 sm:$0xff]  }
 0x522   : > { %6252 = vpow2.f32 %v2227_v29  ;;  %v2229_v39 = vmul.f32 1.442695, %v2202_v38  ;;  %v2203_v40 = vsub.f32 %v7646_v32, %v2184_v62  ;;  %v7674_v14 = vpop.eup %6242 }
 0x523   : > { %v2186_v28 = vpop.xlane.xlu1 %2185  ;;  %5387 = vmatpush3.bf16.msra.mxu1 %v6102_v9  ;;  %v6064_v9 = vld [vmem:[#allocation11] ss:$12 sps:$4 sm:$0xff]  }
 0x524   : > { %v7676_v41 = vpop.eup %6244  ;;  %v2231_v42 = vmul.f32 1.442695, %v2203_v40  ;;  %v2204_v44 = vsub.f32 %v7651_v11, %v2186_v28  ;;  %6254 = vpow2.f32 %v2229_v39  ;;  %5388 = vmatprep.subr.bf16.mxu1 %v6106_v13 }
 0x525   : > { %2251 = vadd.xlane.f32.xlu0 %v7676_v41  ;;  %v2188_v20 = vpop.xlane.xlu0 %2187  ;;  %2249 = vadd.xlane.f32.xlu1 %v7674_v14 }
 0x526   : > { %6256 = vpow2.f32 %v2231_v42  ;;  %v2233_v53 = vmul.f32 1.442695, %v2204_v44  ;;  %v2205_v57 = vsub.f32 %v7644_v31, %v2188_v20  ;;  %v7682_v49 = vpop.eup %6246 }
 0x527   : > { %v2190_v32 = vpop.xlane.xlu1 %2189  ;;  %5389 = vmatpush3.bf16.msra.mxu1 %v6107_v18  ;;  %v6069_v18 = vld [vmem:[#allocation11 + $0x1c] ss:$12 sps:$4 sm:$0xff]  }
 0x528   : > { %v7684_v30 = vpop.eup %6248  ;;  %v2235_v52 = vmul.f32 1.442695, %v2205_v57  ;;  %v2206_v54 = vsub.f32 %v7649_v36, %v2190_v32  ;;  %6258 = vpow2.f32 %v2233_v53  ;;  %5390 = vmatprep.subr.bf16.mxu1 %v6111_v27 }
 0x529   : > { %2255 = vadd.xlane.f32.xlu0 %v7684_v30  ;;  %2253 = vadd.xlane.f32.xlu1 %v7682_v49 }
 0x52a   : > { %6260 = vpow2.f32 %v2235_v52  ;;  %v2237_v11 = vmul.f32 1.442695, %v2206_v54  ;;  %v7689_v45 = vpop.eup %6250 }
 0x52b   : > { %5391 = vmatpush3.bf16.msra.mxu1 %v6112_v51 }
 0x52c   : > { %v7691_v56 = vpop.eup %6252  ;;  %6262 = vpow2.f32 %v2237_v11  ;;  %5392 = vmatprep.subr.bf16.mxu1 %v6116_v60 }
 0x52d   : > { %2259 = vadd.xlane.f32.xlu0 %v7691_v56  ;;  %2257 = vadd.xlane.f32.xlu1 %v7689_v45 }
 0x52e   : > { %v7695_v31 = vpop.eup %6254 }
 0x52f   : > { %5393 = vmatpush3.bf16.msra.mxu1 %v6117_v22 }
 0x530   : > { %v7697_v12 = vpop.eup %6256  ;;  %5394 = vmatprep.subr.bf16.mxu1 %v6121_v23  ;;  %v6072_v23 = vld [vmem:[#allocation11 + $0x34] ss:$12 sps:$4 sm:$0xff]  }
 0x531   : > { %2263 = vadd.xlane.f32.xlu0 %v7697_v12  ;;  %2261 = vadd.xlane.f32.xlu1 %v7695_v31 }
 0x532   : > { %v7701_v36 = vpop.eup %6258 }
 0x533   : > { %5395 = vmatpush3.bf16.msra.mxu1 %v6122_v26 }
 0x534   : > { %v7703_v61 = vpop.eup %6260 }
 0x535   : > { %2267 = vadd.xlane.f32.xlu0 %v7703_v61  ;;  %2265 = vadd.xlane.f32.xlu1 %v7701_v36 }
 0x536   : > { %v7707_v1 = vpop.eup %6262 }
 0x539   : > { %2269 = vadd.xlane.f32.xlu1 %v7707_v1 }
 0x5a6   : > { %v2240_v29 = vpop.xlane.xlu0 %2239 }
 0x5a7   : > { %6264 = vrcp.f32 %v2240_v29 }
 0x5aa   : > { %v2244_v38 = vpop.xlane.xlu0 %2243  ;;  %v2242_v62 = vpop.xlane.xlu1 %2241 }
 0x5ab   : > { %6266 = vrcp.f32 %v2242_v62 }
 0x5ac   : > { %6268 = vrcp.f32 %v2244_v38 }
 0x5ae   : > { %v2248_v39 = vpop.xlane.xlu0 %2247  ;;  %v2246_v40 = vpop.xlane.xlu1 %2245 }
 0x5af   : > { %6270 = vrcp.f32 %v2246_v40 }
 0x5b0   : > { %6272 = vrcp.f32 %v2248_v39 }
 0x5b1   : > { %v6265_v44 = vpop.eup %6264 }
 0x5b2   : > { %v2252_v28 = vpop.xlane.xlu0 %2251  ;;  %v2250_v42 = vpop.xlane.xlu1 %2249  ;;  %v2287_v32 = vmul.f32 %v6265_v44, %v7656_v5 }
 0x5b3   : > { %6274 = vrcp.f32 %v2250_v42 }
 0x5b4   : > { %6276 = vrcp.f32 %v2252_v28  ;;  %v6075_v28 = vld [vmem:[#allocation11 + $0x4c] ss:$12 sps:$4 sm:$0xff]  }
 0x5b5   : > { %v6267_v20 = vpop.eup %6266 }
 0x5b6   : > { %v2256_v53 = vpop.xlane.xlu0 %2255  ;;  %v2254_v57 = vpop.xlane.xlu1 %2253  ;;  %v2288_v52 = vmul.f32 %v6267_v20, %v7661_v2 }
 0x5b7   : > { %v6269_v54 = vpop.eup %6268  ;;  %6278 = vrcp.f32 %v2254_v57 }
 0x5b8   : > { %v2303_v11 = vpack.c.bf16 %v2288_v52, %v2287_v32  ;;  %6280 = vrcp.f32 %v2256_v53  ;;  %v2289_v6 = vmul.f32 %v6269_v54, %v7659_v15  ;;  %v6067_v15 = vld [vmem:[#allocation11 + $0x18] ss:$12 sps:$4 sm:$0xff]  }
 0x5b9   : > { %v6271_v43 = vpop.eup %6270  ;;  %v6078_v32 = vld [vmem:[#allocation11 + $0x64] ss:$12 sps:$4 sm:$0xff]  }
 0x5ba   : > { %v2260_v3 = vpop.xlane.xlu0 %2259  ;;  %v2258_v46 = vpop.xlane.xlu1 %2257  ;;  %v2290_v7 = vmul.f32 %v6271_v43, %v7666_v25  ;;  %5686 = vmatprep.mubr.bf16.mxu0 %v2303_v11 }
 0x5bb   : > { %v6273_v8 = vpop.eup %6272  ;;  %6282 = vrcp.f32 %v2258_v46 }
 0x5bc   : > { %v2304_v13 = vpack.c.bf16 %v2290_v7, %v2289_v6  ;;  %6284 = vrcp.f32 %v2260_v3  ;;  %v2291_v51 = vmul.f32 %v6273_v8, %v7668_v17  ;;  %v6070_v17 = vld [vmem:[#allocation11 + $0x30] ss:$12 sps:$4 sm:$0xff]   ;;  %v6076_v3 = vld [vmem:[#allocation11 + $0x60] ss:$12 sps:$4 sm:$0xff]  }
 0x5bd   : > { %v6275_v5 = vpop.eup %6274 }
 0x5be   : > { %v2264_v2 = vpop.xlane.xlu0 %2263  ;;  %v2262_v27 = vpop.xlane.xlu1 %2261  ;;  %5687 = vmatmul.mubr.bf16.vlgmr.msra.gmra.mrb[80].mxu0 %v2304_v13  ;;  %v2292_v60 = vmul.f32 %v6275_v5, %v7674_v14 }
 0x5bf   : > { %v6277_v22 = vpop.eup %6276  ;;  %6286 = vrcp.f32 %v2262_v27  ;;  %2685 = vmatpush1.bf16.msra.mxu0 %v6064_v9  ;;  %v6079_v9 = vld [vmem:[#allocation11 + $0x78] ss:$12 sps:$4 sm:$0xff]   ;;  %v6082_v27 = vld [vmem:[#allocation11 + $0x90] ss:$12 sps:$4 sm:$0xff]  }
 0x5c0   : > { %v2305_v25 = vpack.c.bf16 %v2292_v60, %v2291_v51  ;;  %2686 = vmatprep.subr.bf16.mxu0 %v6069_v18  ;;  %6288 = vrcp.f32 %v2264_v2  ;;  %v2293_v62 = vmul.f32 %v6277_v22, %v7676_v41  ;;  %v6073_v41 = vld [vmem:[#allocation11 + $0x48] ss:$12 sps:$4 sm:$0xff]   ;;  %v6087_v51 = vld [vmem:[#allocation11 + $0xac] ss:$12 sps:$4 sm:$0xff]  }
 0x5c1   : > { %v6279_v26 = vpop.eup %6278  ;;  %v6088_v60 = vld [vmem:[#allocation11 + $0xc0] ss:$12 sps:$4 sm:$0xff]   ;;  %v6095_v22 = vld [vmem:[#allocation11 + $0xdc] ss:$12 sps:$4 sm:$0xff]  }
 0x5c2   : > { %v2268_v29 = vpop.xlane.xlu0 %2267  ;;  %v2266_v38 = vpop.xlane.xlu1 %2265  ;;  %5690 = vmatprep.mubr.bf16.mxu0 %v2305_v25  ;;  %v2294_v39 = vmul.f32 %v6279_v26, %v7682_v49  ;;  %v6105_v25 = vld [vmem:[#allocation11 + $0x10c] ss:$12 sps:$4 sm:$0xff]  }
 0x5c3   : > { %v6281_v40 = vpop.eup %6280  ;;  %6290 = vrcp.f32 %v2266_v38  ;;  %2687 = vmatpush1.bf16.msra.mxu0 %v6067_v15  ;;  %v6098_v15 = vld [vmem:[#allocation11 + $0xf0] ss:$12 sps:$4 sm:$0xff]   ;;  %v6108_v26 = vld [vmem:[#allocation11 + $0x120] ss:$12 sps:$4 sm:$0xff]   ;;  %v6113_v38 = vld [vmem:[#allocation11 + $0x138] ss:$12 sps:$4 sm:$0xff]  }
 0x5c4   : > { %6292 = vrcp.f32 %v2268_v29  ;;  %v2306_v14 = vpack.c.bf16 %v2294_v39, %v2293_v62  ;;  %2688 = vmatprep.subr.bf16.mxu0 %v6072_v23  ;;  %v2295_v20 = vmul.f32 %v6281_v40, %v7684_v30  ;;  %v6081_v30 = vld [vmem:[#allocation11 + $0x7c] ss:$12 sps:$4 sm:$0xff]   ;;  %v6120_v62 = vld [vmem:[#allocation11 + $0x154] ss:$12 sps:$4 sm:$0xff]   ;;  %v6125_v40 = vld [vmem:[#allocation11 + $0x16c] ss:$12 sps:$4 sm:$0xff]  }
 0x5c5   : > { %v6283_v42 = vpop.eup %6282  ;;  %v6103_v23 = vld [vmem:[#allocation11 + $0x108] ss:$12 sps:$4 sm:$0xff]   ;;  %v6118_v39 = vld [vmem:[#allocation11 + $0x150] ss:$12 sps:$4 sm:$0xff]  }
 0x5c6   : > { %v2270_v44 = vpop.xlane.xlu1 %2269  ;;  %5691 = vmatmul.mubr.bf16.gmra.mrb[84].mxu0 %v2306_v14  ;;  %v2296_v53 = vmul.f32 %v6283_v42, %v7689_v45  ;;  %v6285_v57 = vpop.eup %6284  ;;  %v6115_v29 = vld [vmem:[#allocation11 + $0x13c] ss:$12 sps:$4 sm:$0xff]   ;;  %v6130_v42 = vld [vmem:[#allocation13 + $0x4] ss:$12 sps:$4 sm:$0xff]  }
 0x5c7   : > { %6294 = vrcp.f32 %v2270_v44  ;;  %2689 = vmatpush1.bf16.msra.mxu0 %v6070_v17  ;;  %v2297_v54 = vmul.f32 %v6285_v57, %v7691_v56  ;;  %v6084_v56 = vld [vmem:[#allocation11 + $0x94] ss:$12 sps:$4 sm:$0xff]   ;;  %v6126_v17 = vld [vmem:[#allocation11 + $0x170] ss:$12 sps:$4 sm:$0xff]  }
 0x5c8   : > { %v2307_v49 = vpack.c.bf16 %v2296_v53, %v2295_v20  ;;  %2690 = vmatprep.subr.bf16.mxu0 %v6075_v28  ;;  %v6123_v14 = vld [vmem:[#allocation11 + $0x168] ss:$12 sps:$4 sm:$0xff]   ;;  %v6127_v28 = vld [vmem:[#allocation11 + $0xb0] ss:$12 sps:$4 sm:$0xff]   ;;  %5396 = vmatprep.subr.bf16.mxu1 %v6126_v17 }
 0x5c9   : > { %v6287_v52 = vpop.eup %6286  ;;  %5397 = vmatpush3.bf16.msra.mxu1 %v6127_v28  ;;  %v6143_v44 = vld [vmem:[#allocation13 + $0x8] ss:$12 sps:$4 sm:$0xff]  }
 0x5ca   : > { %5694 = vmatprep.mubr.bf16.mxu0 %v2307_v49  ;;  %v2298_v11 = vmul.f32 %v6287_v52, %v7695_v31  ;;  %v6289_v43 = vpop.eup %6288  ;;  %3266 = vmatprep.subr.bf16.mxu1 %v6130_v42  ;;  %v6128_v52 = vld [vmem:[#allocation13] ss:$12 sps:$4 sm:$0xff]   ;;  %v6155_v17 = vld [vmem:[#allocation13 + $0xa8] ss:$12 sps:$4 sm:$0xff]  }
 0x5cb   : > { %2691 = vmatpush1.bf16.msra.mxu0 %v6073_v41  ;;  %v2299_v7 = vmul.f32 %v6289_v43, %v7697_v12  ;;  %v6085_v12 = vld [vmem:[#allocation11 + $0xa8] ss:$12 sps:$4 sm:$0xff]  }
 0x5cc   : > { %v2308_v46 = vpack.c.bf16 %v2298_v11, %v2297_v54  ;;  %2692 = vmatprep.subr.bf16.mxu0 %v6078_v32  ;;  %v6133_v54 = vld [vmem:[#allocation13 + $0x1c] ss:$12 sps:$4 sm:$0xff]   ;;  %v6144_v11 = vld [vmem:[#allocation13 + $0x20] ss:$12 sps:$4 sm:$0xff]  }
 0x5cd   : > { %v6291_v6 = vpop.eup %6290 }
 0x5ce   : > { %v6293_v45 = vpop.eup %6292  ;;  %5695 = vmatmul.mubr.bf16.gmra.mrb[88].mxu0 %v2308_v46  ;;  %v2300_v8 = vmul.f32 %v6291_v6, %v7701_v36  ;;  %v6090_v36 = vld [vmem:[#allocation11 + $0xc4] ss:$12 sps:$4 sm:$0xff]  }
 0x5cf   : > { %2693 = vmatpush1.bf16.msra.mxu0 %v6076_v3  ;;  %v2301_v31 = vmul.f32 %v6293_v45, %v7703_v61  ;;  %v6093_v61 = vld [vmem:[#allocation11 + $0xd8] ss:$12 sps:$4 sm:$0xff]  }
 0x5d0   : > { %v2309_v18 = vpack.c.bf16 %v2300_v8, %v2299_v7  ;;  %2694 = vmatprep.subr.bf16.mxu0 %v6081_v30  ;;  %v6131_v3 = vld [vmem:[#allocation13 + $0x18] ss:$12 sps:$4 sm:$0xff]   ;;  %v6136_v30 = vld [vmem:[#allocation13 + $0x34] ss:$12 sps:$4 sm:$0xff]  }
 0x5d1   : > { %v6295_v13 = vpop.eup %6294  ;;  %v6148_v6 = vld [vmem:[#allocation13 + $0x38] ss:$12 sps:$4 sm:$0xff]  }
 0x5d2   : > { %v2302_v5 = vmul.f32 %v6295_v13, %v7707_v1  ;;  %5698 = vmatprep.mubr.bf16.mxu0 %v2309_v18  ;;  %v6100_v1 = vld [vmem:[#allocation11 + $0xf4] ss:$12 sps:$4 sm:$0xff]   ;;  %v6134_v13 = vld [vmem:[#allocation13 + $0x30] ss:$12 sps:$4 sm:$0xff]   ;;  %v6139_v18 = vld [vmem:[#allocation13 + $0x4c] ss:$12 sps:$4 sm:$0xff]  }
 0x5d3   : > { %2695 = vmatpush1.bf16.msra.mxu0 %v6079_v9 }
 0x5d4   : > { %v2310_v2 = vpack.c.bf16 %v2302_v5, %v2301_v31  ;;  %2696 = vmatprep.subr.bf16.mxu0 %v6084_v56  ;;  %v6137_v31 = vld [vmem:[#allocation13 + $0x48] ss:$12 sps:$4 sm:$0xff]  }
 0x5d6   : > { %5699 = vmatmul.mubr.bf16.gmra.mrb[92].mxu0 %v2310_v2  ;;  %v6142_v2 = vld [vmem:[#allocation13 + $0x64] ss:$12 sps:$4 sm:$0xff]  }
 0x5d7   : > { %2716 = vmatprep.mubr.bf16.mxu0 %v7567_v0  ;;  %2697 = vmatpush1.bf16.msra.mxu0 %v6082_v27  ;;  %v6110_v0 = vld [vmem:[#allocation11 + $0x124] ss:$12 sps:$4 sm:$0xff]   ;;  %v6153_v27 = vld [vmem:[#allocation13 + $0x68] ss:$12 sps:$4 sm:$0xff]  }
 0x5d8   : > { %2698 = vmatprep.subr.bf16.mxu0 %v6087_v51 }
 0x5db   : > { %2699 = vmatpush1.bf16.msra.mxu0 %v6085_v12 }
 0x5dc   : > { %2700 = vmatprep.subr.bf16.mxu0 %v6090_v36 }
 0x5df   : > { %2701 = vmatpush1.bf16.msra.mxu0 %v6088_v60 }
 0x5e0   : > { %2702 = vmatprep.subr.bf16.mxu0 %v6095_v22  ;;  %v6140_v22 = vld [vmem:[#allocation13 + $0x60] ss:$12 sps:$4 sm:$0xff]  }
 0x5e3   : > { %2703 = vmatpush1.bf16.msra.mxu0 %v6093_v61  ;;  %v6147_v61 = vld [vmem:[#allocation13 + $0x7c] ss:$12 sps:$4 sm:$0xff]  }
 0x5e4   : > { %2704 = vmatprep.subr.bf16.mxu0 %v6100_v1 }
 0x5e7   : > { %2705 = vmatpush1.bf16.msra.mxu0 %v6098_v15  ;;  %v6145_v15 = vld [vmem:[#allocation13 + $0x78] ss:$12 sps:$4 sm:$0xff]  }
 0x5e8   : > { %2706 = vmatprep.subr.bf16.mxu0 %v6105_v25 }
 0x5eb   : > { %2707 = vmatpush1.bf16.msra.mxu0 %v6103_v23  ;;  %v6152_v23 = vld [vmem:[#allocation13 + $0x94] ss:$12 sps:$4 sm:$0xff]  }
 0x5ec   : > { %2708 = vmatprep.subr.bf16.mxu0 %v6110_v0  ;;  %v6158_v0 = vld [vmem:[#allocation13 + $0x98] ss:$12 sps:$4 sm:$0xff]  }
 0x5ef   : > { %2709 = vmatpush1.bf16.msra.mxu0 %v6108_v26 }
 0x5f0   : > { %2710 = vmatprep.subr.bf16.mxu0 %v6115_v29 }
 0x5f3   : > { %2711 = vmatpush1.bf16.msra.mxu0 %v6113_v38 }
 0x5f4   : > { %2712 = vmatprep.subr.bf16.mxu0 %v6120_v62 }
 0x5f7   : > { %2713 = vmatpush1.bf16.msra.mxu0 %v6118_v39  ;;  %v6150_v39 = vld [vmem:[#allocation13 + $0x90] ss:$12 sps:$4 sm:$0xff]  }
 0x5f8   : > { %2714 = vmatprep.subr.bf16.mxu0 %v6125_v40  ;;  %v6157_v40 = vld [vmem:[#allocation13 + $0xac] ss:$12 sps:$4 sm:$0xff]  }
 0x5fb   : > { %2715 = vmatpush1.bf16.msra.mxu0 %v6123_v14 }
 0x5fc   : > { %5702 = vmatprep.subr.bf16.mxu0 %v6143_v44 }
 0x691   : > { %v5688_v20 = vpop.f32.mrb[80].mxu0 }
 0x692   : > { %v2345_v53 = vpop.f32.mrb[81].mxu0 }
 0x693   : > { %v5689_v57 = vpop.f32.mrb[82].mxu0 }
 0x694   : > { %v2409_v41 = vpack.c.bf16 %v5689_v57, %v5688_v20  ;;  %v2348_v49 = vpop.f32.mrb[83].mxu0 }
 0x695   : > { %v2408_v32 = vpack.c.bf16 %v2348_v49, %v2345_v53 }
 0x697   : > { %2717 = vmatmul.mubr.bf16.vlgmr.msra.gmra.mrb[96].mxu0 %v2408_v32  ;;  %2830 = vmatmul.mubr.bf16.vlgmr.msra.gmra.mrb[96].mxu1 %v2408_v32 }
 0x698   : > { %2726 = vmatprep.mubr.bf16.mxu0 %v7580_v24  ;;  %2837 = vmatprep.mubr.bf16.mxu1 %v7580_v24  ;;  %v6149_v24 = vld [vmem:[#allocation13 + $0x50] ss:$12 sps:$4 sm:$0xff]  }
 0x699   : > { %3267 = vmatpush1.bf16.msra.mxu1 %v6128_v52  ;;  %v5692_v43 = vpop.f32.mrb[84].mxu0  ;;  %5703 = vmatpush3.bf16.msra.mxu0 %v6143_v44 }
 0x69a   : > { %v2361_v46 = vpop.f32.mrb[85].mxu0  ;;  %3268 = vmatprep.subr.bf16.mxu1 %v6133_v54  ;;  %5704 = vmatprep.subr.bf16.mxu0 %v6144_v11 }
 0x69b   : > { %v5693_v45 = vpop.f32.mrb[86].mxu0 }
 0x69c   : > { %v2411_v7 = vpack.c.bf16 %v5693_v45, %v5692_v43  ;;  %v2364_v8 = vpop.f32.mrb[87].mxu0 }
 0x69d   : > { %v2410_v9 = vpack.c.bf16 %v2364_v8, %v2361_v46  ;;  %3269 = vmatpush1.bf16.msra.mxu1 %v6131_v3  ;;  %5705 = vmatpush3.bf16.msra.mxu0 %v6144_v11 }
 0x69e   : > { %3270 = vmatprep.subr.bf16.mxu1 %v6136_v30  ;;  %5706 = vmatprep.subr.bf16.mxu0 %v6148_v6 }
 0x69f   : > { %2727 = vmatmul.mubr.bf16.gmra.mrb[100].mxu0 %v2409_v41  ;;  %2838 = vmatmul.mubr.bf16.gmra.mrb[100].mxu1 %v2409_v41 }
 0x6a0   : > { %2736 = vmatprep.mubr.bf16.mxu0 %v7586_v35  ;;  %2845 = vmatprep.mubr.bf16.mxu1 %v7586_v35  ;;  %v6154_v35 = vld [vmem:[#allocation13 + $0x80] ss:$12 sps:$4 sm:$0xff]  }
 0x6a1   : > { %v5696_v56 = vpop.f32.mrb[88].mxu0  ;;  %3271 = vmatpush1.bf16.msra.mxu1 %v6134_v13  ;;  %5707 = vmatpush3.bf16.msra.mxu0 %v6148_v6 }
 0x6a2   : > { %v2377_v5 = vpop.f32.mrb[89].mxu0  ;;  %3272 = vmatprep.subr.bf16.mxu1 %v6139_v18  ;;  %5708 = vmatprep.subr.bf16.mxu0 %v6149_v24 }
 0x6a3   : > { %v5697_v51 = vpop.f32.mrb[90].mxu0 }
 0x6a4   : > { %v2413_v12 = vpack.c.bf16 %v5697_v51, %v5696_v56  ;;  %v2380_v36 = vpop.f32.mrb[91].mxu0 }
 0x6a5   : > { %v2412_v60 = vpack.c.bf16 %v2380_v36, %v2377_v5  ;;  %3273 = vmatpush1.bf16.msra.mxu1 %v6137_v31  ;;  %5709 = vmatpush3.bf16.msra.mxu0 %v6149_v24 }
 0x6a6   : > { %3274 = vmatprep.subr.bf16.mxu1 %v6142_v2  ;;  %5710 = vmatprep.subr.bf16.mxu0 %v6153_v27 }
 0x6a7   : > { %2737 = vmatmul.mubr.bf16.gmra.mrb[104].mxu0 %v2410_v9  ;;  %2846 = vmatmul.mubr.bf16.gmra.mrb[104].mxu1 %v2410_v9 }
 0x6a8   : > { %2746 = vmatprep.mubr.bf16.mxu0 %v7596_v59  ;;  %2853 = vmatprep.mubr.bf16.mxu1 %v7596_v59  ;;  %v6159_v59 = vld [vmem:[#allocation13 + $0xb0] ss:$12 sps:$4 sm:$0xff]  }
 0x6a9   : > { %v5700_v1 = vpop.f32.mrb[92].mxu0  ;;  %3275 = vmatpush1.bf16.msra.mxu1 %v6140_v22  ;;  %5711 = vmatpush3.bf16.msra.mxu0 %v6153_v27 }
 0x6aa   : > { %v2393_v25 = vpop.f32.mrb[93].mxu0  ;;  %3276 = vmatprep.subr.bf16.mxu1 %v6147_v61  ;;  %5712 = vmatprep.subr.bf16.mxu0 %v6154_v35 }
 0x6ab   : > { %v5701_v26 = vpop.f32.mrb[94].mxu0 }
 0x6ac   : > { %v2415_v29 = vpack.c.bf16 %v5701_v26, %v5700_v1  ;;  %v2396_v38 = vpop.f32.mrb[95].mxu0 }
 0x6ad   : > { %v2414_v62 = vpack.c.bf16 %v2396_v38, %v2393_v25  ;;  %3277 = vmatpush1.bf16.msra.mxu1 %v6145_v15  ;;  %5713 = vmatpush3.bf16.msra.mxu0 %v6154_v35 }
 0x6ae   : > { %3278 = vmatprep.subr.bf16.mxu1 %v6152_v23  ;;  %5714 = vmatprep.subr.bf16.mxu0 %v6158_v0 }
 0x6af   : > { %2747 = vmatmul.mubr.bf16.gmra.mrb[108].mxu0 %v2411_v7  ;;  %2854 = vmatmul.mubr.bf16.gmra.mrb[108].mxu1 %v2411_v7 }
 0x6b0   : > { %2756 = vmatprep.mubr.bf16.mxu0 %v7602_v10  ;;  %2861 = vmatprep.mubr.bf16.mxu1 %v7602_v10 }
 0x6b1   : > { %3279 = vmatpush1.bf16.msra.mxu1 %v6150_v39  ;;  %5715 = vmatpush3.bf16.msra.mxu0 %v6158_v0  ;;  %v7808_v0 = vld [vmem:[#allocation17 + $0x8] sm:$0xff] }
 0x6b2   : > { %3280 = vmatprep.subr.bf16.mxu1 %v6157_v40  ;;  %5716 = vmatprep.subr.bf16.mxu0 %v6159_v59 }
 0x6b5   : > { %3281 = vmatpush1.bf16.msra.mxu1 %v6155_v17  ;;  %5717 = vmatpush3.bf16.msra.mxu0 %v6159_v59 }
 0x6b7   : > { %2757 = vmatmul.mubr.bf16.gmra.mrb[112].mxu0 %v2412_v60  ;;  %2862 = vmatmul.mubr.bf16.gmra.mrb[112].mxu1 %v2412_v60 }
 0x6b8   : > { %2766 = vmatprep.mubr.bf16.mxu0 %v7612_v37  ;;  %2869 = vmatprep.mubr.bf16.mxu1 %v7612_v37 }
 0x6bf   : > { %2767 = vmatmul.mubr.bf16.gmra.mrb[116].mxu0 %v2413_v12  ;;  %2870 = vmatmul.mubr.bf16.gmra.mrb[116].mxu1 %v2413_v12 }
 0x6c0   : > { %2776 = vmatprep.mubr.bf16.mxu0 %v7618_v50  ;;  %2877 = vmatprep.mubr.bf16.mxu1 %v7618_v50 }
 0x6c7   : > { %2777 = vmatmul.mubr.bf16.gmra.mrb[120].mxu0 %v2414_v62  ;;  %2878 = vmatmul.mubr.bf16.gmra.mrb[120].mxu1 %v2414_v62 }
 0x6c8   : > { %2786 = vmatprep.mubr.bf16.mxu0 %v7628_v63  ;;  %2885 = vmatprep.mubr.bf16.mxu1 %v7628_v63 }
 0x6cf   : > { %2787 = vmatmul.mubr.bf16.gmra.mrb[124].mxu0 %v2415_v29  ;;  %2886 = vmatmul.mubr.bf16.gmra.mrb[124].mxu1 %v2415_v29 }
 0x6d0   : > { %5718 = vmatprep.mubr.bf16.mxu0 %v7531_v4  ;;  %3298 = vmatprep.mubr.bf16.mxu1 %v6888_v55 }
 0x6d7   : > { %3299 = vmatmul.mubr.bf16.vlgmr.msra.gmra.mrb[128].mxu1 %v7531_v4  ;;  %5719 = vmatmul.mubr.bf16.vlgmr.msra.gmra.mrb[128].mxu0 %v7529_v16 }
 0x6d8   : > { %5722 = vmatprep.mubr.bf16.mxu0 %v7539_v21  ;;  %3308 = vmatprep.mubr.bf16.mxu1 %v6888_v55 }
 0x6df   : > { %3309 = vmatmul.mubr.bf16.gmra.mrb[132].mxu1 %v7529_v16  ;;  %5723 = vmatmul.mubr.bf16.gmra.mrb[132].mxu0 %v7537_v19  ;;  %v7766_v16 = vsub.s32 3, %v7442_v58 }
 0x6e0   : > { %5726 = vmatprep.mubr.bf16.mxu0 %v7547_v34  ;;  %3318 = vmatprep.mubr.bf16.mxu1 %v6888_v55 }
 0x6e1   : > { %v7812_v26 = vrot.slane %v7808_v0, %v7766_v16 }
 0x6e7   : > { %3319 = vmatmul.mubr.bf16.gmra.mrb[136].mxu1 %v7539_v21  ;;  %5727 = vmatmul.mubr.bf16.gmra.mrb[136].mxu0 %v7545_v33  ;;  %v7770_v21 = vld [vmem:[#allocation17 + $0x10] sm:$0xff] }
 0x6e8   : > { %5730 = vmatprep.mubr.bf16.mxu0 %v7555_v48  ;;  %3328 = vmatprep.mubr.bf16.mxu1 %v6888_v55 }
 0x6ef   : > { %3329 = vmatmul.mubr.bf16.gmra.mrb[140].mxu1 %v7537_v19  ;;  %5731 = vmatmul.mubr.bf16.gmra.mrb[140].mxu0 %v7553_v47 }
 0x6f0   : > { %3338 = vmatprep.mubr.bf16.mxu1 %v6888_v55 }
 0x6f7   : > { %3339 = vmatmul.mubr.bf16.gmra.mrb[144].mxu1 %v7547_v34  ;;  %v7774_v34 = vrot.slane %v7770_v21, %v7766_v16 }
 0x6f8   : > { %3348 = vmatprep.mubr.bf16.mxu1 %v6888_v55 }
 0x6ff   : > { %3349 = vmatmul.mubr.bf16.gmra.mrb[148].mxu1 %v7545_v33 }
 0x700   : > { %3358 = vmatprep.mubr.bf16.mxu1 %v6888_v55 }
 0x707   : > { %3359 = vmatmul.mubr.bf16.gmra.mrb[152].mxu1 %v7555_v48 }
 0x708   : > { %3368 = vmatprep.mubr.bf16.mxu1 %v6888_v55 }
 0x70f   : > { %3369 = vmatmul.mubr.bf16.gmra.mrb[156].mxu1 %v7553_v47 }
 0x76a   : > { %v7768_v4 = vpop.f32.mrb[96].mxu0  ;;  %v5398_v19 = vpop.f32.mrb[96].mxu1 }
 0x76b   : > { %v7776_v33 = vpop.f32.mrb[97].mxu0  ;;  %v5399_v10 = vpop.f32.mrb[97].mxu1 }
 0x76c   : > { %v5400_v48 = vadd.f32 %v5399_v10, %v5398_v19  ;;  %v7778_v37 = vpop.f32.mrb[98].mxu0  ;;  %v5401_v55 = vpop.f32.mrb[98].mxu1 }
 0x76d   : > { %v7780_v47 = vpop.f32.mrb[99].mxu0  ;;  %v5402_v50 = vpop.f32.mrb[99].mxu1 }
 0x76e   : > { %v2832_v63 = vadd.f32 %v5400_v48, %v7774_v34  ;;  %v5403_v14 = vadd.f32 %v5402_v50, %v5401_v55  ;;  %v7819_v48 = vld [vmem:[#allocation17] sm:$0xff] }
 0x76f   : > { %v7823_v55 = vrot.slane %v7819_v48, %v7766_v16 }
 0x770   : > { %v5007_v28 = vmul.f32 -1.442695, %v2832_v63  ;;  %v2835_v42 = vadd.f32 %v5403_v14, %v7774_v34  ;;  %v2721_v63 = vadd.f32 %v7776_v33, %v7812_v26 }
 0x772   : > { %6296 = vpow2.f32 %v5007_v28  ;;  %v5008_v44 = vmul.f32 -1.442695, %v2835_v42  ;;  %v7784_v20 = vpop.f32.mrb[100].mxu0  ;;  %v5404_v53 = vpop.f32.mrb[100].mxu1 }
 0x773   : > { %v7786_v57 = vpop.f32.mrb[101].mxu0  ;;  %v5405_v41 = vpop.f32.mrb[101].mxu1 }
 0x774   : > { %6298 = vpow2.f32 %v5008_v44  ;;  %v5406_v49 = vadd.f32 %v5405_v41, %v5404_v53  ;;  %v7788_v32 = vpop.f32.mrb[102].mxu0  ;;  %v5407_v52 = vpop.f32.mrb[102].mxu1  ;;  %v2725_v44 = vadd.f32 %v7780_v47, %v7812_v26 }
 0x775   : > { %v7790_v54 = vpop.f32.mrb[103].mxu0  ;;  %v5408_v11 = vpop.f32.mrb[103].mxu1 }
 0x776   : > { %v2840_v43 = vadd.f32 %v5406_v49, %v7774_v34  ;;  %v5409_v3 = vadd.f32 %v5408_v11, %v5407_v52  ;;  %v2719_v11 = vadd.f32 %v7768_v4, %v7823_v55 }
 0x778   : > { %v5009_v46 = vmul.f32 -1.442695, %v2840_v43  ;;  %v2843_v30 = vadd.f32 %v5409_v3, %v7774_v34 }
 0x77a   : > { %6300 = vpow2.f32 %v5009_v46  ;;  %v5010_v6 = vmul.f32 -1.442695, %v2843_v30  ;;  %v7794_v45 = vpop.f32.mrb[104].mxu0  ;;  %v5410_v7 = vpop.f32.mrb[104].mxu1  ;;  %v2723_v46 = vadd.f32 %v7778_v37, %v7823_v55 }
 0x77b   : > { %v7796_v8 = vpop.f32.mrb[105].mxu0  ;;  %v5411_v9 = vpop.f32.mrb[105].mxu1 }
 0x77c   : > { %v6297_v13 = vpop.eup %6296  ;;  %6302 = vpow2.f32 %v5010_v6  ;;  %v5412_v18 = vadd.f32 %v5411_v9, %v5410_v7  ;;  %v7798_v24 = vpop.f32.mrb[106].mxu0 }
 0x77d   : > { %v5413_v56 = vpop.f32.mrb[106].mxu1  ;;  %v2942_v31 = vadd.f32 1.0, %v6297_v13  ;;  %v7800_v5 = vpop.f32.mrb[107].mxu0 }
 0x77e   : > { %v5414_v2 = vpop.f32.mrb[107].mxu1  ;;  %v6299_v27 = vpop.eup %6298  ;;  %v2848_v51 = vadd.f32 %v5412_v18, %v7774_v34 }
 0x77f   : > { %v5415_v12 = vadd.f32 %v5414_v2, %v5413_v56  ;;  %6304 = vrcp.f32 %v2942_v31  ;;  %v2943_v36 = vadd.f32 1.0, %v6299_v27 }
 0x780   : > { %v5011_v60 = vmul.f32 -1.442695, %v2848_v51  ;;  %v2731_v51 = vadd.f32 %v7786_v57, %v7812_v26 }
 0x781   : > { %v2851_v22 = vadd.f32 %v5415_v12, %v7774_v34  ;;  %6306 = vrcp.f32 %v2943_v36 }
 0x782   : > { %6308 = vpow2.f32 %v5011_v60  ;;  %v7804_v35 = vpop.f32.mrb[108].mxu0  ;;  %v5416_v1 = vpop.f32.mrb[108].mxu1 }
 0x783   : > { %v5012_v61 = vmul.f32 -1.442695, %v2851_v22  ;;  %v7806_v15 = vpop.f32.mrb[109].mxu0  ;;  %v5417_v25 = vpop.f32.mrb[109].mxu1 }
 0x784   : > { %v6301_v23 = vpop.eup %6300  ;;  %v5418_v29 = vadd.f32 %v5417_v25, %v5416_v1  ;;  %v7814_v38 = vpop.f32.mrb[110].mxu0 }
 0x785   : > { %6310 = vpow2.f32 %v5012_v61  ;;  %v5419_v62 = vpop.f32.mrb[110].mxu1  ;;  %v2944_v39 = vadd.f32 1.0, %v6301_v23  ;;  %v7816_v40 = vpop.f32.mrb[111].mxu0  ;;  %v2735_v61 = vadd.f32 %v7790_v54, %v7812_v26 }
 0x786   : > { %v5420_v59 = vpop.f32.mrb[111].mxu1  ;;  %v6303_v17 = vpop.eup %6302  ;;  %v2856_v19 = vadd.f32 %v5418_v29, %v7774_v34 }
 0x787   : > { %v5421_v10 = vadd.f32 %v5420_v59, %v5419_v62  ;;  %6312 = vrcp.f32 %v2944_v39  ;;  %v2945_v50 = vadd.f32 1.0, %v6303_v17  ;;  %v2729_v62 = vadd.f32 %v7784_v20, %v7823_v55 }
 0x788   : > { %v5013_v14 = vmul.f32 -1.442695, %v2856_v19  ;;  %v2733_v17 = vadd.f32 %v7788_v32, %v7823_v55 }
 0x789   : > { %v2859_v28 = vadd.f32 %v5421_v10, %v7774_v34  ;;  %v6305_v42 = vpop.eup %6304  ;;  %6314 = vrcp.f32 %v2945_v50 }
 0x78a   : > { %6316 = vpow2.f32 %v5013_v14  ;;  %v7830_v41 = vpop.f32.mrb[112].mxu0  ;;  %v5422_v49 = vpop.f32.mrb[112].mxu1  ;;  %v2990_v16 = vmul.f32 %v6305_v42, %v2721_v63 }
 0x78b   : > { %v5014_v53 = vmul.f32 -1.442695, %v2859_v28  ;;  %v6307_v52 = vpop.eup %6306  ;;  %v7834_v43 = vpop.f32.mrb[113].mxu0 }
 0x78c   : > { %v5423_v33 = vpop.f32.mrb[113].mxu1  ;;  %v6309_v3 = vpop.eup %6308  ;;  %v2991_v7 = vmul.f32 %v6307_v52, %v2725_v44  ;;  %v7842_v56 = vmul.f32 %v2990_v16, %v2719_v11  ;;  %v2741_v16 = vadd.f32 %v7796_v8, %v7812_v26 }
 0x78d   : > { %6318 = vpow2.f32 %v5014_v53  ;;  %v5424_v30 = vadd.f32 %v5423_v33, %v5422_v49  ;;  %v7838_v47 = vpop.f32.mrb[114].mxu0  ;;  %v5425_v6 = vpop.f32.mrb[114].mxu1  ;;  %v2946_v9 = vadd.f32 1.0, %v6309_v3  ;;  %v2745_v3 = vadd.f32 %v7800_v5, %v7812_v26 }
 0x78e   : > { %v7840_v13 = vpop.f32.mrb[115].mxu0  ;;  %v5426_v18 = vpop.f32.mrb[115].mxu1  ;;  %v7845_v27 = vmul.f32 %v2991_v7, %v2723_v46 }
 0x78f   : > { %v6311_v4 = vpop.eup %6310  ;;  %v2864_v31 = vadd.f32 %v5424_v30, %v7774_v34  ;;  %v5427_v2 = vadd.f32 %v5426_v18, %v5425_v6  ;;  %6320 = vrcp.f32 %v2946_v9  ;;  %v2739_v18 = vadd.f32 %v7794_v45, %v7823_v55 }
 0x790   : > { %v2947_v37 = vadd.f32 1.0, %v6311_v4 }
 0x791   : > { %v5015_v12 = vmul.f32 -1.442695, %v2864_v31  ;;  %v2867_v36 = vadd.f32 %v5427_v2, %v7774_v34  ;;  %v6313_v60 = vpop.eup %6312  ;;  %v2743_v2 = vadd.f32 %v7798_v24, %v7823_v55 }
 0x792   : > { %6322 = vrcp.f32 %v2947_v37  ;;  %v2992_v22 = vmul.f32 %v6313_v60, %v2731_v51  ;;  %v7852_v25 = vpop.f32.mrb[116].mxu0  ;;  %v5428_v23 = vpop.f32.mrb[116].mxu1 }
 0x793   : > { %6324 = vpow2.f32 %v5015_v12  ;;  %v5016_v1 = vmul.f32 -1.442695, %v2867_v36  ;;  %v6315_v29 = vpop.eup %6314  ;;  %v7856_v39 = vpop.f32.mrb[117].mxu0 }
 0x794   : > { %v5429_v57 = vpop.f32.mrb[117].mxu1  ;;  %v6317_v59 = vpop.eup %6316  ;;  %v2993_v19 = vmul.f32 %v6315_v29, %v2735_v61  ;;  %v7864_v42 = vmul.f32 %v2992_v22, %v2729_v62  ;;  %v2751_v62 = vadd.f32 %v7806_v15, %v7812_v26 }
 0x795   : > { %6326 = vpow2.f32 %v5016_v1  ;;  %v5430_v10 = vadd.f32 %v5429_v57, %v5428_v23  ;;  %v7860_v54 = vpop.f32.mrb[118].mxu0  ;;  %v5431_v50 = vpop.f32.mrb[118].mxu1  ;;  %v2948_v63 = vadd.f32 1.0, %v6317_v59 }
 0x796   : > { %v7862_v14 = vpop.f32.mrb[119].mxu0  ;;  %v5432_v28 = vpop.f32.mrb[119].mxu1  ;;  %v7867_v49 = vmul.f32 %v2993_v19, %v2733_v17  ;;  %v2755_v19 = vadd.f32 %v7816_v40, %v7812_v26 }
 0x797   : > { %v6319_v20 = vpop.eup %6318  ;;  %v2872_v44 = vadd.f32 %v5430_v10, %v7774_v34  ;;  %v5433_v53 = vadd.f32 %v5432_v28, %v5431_v50  ;;  %6328 = vrcp.f32 %v2948_v63 }
 0x798   : > { %v2949_v32 = vadd.f32 1.0, %v6319_v20 }
 0x799   : > { %v5017_v52 = vmul.f32 -1.442695, %v2872_v44  ;;  %v2875_v11 = vadd.f32 %v5433_v53, %v7774_v34  ;;  %v6321_v33 = vpop.eup %6320  ;;  %v2749_v44 = vadd.f32 %v7804_v35, %v7823_v55 }
 0x79a   : > { %6330 = vrcp.f32 %v2949_v32  ;;  %v7874_v30 = vpop.f32.mrb[120].mxu0  ;;  %v5434_v6 = vpop.f32.mrb[120].mxu1  ;;  %v2994_v7 = vmul.f32 %v6321_v33, %v2741_v16  ;;  %v3128_v32 = vsub.s32 4, %v7442_v58 }
 0x79b   : > { %6332 = vpow2.f32 %v5017_v52  ;;  %v5018_v46 = vmul.f32 -1.442695, %v2875_v11  ;;  %v7878_v4 = vpop.f32.mrb[121].mxu0  ;;  %v5435_v8 = vpop.f32.mrb[121].mxu1  ;;  %v2753_v52 = vadd.f32 %v7814_v38, %v7823_v55 }
 0x79c   : > { %v6323_v9 = vpop.eup %6322  ;;  %v5436_v37 = vadd.f32 %v5435_v8, %v5434_v6  ;;  %v7882_v5 = vpop.f32.mrb[122].mxu0  ;;  %v7886_v61 = vmul.f32 %v2994_v7, %v2739_v18 }
 0x79d   : > { %v6325_v31 = vpop.eup %6324  ;;  %6334 = vpow2.f32 %v5018_v46  ;;  %v5437_v51 = vpop.f32.mrb[122].mxu1  ;;  %v2995_v12 = vmul.f32 %v6323_v9, %v2745_v3 }
 0x79e   : > { %v2950_v36 = vadd.f32 1.0, %v6325_v31  ;;  %v7884_v60 = vpop.f32.mrb[123].mxu0  ;;  %v5438_v22 = vpop.f32.mrb[123].mxu1  ;;  %v2880_v1 = vadd.f32 %v5436_v37, %v7774_v34  ;;  %v7918_v37 = vrot.slane %v7770_v21, %v3128_v32 }
 0x79f   : > { %v6327_v45 = vpop.eup %6326  ;;  %v5439_v23 = vadd.f32 %v5438_v22, %v5437_v51  ;;  %v7889_v29 = vmul.f32 %v2995_v12, %v2743_v2  ;;  %v7915_v2 = vrot.slane %v7819_v48, %v3128_v32  ;;  %v2761_v51 = vadd.f32 %v7834_v43, %v7812_v26 }
 0x7a0   : > { %6336 = vrcp.f32 %v2950_v36  ;;  %v2951_v24 = vadd.f32 1.0, %v6327_v45  ;;  %v5019_v57 = vmul.f32 -1.442695, %v2880_v1  ;;  %v7924_v22 = vrot.slane %v7808_v0, %v3128_v32 }
 0x7a1   : > { %v2883_v59 = vadd.f32 %v5439_v23, %v7774_v34  ;;  %v6329_v17 = vpop.eup %6328  ;;  %v2765_v1 = vadd.f32 %v7840_v13, %v7812_v26  ;;  %v2759_v43 = vadd.f32 %v7830_v41, %v7823_v55 }
 0x7a2   : > { %6338 = vrcp.f32 %v2951_v24  ;;  %v7896_v50 = vpop.f32.mrb[124].mxu0  ;;  %v5440_v63 = vpop.f32.mrb[124].mxu1  ;;  %v2996_v28 = vmul.f32 %v6329_v17, %v2751_v62 }
 0x7a3   : > { %6340 = vpow2.f32 %v5019_v57  ;;  %v5020_v10 = vmul.f32 -1.442695, %v2883_v59  ;;  %v7900_v53 = vpop.f32.mrb[125].mxu0  ;;  %v5441_v15 = vpop.f32.mrb[125].mxu1 }
 0x7a4   : > { %v6331_v20 = vpop.eup %6330  ;;  %v5442_v40 = vadd.f32 %v5441_v15, %v5440_v63  ;;  %v7905_v11 = vpop.f32.mrb[126].mxu0  ;;  %v7909_v35 = vmul.f32 %v2996_v28, %v2749_v44 }
 0x7a5   : > { %v6333_v16 = vpop.eup %6332  ;;  %6342 = vpow2.f32 %v5020_v10  ;;  %v5443_v33 = vpop.f32.mrb[126].mxu1  ;;  %v2997_v3 = vmul.f32 %v6331_v20, %v2755_v19 }
 0x7a6   : > { %v2952_v46 = vadd.f32 1.0, %v6333_v16  ;;  %v7907_v6 = vpop.f32.mrb[127].mxu0  ;;  %v5444_v7 = vpop.f32.mrb[127].mxu1  ;;  %v2888_v18 = vadd.f32 %v5442_v40, %v7774_v34 }
 0x7a7   : > { %v6335_v9 = vpop.eup %6334  ;;  %v5445_v8 = vadd.f32 %v5444_v7, %v5443_v33  ;;  %v7912_v31 = vmul.f32 %v2997_v3, %v2753_v52 }
 0x7a8   : > { %6344 = vrcp.f32 %v2952_v46  ;;  %v2953_v38 = vadd.f32 1.0, %v6335_v9  ;;  %v5021_v12 = vmul.f32 -1.442695, %v2888_v18  ;;  %v2771_v18 = vadd.f32 %v7856_v39, %v7812_v26 }
 0x7a9   : > { %v2891_v36 = vadd.f32 %v5445_v8, %v7774_v34  ;;  %v2763_v34 = vadd.f32 %v7838_v47, %v7823_v55 }
 0x7aa   : > { %v6337_v45 = vpop.eup %6336  ;;  %6346 = vrcp.f32 %v2953_v38  ;;  %v3300_v23 = vpop.f32.mrb[128].mxu1 }
 0x7ab   : > { %6348 = vpow2.f32 %v5021_v12  ;;  %v5022_v48 = vmul.f32 -1.442695, %v2891_v36  ;;  %v5720_v24 = vpop.f32.mrb[128].mxu0  ;;  %v2998_v21 = vmul.f32 %v6337_v45, %v2761_v51  ;;  %v3301_v0 = vadd.f32 %v3300_v23, %v7915_v2  ;;  %v3302_v57 = vpop.f32.mrb[129].mxu1 }
 0x7ac   : > { %v6339_v62 = vpop.eup %6338  ;;  %v3413_v59 = vpop.f32.mrb[129].mxu0  ;;  %v3422_v13 = vadd.f32 %v5720_v24, %v7918_v37  ;;  %v3303_v19 = vadd.f32 %v3302_v57, %v7924_v22  ;;  %v2769_v12 = vadd.f32 %v7852_v25, %v7823_v55  ;;  %v2775_v36 = vadd.f32 %v7862_v14, %v7812_v26 }
 0x7ad   : > { %v6341_v17 = vpop.eup %6340  ;;  %6350 = vpow2.f32 %v5022_v48  ;;  %v3304_v10 = vpop.f32.mrb[130].mxu1  ;;  %v2999_v28 = vmul.f32 %v6339_v62, %v2765_v1  ;;  %v7937_v32 = vmul.f32 %v2998_v21, %v2759_v43  ;;  %v3414_v52 = vadd.f32 %v3413_v59, %v7918_v37 }
 0x7ae   : > { %v5721_v63 = vpop.f32.mrb[130].mxu0  ;;  %v2954_v20 = vadd.f32 1.0, %v6341_v17  ;;  %v3305_v44 = vadd.f32 %v3304_v10, %v7915_v2  ;;  %v3306_v15 = vpop.f32.mrb[131].mxu1  ;;  %v2773_v43 = vadd.f32 %v7860_v54, %v7823_v55 }
 0x7af   : > { %v3425_v41 = vadd.f32 %v5721_v63, %v7918_v37  ;;  %v3416_v47 = vpop.f32.mrb[131].mxu0  ;;  %v6343_v16 = vpop.eup %6342  ;;  %v3307_v40 = vadd.f32 %v3306_v15, %v7924_v22  ;;  %v7942_v3 = vmul.f32 %v2999_v28, %v2763_v34 }
 0x7b0   : > { %v3417_v33 = vadd.f32 %v3416_v47, %v7918_v37  ;;  %6352 = vrcp.f32 %v2954_v20  ;;  %v2955_v46 = vadd.f32 1.0, %v6343_v16  ;;  %v7944_v7 = vpack.c.bf16 %v3305_v44, %v3301_v0 }
 0x7b1   : > { %v3493_v9 = vpack.c.bf16 %v3425_v41, %v3422_v13  ;;  %v3484_v8 = vpack.c.bf16 %v3307_v40, %v3303_v19 }
 0x7b2   : > { %v3492_v38 = vpack.c.bf16 %v3417_v33, %v3414_v52  ;;  %v6345_v51 = vpop.eup %6344  ;;  %6354 = vrcp.f32 %v2955_v46  ;;  %5750 = vmatprep.mubr.bf16.mxu1 %v7944_v7  ;;  %v3310_v45 = vpop.f32.mrb[132].mxu1  ;;  %v2781_v52 = vadd.f32 %v7878_v4, %v7812_v26 }
 0x7b3   : > { %v5724_v1 = vpop.f32.mrb[132].mxu0  ;;  %5734 = vmatprep.subr.bf16.mxu1 %v3484_v8  ;;  %v3000_v48 = vmul.f32 %v6345_v51, %v2771_v18  ;;  %v3311_v39 = vadd.f32 %v3310_v45, %v7915_v2  ;;  %v3312_v24 = vpop.f32.mrb[133].mxu1  ;;  %v2779_v18 = vadd.f32 %v7874_v30, %v7823_v55 }
 0x7b4   : > { %5766 = vmatprep.subr.bf16.mxu0 %v3492_v38  ;;  %v6347_v23 = vpop.eup %6346  ;;  %v3429_v21 = vpop.f32.mrb[133].mxu0  ;;  %5735 = vmatpush3.bf16.xpose.msra.mxu1 %v3484_v8  ;;  %v3438_v25 = vadd.f32 %v5724_v1, %v7918_v37  ;;  %v3313_v17 = vadd.f32 %v3312_v24, %v7924_v22  ;;  %v2785_v8 = vadd.f32 %v7884_v60, %v7812_v26 }
 0x7b5   : > { %5767 = vmatpush3.bf16.msra.mxu0 %v3492_v38  ;;  %v6349_v62 = vpop.eup %6348  ;;  %v3314_v34 = vpop.f32.mrb[134].mxu1  ;;  %v3001_v0 = vmul.f32 %v6347_v23, %v2775_v36  ;;  %v7957_v57 = vmul.f32 %v3000_v48, %v2769_v12  ;;  %v3430_v54 = vadd.f32 %v3429_v21, %v7918_v37  ;;  %v2783_v1 = vadd.f32 %v7882_v5, %v7823_v55 }
 0x7b6   : > { %v5725_v14 = vpop.f32.mrb[134].mxu0  ;;  %5768 = vmatprep.subr.bf16.mxu0 %v3493_v9  ;;  %v2956_v59 = vadd.f32 1.0, %v6349_v62  ;;  %v3315_v13 = vadd.f32 %v3314_v34, %v7915_v2  ;;  %v3316_v10 = vpop.f32.mrb[135].mxu1 }
 0x7b7   : > { %v3441_v19 = vadd.f32 %v5725_v14, %v7918_v37  ;;  %v3432_v63 = vpop.f32.mrb[135].mxu0  ;;  %v6351_v28 = vpop.eup %6350  ;;  %v3317_v20 = vadd.f32 %v3316_v10, %v7924_v22  ;;  %v7965_v41 = vmul.f32 %v3001_v0, %v2773_v43 }
 0x7b8   : > { %v3433_v44 = vadd.f32 %v3432_v63, %v7918_v37  ;;  %6356 = vrcp.f32 %v2956_v59  ;;  %v2957_v15 = vadd.f32 1.0, %v6351_v28  ;;  %v7967_v47 = vpack.c.bf16 %v3315_v13, %v3311_v39 }
 0x7b9   : > { %v3495_v16 = vpack.c.bf16 %v3441_v19, %v3438_v25  ;;  %5769 = vmatpush3.bf16.msra.mxu0 %v3493_v9  ;;  %v3485_v40 = vpack.c.bf16 %v3317_v20, %v3313_v17  ;;  %v2791_v13 = vadd.f32 %v7900_v53, %v7812_v26  ;;  %v2789_v28 = vadd.f32 %v7896_v50, %v7823_v55 }
 0x7ba   : > { %v3494_v33 = vpack.c.bf16 %v3433_v44, %v3430_v54  ;;  %v6353_v46 = vpop.eup %6352  ;;  %6358 = vrcp.f32 %v2957_v15  ;;  %v3320_v38 = vpop.f32.mrb[136].mxu1  ;;  %v2795_v54 = vadd.f32 %v7907_v6, %v7812_v26  ;;  %v2793_v53 = vadd.f32 %v7905_v11, %v7823_v55 }
 0x7bb   : > { %v5728_v51 = vpop.f32.mrb[136].mxu0  ;;  %5736 = vmatprep.subr.bf16.mxu1 %v3485_v40  ;;  %v3002_v12 = vmul.f32 %v6353_v46, %v2781_v52  ;;  %v3321_v9 = vadd.f32 %v3320_v38, %v7915_v2  ;;  %v3322_v45 = vpop.f32.mrb[137].mxu1 }
 0x7bc   : > { %5770 = vmatprep.subr.bf16.mxu0 %v3494_v33  ;;  %v6355_v36 = vpop.eup %6354  ;;  %v3445_v4 = vpop.f32.mrb[137].mxu0  ;;  %5737 = vmatpush3.bf16.xpose.msra.mxu1 %v3485_v40  ;;  %v3454_v39 = vadd.f32 %v5728_v51, %v7918_v37  ;;  %v3323_v24 = vadd.f32 %v3322_v45, %v7924_v22 }
 0x7bd   : > { %5771 = vmatpush3.bf16.msra.mxu0 %v3494_v33  ;;  %v3324_v48 = vpop.f32.mrb[138].mxu1  ;;  %v5729_v30 = vpop.f32.mrb[138].mxu0  ;;  %v3003_v23 = vmul.f32 %v6355_v36, %v2785_v8  ;;  %v7978_v60 = vmul.f32 %v3002_v12, %v2779_v18  ;;  %v3446_v34 = vadd.f32 %v3445_v4, %v7918_v37 }
 0x7be   : > { %5772 = vmatprep.subr.bf16.mxu0 %v3495_v16  ;;  %v3325_v21 = vadd.f32 %v3324_v48, %v7915_v2  ;;  %v3457_v62 = vadd.f32 %v5729_v30, %v7918_v37  ;;  %v3326_v43 = vpop.f32.mrb[139].mxu1  ;;  %v3448_v25 = vpop.f32.mrb[139].mxu0 }
 0x7bf   : > { %v3327_v5 = vadd.f32 %v3326_v43, %v7924_v22  ;;  %v3449_v14 = vadd.f32 %v3448_v25, %v7918_v37  ;;  %v7987_v0 = vmul.f32 %v3003_v23, %v2783_v1 }
 0x7c0   : > { %v7989_v59 = vpack.c.bf16 %v3325_v21, %v3321_v9  ;;  %v3497_v17 = vpack.c.bf16 %v3457_v62, %v3454_v39 }
 0x7c1   : > { %5773 = vmatpush3.bf16.msra.mxu0 %v3495_v16  ;;  %v3486_v19 = vpack.c.bf16 %v3327_v5, %v3323_v24  ;;  %v3496_v10 = vpack.c.bf16 %v3449_v14, %v3446_v34 }
 0x7c2   : > { %v6357_v63 = vpop.eup %6356  ;;  %v3330_v20 = vpop.f32.mrb[140].mxu1 }
 0x7c3   : > { %v5732_v44 = vpop.f32.mrb[140].mxu0  ;;  %5738 = vmatprep.subr.bf16.mxu1 %v3486_v19  ;;  %5774 = vmatprep.subr.bf16.mxu0 %v3496_v10  ;;  %v3004_v15 = vmul.f32 %v6357_v63, %v2791_v13  ;;  %v3331_v16 = vadd.f32 %v3330_v20, %v7915_v2  ;;  %v3332_v40 = vpop.f32.mrb[141].mxu1 }
 0x7c4   : > { %v6359_v52 = vpop.eup %6358  ;;  %v3461_v33 = vpop.f32.mrb[141].mxu0  ;;  %5739 = vmatpush3.bf16.xpose.msra.mxu1 %v3486_v19  ;;  %v3470_v6 = vadd.f32 %v5732_v44, %v7918_v37  ;;  %v3333_v8 = vadd.f32 %v3332_v40, %v7924_v22 }
 0x7c5   : > { %5775 = vmatpush3.bf16.msra.mxu0 %v3496_v10  ;;  %v3334_v46 = vpop.f32.mrb[142].mxu1  ;;  %v5733_v50 = vpop.f32.mrb[142].mxu0  ;;  %v3005_v18 = vmul.f32 %v6359_v52, %v2795_v54  ;;  %v8000_v26 = vmul.f32 %v3004_v15, %v2789_v28  ;;  %v3462_v9 = vadd.f32 %v3461_v33, %v7918_v37 }
 0x7c6   : > { %5776 = vmatprep.subr.bf16.mxu0 %v3497_v17  ;;  %v3335_v38 = vadd.f32 %v3334_v46, %v7915_v2  ;;  %v3473_v51 = vadd.f32 %v5733_v50, %v7918_v37  ;;  %v3336_v12 = vpop.f32.mrb[143].mxu1  ;;  %v3464_v36 = vpop.f32.mrb[143].mxu0 }
 0x7c7   : > { %v3337_v55 = vadd.f32 %v3336_v12, %v7924_v22  ;;  %v3465_v11 = vadd.f32 %v3464_v36, %v7918_v37  ;;  %v8009_v45 = vmul.f32 %v3005_v18, %v2793_v53 }
 0x7c8   : > { %v8011_v4 = vpack.c.bf16 %v3335_v38, %v3331_v16  ;;  %v3499_v1 = vpack.c.bf16 %v3473_v51, %v3470_v6 }
 0x7c9   : > { %5777 = vmatpush3.bf16.msra.mxu0 %v3497_v17  ;;  %v3487_v48 = vpack.c.bf16 %v3337_v55, %v3333_v8  ;;  %v3498_v30 = vpack.c.bf16 %v3465_v11, %v3462_v9 }
 0x7ca   : > { %v3340_v23 = vpop.f32.mrb[144].mxu1 }
 0x7cb   : > { %5740 = vmatprep.subr.bf16.mxu1 %v3487_v48  ;;  %5778 = vmatprep.subr.bf16.mxu0 %v3498_v30  ;;  %v3341_v39 = vadd.f32 %v3340_v23, %v7915_v2  ;;  %v3342_v24 = vpop.f32.mrb[145].mxu1 }
 0x7cc   : > { %5741 = vmatpush3.bf16.xpose.msra.mxu1 %v3487_v48  ;;  %v3344_v21 = vpop.f32.mrb[146].mxu1  ;;  %v3343_v43 = vadd.f32 %v3342_v24, %v7924_v22 }
 0x7cd   : > { %5779 = vmatpush3.bf16.msra.mxu0 %v3498_v30  ;;  %v3345_v37 = vadd.f32 %v3344_v21, %v7915_v2  ;;  %v3346_v62 = vpop.f32.mrb[147].mxu1 }
 0x7ce   : > { %5780 = vmatprep.subr.bf16.mxu0 %v3499_v1  ;;  %v3347_v25 = vadd.f32 %v3346_v62, %v7924_v22 }
 0x7cf   : > { %v8017_v34 = vpack.c.bf16 %v3345_v37, %v3341_v39 }
 0x7d0   : > { %v3488_v5 = vpack.c.bf16 %v3347_v25, %v3343_v43 }
 0x7d1   : > { %5781 = vmatpush3.bf16.msra.mxu0 %v3499_v1 }
 0x7d2   : > { %v3350_v14 = vpop.f32.mrb[148].mxu1  ;;  %5742 = vmatprep.subr.bf16.mxu1 %v3488_v5 }
 0x7d3   : > { %v3351_v17 = vadd.f32 %v3350_v14, %v7915_v2  ;;  %v3352_v13 = vpop.f32.mrb[149].mxu1 }
 0x7d4   : > { %5743 = vmatpush3.bf16.xpose.msra.mxu1 %v3488_v5  ;;  %v3354_v19 = vpop.f32.mrb[150].mxu1  ;;  %v3353_v28 = vadd.f32 %v3352_v13, %v7924_v22 }
 0x7d5   : > { %v3355_v10 = vadd.f32 %v3354_v19, %v7915_v2  ;;  %v3356_v63 = vpop.f32.mrb[151].mxu1 }
 0x7d6   : > { %v3357_v54 = vadd.f32 %v3356_v63, %v7924_v22 }
 0x7d7   : > { %v8023_v20 = vpack.c.bf16 %v3355_v10, %v3351_v17 }
 0x7d8   : > { %v3489_v44 = vpack.c.bf16 %v3357_v54, %v3353_v28 }
 0x7da   : > { %v3360_v15 = vpop.f32.mrb[152].mxu1  ;;  %5744 = vmatprep.subr.bf16.mxu1 %v3489_v44 }
 0x7db   : > { %v3361_v52 = vadd.f32 %v3360_v15, %v7915_v2  ;;  %v3362_v16 = vpop.f32.mrb[153].mxu1 }
 0x7dc   : > { %5745 = vmatpush3.bf16.xpose.msra.mxu1 %v3489_v44  ;;  %v3364_v40 = vpop.f32.mrb[154].mxu1  ;;  %v3363_v46 = vadd.f32 %v3362_v16, %v7924_v22 }
 0x7dd   : > { %v3365_v33 = vadd.f32 %v3364_v40, %v7915_v2  ;;  %v3366_v53 = vpop.f32.mrb[155].mxu1 }
 0x7de   : > { %v3367_v50 = vadd.f32 %v3366_v53, %v7924_v22 }
 0x7df   : > { %v8029_v18 = vpack.c.bf16 %v3365_v33, %v3361_v52 }
 0x7e0   : > { %v3490_v6 = vpack.c.bf16 %v3367_v50, %v3363_v46 }
 0x7e2   : > { %v3370_v8 = vpop.f32.mrb[156].mxu1  ;;  %5746 = vmatprep.subr.bf16.mxu1 %v3490_v6 }
 0x7e3   : > { %v3371_v38 = vadd.f32 %v3370_v8, %v7915_v2  ;;  %v3372_v51 = vpop.f32.mrb[157].mxu1 }
 0x7e4   : > { %5747 = vmatpush3.bf16.xpose.msra.mxu1 %v3490_v6  ;;  %v3374_v12 = vpop.f32.mrb[158].mxu1  ;;  %v3373_v55 = vadd.f32 %v3372_v51, %v7924_v22 }
 0x7e5   : > { %v3375_v36 = vadd.f32 %v3374_v12, %v7915_v2  ;;  %v3376_v9 = vpop.f32.mrb[159].mxu1 }
 0x7e6   : > { %v3377_v11 = vadd.f32 %v3376_v9, %v7924_v22 }
 0x7e7   : > { %v8035_v1 = vpack.c.bf16 %v3375_v36, %v3371_v38 }
 0x7e8   : > { %v3491_v48 = vpack.c.bf16 %v3377_v11, %v3373_v55 }
 0x7ea   : > { %5748 = vmatprep.subr.bf16.mxu1 %v3491_v48 }
 0x7ec   : > { %5749 = vmatpush3.bf16.xpose.msra.mxu1 %v3491_v48 }
 0x7f3   : > { %5751 = vmatmul.mubr.bf16.vlgmr.msra.gmra.mrb[160].mxu1 %v7967_v47 }
 0x7f4   : > { %5754 = vmatprep.mubr.bf16.mxu1 %v7989_v59 }
 0x7fb   : > { %5755 = vmatmul.mubr.bf16.gmra.mrb[164].mxu1 %v8011_v4 }
 0x7fc   : > { %5758 = vmatprep.mubr.bf16.mxu1 %v8017_v34 }
 0x803   : > { %5759 = vmatmul.mubr.bf16.gmra.mrb[168].mxu1 %v8023_v20 }
 0x804   : > { %5762 = vmatprep.mubr.bf16.mxu1 %v8029_v18 }
 0x80b   : > { %5763 = vmatmul.mubr.bf16.gmra.mrb[172].mxu1 %v8035_v1 }
 0x80c   : > { %4267 = vmatprep.mubr.bf16.mxu1 %v7944_v7 }
 0x8c6   : > { %v5752_v2 = vpop.f32.mrb[160].mxu1 }
 0x8c7   : > { %v3534_v22 = vpop.f32.mrb[161].mxu1 }
 0x8c8   : > { %3597 = vmax.xlane.f32.xlu0 %v3534_v22  ;;  %v5753_v30 = vpop.f32.mrb[162].mxu1 }
 0x8c9   : > { %v3537_v23 = vpop.f32.mrb[163].mxu1 }
 0x8ca   : > { %3599 = vmax.xlane.f32.xlu1 %v3537_v23 }
 0x8cc   : > { %3601 = vmax.xlane.f32.xlu0 %v5752_v2 }
 0x8ce   : > { %3603 = vmax.xlane.f32.xlu1 %v5753_v30  ;;  %v5756_v39 = vpop.f32.mrb[164].mxu1 }
 0x8cf   : > { %v3550_v24 = vpop.f32.mrb[165].mxu1 }
 0x8d0   : > { %3605 = vmax.xlane.f32.xlu0 %v3550_v24  ;;  %v5757_v21 = vpop.f32.mrb[166].mxu1 }
 0x8d1   : > { %v3553_v37 = vpop.f32.mrb[167].mxu1 }
 0x8d2   : > { %3607 = vmax.xlane.f32.xlu1 %v3553_v37 }
 0x8d4   : > { %3609 = vmax.xlane.f32.xlu0 %v5756_v39 }
 0x8d6   : > { %3611 = vmax.xlane.f32.xlu1 %v5757_v21  ;;  %v8045_v62 = vpop.f32.mrb[168].mxu1 }
 0x8d7   : > { %v3566_v43 = vpop.f32.mrb[169].mxu1 }
 0x8d8   : > { %3613 = vmax.xlane.f32.xlu0 %v3566_v43  ;;  %v8047_v25 = vpop.f32.mrb[170].mxu1 }
 0x8d9   : > { %v3569_v5 = vpop.f32.mrb[171].mxu1 }
 0x8da   : > { %3615 = vmax.xlane.f32.xlu1 %v3569_v5 }
 0x8dc   : > { %3617 = vmax.xlane.f32.xlu0 %v8045_v62 }
 0x8de   : > { %3619 = vmax.xlane.f32.xlu1 %v8047_v25  ;;  %v8051_v14 = vpop.f32.mrb[172].mxu1 }
 0x8df   : > { %v8053_v17 = vpop.f32.mrb[173].mxu1 }
 0x8e0   : > { %3621 = vmax.xlane.f32.xlu0 %v8053_v17  ;;  %v8056_v13 = vpop.f32.mrb[174].mxu1 }
 0x8e1   : > { %v8058_v19 = vpop.f32.mrb[175].mxu1 }
 0x8e2   : > { %3623 = vmax.xlane.f32.xlu1 %v8058_v19 }
 0x8e4   : > { %3625 = vmax.xlane.f32.xlu0 %v8051_v14 }
 0x8e6   : > { %3627 = vmax.xlane.f32.xlu1 %v8056_v13 }
 0x955   : > { %v3598_v10 = vpop.xlane.xlu0 %3597 }
 0x956   : > { %v3629_v63 = vsub.f32 %v3534_v22, %v3598_v10 }
 0x957   : > { %v3600_v28 = vpop.xlane.xlu1 %3599 }
 0x958   : > { %v3645_v54 = vmul.f32 1.442695, %v3629_v63  ;;  %v3630_v44 = vsub.f32 %v3537_v23, %v3600_v28 }
 0x959   : > { %v3602_v15 = vpop.xlane.xlu0 %3601 }
 0x95a   : > { %6360 = vpow2.f32 %v3645_v54  ;;  %v3647_v52 = vmul.f32 1.442695, %v3630_v44  ;;  %v3631_v16 = vsub.f32 %v5752_v2, %v3602_v15 }
 0x95b   : > { %v3604_v40 = vpop.xlane.xlu1 %3603 }
 0x95c   : > { %6362 = vpow2.f32 %v3647_v52  ;;  %v3649_v33 = vmul.f32 1.442695, %v3631_v16  ;;  %v3632_v53 = vsub.f32 %v5753_v30, %v3604_v40 }
 0x95d   : > { %v3606_v46 = vpop.xlane.xlu0 %3605 }
 0x95e   : > { %6364 = vpow2.f32 %v3649_v33  ;;  %v3651_v50 = vmul.f32 1.442695, %v3632_v53  ;;  %v3633_v6 = vsub.f32 %v3550_v24, %v3606_v46 }
 0x95f   : > { %v3608_v8 = vpop.xlane.xlu1 %3607 }
 0x960   : > { %6366 = vpow2.f32 %v3651_v50  ;;  %v3653_v38 = vmul.f32 1.442695, %v3633_v6  ;;  %v3634_v51 = vsub.f32 %v3553_v37, %v3608_v8 }
 0x961   : > { %v3610_v12 = vpop.xlane.xlu0 %3609 }
 0x962   : > { %6368 = vpow2.f32 %v3653_v38  ;;  %v3655_v36 = vmul.f32 1.442695, %v3634_v51  ;;  %v3635_v9 = vsub.f32 %v5756_v39, %v3610_v12 }
 0x963   : > { %v3612_v55 = vpop.xlane.xlu1 %3611 }
 0x964   : > { %v8063_v11 = vpop.eup %6360  ;;  %6370 = vpow2.f32 %v3655_v36  ;;  %v3657_v48 = vmul.f32 1.442695, %v3635_v9  ;;  %v3636_v2 = vsub.f32 %v5757_v21, %v3612_v55 }
 0x965   : > { %v3614_v22 = vpop.xlane.xlu0 %3613  ;;  %3677 = vadd.xlane.f32.xlu0 %v8063_v11 }
 0x966   : > { %v8066_v30 = vpop.eup %6362  ;;  %6372 = vpow2.f32 %v3657_v48  ;;  %v3659_v23 = vmul.f32 1.442695, %v3636_v2  ;;  %v3637_v24 = vsub.f32 %v3566_v43, %v3614_v22 }
 0x967   : > { %v3616_v10 = vpop.xlane.xlu1 %3615  ;;  %3679 = vadd.xlane.f32.xlu1 %v8066_v30 }
 0x968   : > { %v8069_v37 = vpop.eup %6364  ;;  %6374 = vpow2.f32 %v3659_v23  ;;  %v3661_v39 = vmul.f32 1.442695, %v3637_v24  ;;  %v3638_v63 = vsub.f32 %v3569_v5, %v3616_v10  ;;  %v6162_v24 = vld [vmem:[#allocation14 + $0x4] ss:$12 sps:$4 sm:$0xff]   ;;  %v6187_v10 = vld [vmem:[#allocation14 + $0xc8] ss:$12 sps:$4 sm:$0xff]  }
 0x969   : > { %v3618_v28 = vpop.xlane.xlu0 %3617  ;;  %3681 = vadd.xlane.f32.xlu0 %v8069_v37  ;;  %4122 = vmatprep.subr.bf16.mxu0 %v6162_v24 }
 0x96a   : > { %v8072_v21 = vpop.eup %6366  ;;  %6376 = vpow2.f32 %v3661_v39  ;;  %v3663_v54 = vmul.f32 1.442695, %v3638_v63  ;;  %v3639_v44 = vsub.f32 %v8045_v62, %v3618_v28  ;;  %5494 = vmatprep.subr.bf16.mxu1 %v6187_v10  ;;  %v6188_v39 = vld [vmem:[#allocation14 + $0x8] ss:$12 sps:$4 sm:$0xff]   ;;  %v6192_v63 = vld [vmem:[#allocation14 + $0xe0] ss:$12 sps:$4 sm:$0xff]  }
 0x96b   : > { %v3620_v15 = vpop.xlane.xlu1 %3619  ;;  %3683 = vadd.xlane.f32.xlu1 %v8072_v21  ;;  %5495 = vmatpush3.bf16.msra.mxu1 %v6188_v39  ;;  %v6193_v28 = vld [vmem:[#allocation14 + $0x20] ss:$12 sps:$4 sm:$0xff]  }
 0x96c   : > { %v8076_v43 = vpop.eup %6368  ;;  %6378 = vpow2.f32 %v3663_v54  ;;  %v3665_v52 = vmul.f32 1.442695, %v3639_v44  ;;  %v3640_v16 = vsub.f32 %v8047_v25, %v3620_v15  ;;  %5496 = vmatprep.subr.bf16.mxu1 %v6192_v63  ;;  %v6197_v54 = vld [vmem:[#allocation14 + $0xf8] ss:$12 sps:$4 sm:$0xff]   ;;  %v6202_v15 = vld [vmem:[#allocation14 + $0x110] ss:$12 sps:$4 sm:$0xff]  }
 0x96d   : > { %3685 = vadd.xlane.f32.xlu0 %v8076_v43  ;;  %v3622_v5 = vpop.xlane.xlu0 %3621  ;;  %v6198_v44 = vld [vmem:[#allocation14 + $0x38] ss:$12 sps:$4 sm:$0xff]  }
 0x96e   : > { %v8080_v40 = vpop.eup %6370  ;;  %6380 = vpow2.f32 %v3665_v52  ;;  %v3667_v33 = vmul.f32 1.442695, %v3640_v16  ;;  %v3641_v53 = vsub.f32 %v8053_v17, %v3622_v5  ;;  %v6203_v52 = vld [vmem:[#allocation14 + $0x50] ss:$12 sps:$4 sm:$0xff]   ;;  %v6207_v16 = vld [vmem:[#allocation14 + $0x128] ss:$12 sps:$4 sm:$0xff]  }
 0x96f   : > { %3687 = vadd.xlane.f32.xlu1 %v8080_v40  ;;  %v3624_v62 = vpop.xlane.xlu1 %3623  ;;  %5497 = vmatpush3.bf16.msra.mxu1 %v6193_v28  ;;  %v6208_v5 = vld [vmem:[#allocation14 + $0x68] ss:$12 sps:$4 sm:$0xff]  }
 0x970   : > { %v8084_v46 = vpop.eup %6372  ;;  %6382 = vpow2.f32 %v3667_v33  ;;  %v3669_v50 = vmul.f32 1.442695, %v3641_v53  ;;  %v3642_v6 = vsub.f32 %v8058_v19, %v3624_v62  ;;  %5498 = vmatprep.subr.bf16.mxu1 %v6197_v54  ;;  %v6212_v33 = vld [vmem:[#allocation14 + $0x140] ss:$12 sps:$4 sm:$0xff]   ;;  %v6217_v62 = vld [vmem:[#allocation14 + $0x158] ss:$12 sps:$4 sm:$0xff]  }
 0x971   : > { %3689 = vadd.xlane.f32.xlu0 %v8084_v46  ;;  %v3626_v25 = vpop.xlane.xlu0 %3625  ;;  %v6213_v53 = vld [vmem:[#allocation14 + $0x80] ss:$12 sps:$4 sm:$0xff]  }
 0x972   : > { %v8088_v8 = vpop.eup %6374  ;;  %6384 = vpow2.f32 %v3669_v50  ;;  %v3671_v38 = vmul.f32 1.442695, %v3642_v6  ;;  %v3643_v51 = vsub.f32 %v8051_v14, %v3626_v25  ;;  %v6218_v50 = vld [vmem:[#allocation14 + $0x98] ss:$12 sps:$4 sm:$0xff]  }
 0x973   : > { %3691 = vadd.xlane.f32.xlu1 %v8088_v8  ;;  %v3628_v17 = vpop.xlane.xlu1 %3627  ;;  %5499 = vmatpush3.bf16.msra.mxu1 %v6198_v44 }
 0x974   : > { %v8092_v12 = vpop.eup %6376  ;;  %6386 = vpow2.f32 %v3671_v38  ;;  %v3673_v36 = vmul.f32 1.442695, %v3643_v51  ;;  %v3644_v9 = vsub.f32 %v8056_v13, %v3628_v17  ;;  %5500 = vmatprep.subr.bf16.mxu1 %v6202_v15 }
 0x975   : > { %3693 = vadd.xlane.f32.xlu0 %v8092_v12 }
 0x976   : > { %v8096_v19 = vpop.eup %6378  ;;  %6388 = vpow2.f32 %v3673_v36  ;;  %v3675_v55 = vmul.f32 1.442695, %v3644_v9 }
 0x977   : > { %3695 = vadd.xlane.f32.xlu1 %v8096_v19  ;;  %5501 = vmatpush3.bf16.msra.mxu1 %v6203_v52 }
 0x978   : > { %v8099_v48 = vpop.eup %6380  ;;  %6390 = vpow2.f32 %v3675_v55  ;;  %5502 = vmatprep.subr.bf16.mxu1 %v6207_v16 }
 0x979   : > { %3697 = vadd.xlane.f32.xlu0 %v8099_v48 }
 0x97a   : > { %v8102_v14 = vpop.eup %6382 }
 0x97b   : > { %3699 = vadd.xlane.f32.xlu1 %v8102_v14  ;;  %5503 = vmatpush3.bf16.msra.mxu1 %v6208_v5 }
 0x97c   : > { %v8105_v2 = vpop.eup %6384  ;;  %5504 = vmatprep.subr.bf16.mxu1 %v6212_v33 }
 0x97d   : > { %3701 = vadd.xlane.f32.xlu0 %v8105_v2 }
 0x97e   : > { %v8108_v13 = vpop.eup %6386 }
 0x97f   : > { %3703 = vadd.xlane.f32.xlu1 %v8108_v13  ;;  %5505 = vmatpush3.bf16.msra.mxu1 %v6213_v53  ;;  %v6160_v53 = vld [vmem:[#allocation14] ss:$12 sps:$4 sm:$0xff]  }
 0x980   : > { %v8111_v22 = vpop.eup %6388  ;;  %5506 = vmatprep.subr.bf16.mxu1 %v6217_v62 }
 0x981   : > { %3705 = vadd.xlane.f32.xlu0 %v8111_v22 }
 0x982   : > { %v8114_v23 = vpop.eup %6390 }
 0x983   : > { %3707 = vadd.xlane.f32.xlu1 %v8114_v23  ;;  %5507 = vmatpush3.bf16.msra.mxu1 %v6218_v50 }
 0x9f2   : > { %v3678_v6 = vpop.xlane.xlu0 %3677 }
 0x9f3   : > { %6392 = vrcp.f32 %v3678_v6 }
 0x9f4   : > { %v3680_v25 = vpop.xlane.xlu1 %3679 }
 0x9f5   : > { %6394 = vrcp.f32 %v3680_v25 }
 0x9f6   : > { %v3682_v38 = vpop.xlane.xlu0 %3681 }
 0x9f7   : > { %6396 = vrcp.f32 %v3682_v38 }
 0x9f8   : > { %v3684_v51 = vpop.xlane.xlu1 %3683 }
 0x9f9   : > { %6398 = vrcp.f32 %v3684_v51 }
 0x9fa   : > { %v3686_v17 = vpop.xlane.xlu0 %3685 }
 0x9fb   : > { %6400 = vrcp.f32 %v3686_v17 }
 0x9fc   : > { %v3688_v36 = vpop.xlane.xlu1 %3687 }
 0x9fd   : > { %v6393_v9 = vpop.eup %6392  ;;  %6402 = vrcp.f32 %v3688_v36  ;;  %v6168_v36 = vld [vmem:[#allocation14 + $0x34] ss:$12 sps:$4 sm:$0xff]  }
 0x9fe   : > { %v3690_v55 = vpop.xlane.xlu0 %3689  ;;  %v3725_v39 = vmul.f32 %v6393_v9, %v8063_v11  ;;  %v6165_v11 = vld [vmem:[#allocation14 + $0x1c] ss:$12 sps:$4 sm:$0xff]  }
 0x9ff   : > { %v6395_v24 = vpop.eup %6394  ;;  %6404 = vrcp.f32 %v3690_v55 }
 0xa00   : > { %v3692_v10 = vpop.xlane.xlu1 %3691  ;;  %v3726_v63 = vmul.f32 %v6395_v24, %v8066_v30 }
 0xa01   : > { %v6397_v28 = vpop.eup %6396  ;;  %6406 = vrcp.f32 %v3692_v10 }
 0xa02   : > { %v3694_v54 = vpop.xlane.xlu0 %3693  ;;  %v3741_v44 = vpack.c.bf16 %v3726_v63, %v3725_v39  ;;  %v3727_v52 = vmul.f32 %v6397_v28, %v8069_v37  ;;  %v6163_v37 = vld [vmem:[#allocation14 + $0x18] ss:$12 sps:$4 sm:$0xff]  }
 0xa03   : > { %v6399_v15 = vpop.eup %6398  ;;  %6408 = vrcp.f32 %v3694_v54  ;;  %v6171_v28 = vld [vmem:[#allocation14 + $0x4c] ss:$12 sps:$4 sm:$0xff]  }
 0xa04   : > { %v3728_v16 = vmul.f32 %v6399_v15, %v8072_v21  ;;  %v3696_v5 = vpop.xlane.xlu1 %3695  ;;  %5782 = vmatprep.mubr.bf16.mxu0 %v3741_v44 }
 0xa05   : > { %v6401_v33 = vpop.eup %6400  ;;  %6410 = vrcp.f32 %v3696_v5  ;;  %v6174_v5 = vld [vmem:[#allocation14 + $0x64] ss:$12 sps:$4 sm:$0xff]  }
 0xa06   : > { %v3698_v62 = vpop.xlane.xlu0 %3697  ;;  %v3742_v50 = vpack.c.bf16 %v3728_v16, %v3727_v52  ;;  %v3729_v25 = vmul.f32 %v6401_v33, %v8076_v43  ;;  %v6166_v43 = vld [vmem:[#allocation14 + $0x30] ss:$12 sps:$4 sm:$0xff]  }
 0xa07   : > { %v6403_v6 = vpop.eup %6402  ;;  %6412 = vrcp.f32 %v3698_v62 }
 0xa08   : > { %v3700_v30 = vpop.xlane.xlu1 %3699  ;;  %5783 = vmatmul.mubr.bf16.vlgmr.msra.gmra.mrb[144].mxu0 %v3742_v50  ;;  %v3730_v38 = vmul.f32 %v6403_v6, %v8080_v40 }
 0xa09   : > { %v6405_v51 = vpop.eup %6404  ;;  %6414 = vrcp.f32 %v3700_v30  ;;  %4123 = vmatpush1.bf16.msra.mxu0 %v6160_v53 }
 0xa0a   : > { %v3702_v21 = vpop.xlane.xlu0 %3701  ;;  %v3743_v17 = vpack.c.bf16 %v3730_v38, %v3729_v25  ;;  %4124 = vmatprep.subr.bf16.mxu0 %v6165_v11  ;;  %v3731_v24 = vmul.f32 %v6405_v51, %v8084_v46  ;;  %v6169_v46 = vld [vmem:[#allocation14 + $0x48] ss:$12 sps:$4 sm:$0xff]   ;;  %v6172_v11 = vld [vmem:[#allocation14 + $0x60] ss:$12 sps:$4 sm:$0xff]   ;;  %v6175_v51 = vld [vmem:[#allocation14 + $0x78] ss:$12 sps:$4 sm:$0xff]  }
 0xa0b   : > { %v6407_v9 = vpop.eup %6406  ;;  %6416 = vrcp.f32 %v3702_v21 }
 0xa0c   : > { %v3704_v55 = vpop.xlane.xlu1 %3703  ;;  %5786 = vmatprep.mubr.bf16.mxu0 %v3743_v17  ;;  %v3732_v10 = vmul.f32 %v6407_v9, %v8088_v8 }
 0xa0d   : > { %v6409_v39 = vpop.eup %6408  ;;  %6418 = vrcp.f32 %v3704_v55  ;;  %4125 = vmatpush1.bf16.msra.mxu0 %v6163_v37  ;;  %v6183_v55 = vld [vmem:[#allocation14 + $0xac] ss:$12 sps:$4 sm:$0xff]  }
 0xa0e   : > { %v3706_v40 = vpop.xlane.xlu0 %3705  ;;  %v3744_v63 = vpack.c.bf16 %v3732_v10, %v3731_v24  ;;  %4126 = vmatprep.subr.bf16.mxu0 %v6168_v36  ;;  %v3733_v15 = vmul.f32 %v6409_v39, %v8092_v12  ;;  %v6177_v12 = vld [vmem:[#allocation14 + $0x7c] ss:$12 sps:$4 sm:$0xff]   ;;  %v6184_v24 = vld [vmem:[#allocation14 + $0xc0] ss:$12 sps:$4 sm:$0xff]  }
 0xa0f   : > { %v6411_v54 = vpop.eup %6410  ;;  %6420 = vrcp.f32 %v3706_v40  ;;  %v6178_v36 = vld [vmem:[#allocation14 + $0x90] ss:$12 sps:$4 sm:$0xff]   ;;  %v6199_v40 = vld [vmem:[#allocation14 + $0x108] ss:$12 sps:$4 sm:$0xff]  }
 0xa10   : > { %v3708_v44 = vpop.xlane.xlu1 %3707  ;;  %5787 = vmatmul.mubr.bf16.gmra.mrb[148].mxu0 %v3744_v63  ;;  %v3734_v52 = vmul.f32 %v6411_v54, %v8096_v19  ;;  %v6191_v10 = vld [vmem:[#allocation14 + $0xdc] ss:$12 sps:$4 sm:$0xff]   ;;  %v6204_v63 = vld [vmem:[#allocation14 + $0x120] ss:$12 sps:$4 sm:$0xff]   ;;  %v6209_v54 = vld [vmem:[#allocation14 + $0x138] ss:$12 sps:$4 sm:$0xff]  }
 0xa11   : > { %v6413_v16 = vpop.eup %6412  ;;  %6422 = vrcp.f32 %v3708_v44  ;;  %4127 = vmatpush1.bf16.msra.mxu0 %v6166_v43  ;;  %v6194_v39 = vld [vmem:[#allocation14 + $0xf0] ss:$12 sps:$4 sm:$0xff]   ;;  %v6201_v43 = vld [vmem:[#allocation14 + $0x10c] ss:$12 sps:$4 sm:$0xff]   ;;  %v6216_v44 = vld [vmem:[#allocation14 + $0x154] ss:$12 sps:$4 sm:$0xff]  }
 0xa12   : > { %v3745_v8 = vpack.c.bf16 %v3734_v52, %v3733_v15  ;;  %4128 = vmatprep.subr.bf16.mxu0 %v6171_v28  ;;  %v3735_v53 = vmul.f32 %v6413_v16, %v8099_v48  ;;  %v6180_v48 = vld [vmem:[#allocation14 + $0x94] ss:$12 sps:$4 sm:$0xff]   ;;  %v6211_v28 = vld [vmem:[#allocation14 + $0x13c] ss:$12 sps:$4 sm:$0xff]   ;;  %v6221_v52 = vld [vmem:[#allocation14 + $0x16c] ss:$12 sps:$4 sm:$0xff]  }
 0xa13   : > { %v6415_v33 = vpop.eup %6414  ;;  %v6214_v15 = vld [vmem:[#allocation14 + $0x150] ss:$12 sps:$4 sm:$0xff]  }
 0xa14   : > { %5790 = vmatprep.mubr.bf16.mxu0 %v3745_v8  ;;  %v3736_v62 = vmul.f32 %v6415_v33, %v8102_v14  ;;  %v6222_v16 = vld [vmem:[#allocation14 + $0x170] ss:$12 sps:$4 sm:$0xff]  }
 0xa15   : > { %v6417_v50 = vpop.eup %6416  ;;  %4129 = vmatpush1.bf16.msra.mxu0 %v6169_v46  ;;  %v6219_v46 = vld [vmem:[#allocation14 + $0x168] ss:$12 sps:$4 sm:$0xff]   ;;  %v6223_v8 = vld [vmem:[#allocation14 + $0xb0] ss:$12 sps:$4 sm:$0xff]   ;;  %5508 = vmatprep.subr.bf16.mxu1 %v6222_v16 }
 0xa16   : > { %v3746_v6 = vpack.c.bf16 %v3736_v62, %v3735_v53  ;;  %4130 = vmatprep.subr.bf16.mxu0 %v6174_v5  ;;  %v3737_v30 = vmul.f32 %v6417_v50, %v8105_v2  ;;  %v6181_v2 = vld [vmem:[#allocation14 + $0xa8] ss:$12 sps:$4 sm:$0xff]   ;;  %5509 = vmatpush3.bf16.msra.mxu1 %v6223_v8 }
 0xa17   : > { %v6419_v19 = vpop.eup %6418 }
 0xa18   : > { %5791 = vmatmul.mubr.bf16.gmra.mrb[152].mxu0 %v3746_v6  ;;  %v3738_v25 = vmul.f32 %v6419_v19, %v8108_v13  ;;  %v6186_v13 = vld [vmem:[#allocation14 + $0xc4] ss:$12 sps:$4 sm:$0xff]  }
 0xa19   : > { %v6421_v38 = vpop.eup %6420  ;;  %4131 = vmatpush1.bf16.msra.mxu0 %v6172_v11 }
 0xa1a   : > { %v3747_v37 = vpack.c.bf16 %v3738_v25, %v3737_v30  ;;  %4132 = vmatprep.subr.bf16.mxu0 %v6177_v12  ;;  %v3739_v14 = vmul.f32 %v6421_v38, %v8111_v22  ;;  %v6189_v22 = vld [vmem:[#allocation14 + $0xd8] ss:$12 sps:$4 sm:$0xff]  }
 0xa1b   : > { %v6423_v21 = vpop.eup %6422 }
 0xa1c   : > { %5794 = vmatprep.mubr.bf16.mxu0 %v3747_v37  ;;  %v3740_v17 = vmul.f32 %v6423_v21, %v8114_v23  ;;  %v6196_v23 = vld [vmem:[#allocation14 + $0xf4] ss:$12 sps:$4 sm:$0xff]  }
 0xa1d   : > { %4133 = vmatpush1.bf16.msra.mxu0 %v6175_v51 }
 0xa1e   : > { %v3748_v9 = vpack.c.bf16 %v3740_v17, %v3739_v14  ;;  %4134 = vmatprep.subr.bf16.mxu0 %v6180_v48 }
 0xa20   : > { %5795 = vmatmul.mubr.bf16.gmra.mrb[156].mxu0 %v3748_v9 }
 0xa21   : > { %4154 = vmatprep.mubr.bf16.mxu0 %v7944_v7  ;;  %4135 = vmatpush1.bf16.msra.mxu0 %v6178_v36  ;;  %v6206_v7 = vld [vmem:[#allocation14 + $0x124] ss:$12 sps:$4 sm:$0xff]  }
 0xa22   : > { %4136 = vmatprep.subr.bf16.mxu0 %v6183_v55 }
 0xa25   : > { %4137 = vmatpush1.bf16.msra.mxu0 %v6181_v2 }
 0xa26   : > { %4138 = vmatprep.subr.bf16.mxu0 %v6186_v13 }
 0xa29   : > { %4139 = vmatpush1.bf16.msra.mxu0 %v6184_v24  ;;  %v6229_v24 = vld [vmem:[#allocation16 + $0x28] sm:$0xff]  }
 0xa2a   : > { %4140 = vmatprep.subr.bf16.mxu0 %v6191_v10  ;;  %v6231_v10 = vld [vmem:[#allocation16 + $0x38] sm:$0xff]  }
 0xa2d   : > { %4141 = vmatpush1.bf16.msra.mxu0 %v6189_v22  ;;  %v8149_v22 = vsub.s32 5, %v7442_v58 }
 0xa2e   : > { %4142 = vmatprep.subr.bf16.mxu0 %v6196_v23 }
 0xa31   : > { %4143 = vmatpush1.bf16.msra.mxu0 %v6194_v39 }
 0xa32   : > { %4144 = vmatprep.subr.bf16.mxu0 %v6201_v43  ;;  %v6491_v43 = vld [vmem:[#allocation17 + $0x10] sm:$0xff] }
 0xa35   : > { %4145 = vmatpush1.bf16.msra.mxu0 %v6199_v40  ;;  %v8154_v40 = vrot.slane %v6491_v43, %v8149_v22 }
 0xa36   : > { %4146 = vmatprep.subr.bf16.mxu0 %v6206_v7 }
 0xa39   : > { %4147 = vmatpush1.bf16.msra.mxu0 %v6204_v63 }
 0xa3a   : > { %4148 = vmatprep.subr.bf16.mxu0 %v6211_v28 }
 0xa3d   : > { %4149 = vmatpush1.bf16.msra.mxu0 %v6209_v54 }
 0xa3e   : > { %4150 = vmatprep.subr.bf16.mxu0 %v6216_v44 }
 0xa41   : > { %4151 = vmatpush1.bf16.msra.mxu0 %v6214_v15 }
 0xa42   : > { %4152 = vmatprep.subr.bf16.mxu0 %v6221_v52 }
 0xa45   : > { %4153 = vmatpush1.bf16.msra.mxu0 %v6219_v46 }
 0xadb   : > { %v5784_v5 = vpop.f32.mrb[144].mxu0 }
 0xadc   : > { %v3783_v33 = vpop.f32.mrb[145].mxu0 }
 0xadd   : > { %v5785_v53 = vpop.f32.mrb[146].mxu0 }
 0xade   : > { %v3847_v62 = vpack.c.bf16 %v5785_v53, %v5784_v5  ;;  %v3786_v50 = vpop.f32.mrb[147].mxu0 }
 0xadf   : > { %v3846_v11 = vpack.c.bf16 %v3786_v50, %v3783_v33 }
 0xae1   : > { %4155 = vmatmul.mubr.bf16.vlgmr.msra.gmra.mrb[160].mxu0 %v3846_v11  ;;  %4268 = vmatmul.mubr.bf16.vlgmr.msra.gmra.mrb[176].mxu1 %v3846_v11 }
 0xae2   : > { %4164 = vmatprep.mubr.bf16.mxu0 %v7967_v47  ;;  %4275 = vmatprep.mubr.bf16.mxu1 %v7967_v47 }
 0xae3   : > { %v5788_v6 = vpop.f32.mrb[148].mxu0 }
 0xae4   : > { %v3799_v12 = vpop.f32.mrb[149].mxu0 }
 0xae5   : > { %v5789_v19 = vpop.f32.mrb[150].mxu0 }
 0xae6   : > { %v3849_v30 = vpack.c.bf16 %v5789_v19, %v5788_v6  ;;  %v3802_v25 = vpop.f32.mrb[151].mxu0 }
 0xae7   : > { %v3848_v38 = vpack.c.bf16 %v3802_v25, %v3799_v12 }
 0xae9   : > { %4165 = vmatmul.mubr.bf16.gmra.mrb[164].mxu0 %v3847_v62  ;;  %4276 = vmatmul.mubr.bf16.gmra.mrb[180].mxu1 %v3847_v62 }
 0xaea   : > { %4174 = vmatprep.mubr.bf16.mxu0 %v7989_v59  ;;  %4283 = vmatprep.mubr.bf16.mxu1 %v7989_v59  ;;  %v6224_v59 = vld [vmem:[#allocation16] sm:$0xff]  }
 0xaeb   : > { %v5792_v51 = vpop.f32.mrb[152].mxu0  ;;  %5798 = vmatprep.subr.bf16.mxu1 %v6224_v59 }
 0xaec   : > { %v3815_v37 = vpop.f32.mrb[153].mxu0  ;;  %5799 = vmatpush3.bf16.msra.mxu1 %v6224_v59 }
 0xaed   : > { %v5793_v48 = vpop.f32.mrb[154].mxu0 }
 0xaee   : > { %v3851_v21 = vpack.c.bf16 %v5793_v48, %v5792_v51  ;;  %v3818_v14 = vpop.f32.mrb[155].mxu0 }
 0xaef   : > { %v3850_v17 = vpack.c.bf16 %v3818_v14, %v3815_v37 }
 0xaf1   : > { %4175 = vmatmul.mubr.bf16.gmra.mrb[168].mxu0 %v3848_v38  ;;  %4284 = vmatmul.mubr.bf16.gmra.mrb[184].mxu1 %v3848_v38 }
 0xaf2   : > { %4184 = vmatprep.mubr.bf16.mxu0 %v8011_v4  ;;  %4291 = vmatprep.mubr.bf16.mxu1 %v8011_v4  ;;  %v6225_v4 = vld [vmem:[#allocation16 + $0x8] sm:$0xff]  }
 0xaf3   : > { %v5796_v47 = vpop.f32.mrb[156].mxu0  ;;  %5800 = vmatprep.subr.bf16.mxu1 %v6225_v4 }
 0xaf4   : > { %v3831_v36 = vpop.f32.mrb[157].mxu0  ;;  %5801 = vmatpush3.bf16.msra.mxu1 %v6225_v4 }
 0xaf5   : > { %v5797_v9 = vpop.f32.mrb[158].mxu0 }
 0xaf6   : > { %v3853_v55 = vpack.c.bf16 %v5797_v9, %v5796_v47  ;;  %v3834_v2 = vpop.f32.mrb[159].mxu0 }
 0xaf7   : > { %v3852_v13 = vpack.c.bf16 %v3834_v2, %v3831_v36 }
 0xaf9   : > { %4185 = vmatmul.mubr.bf16.gmra.mrb[172].mxu0 %v3849_v30  ;;  %4292 = vmatmul.mubr.bf16.gmra.mrb[188].mxu1 %v3849_v30 }
 0xafa   : > { %4194 = vmatprep.mubr.bf16.mxu0 %v8017_v34  ;;  %4299 = vmatprep.mubr.bf16.mxu1 %v8017_v34  ;;  %v6226_v34 = vld [vmem:[#allocation16 + $0x10] sm:$0xff]  }
 0xafb   : > { %5802 = vmatprep.subr.bf16.mxu1 %v6226_v34 }
 0xafc   : > { %5803 = vmatpush3.bf16.msra.mxu1 %v6226_v34 }
 0xb01   : > { %4195 = vmatmul.mubr.bf16.gmra.mrb[176].mxu0 %v3850_v17  ;;  %4300 = vmatmul.mubr.bf16.gmra.mrb[192].mxu1 %v3850_v17 }
 0xb02   : > { %4204 = vmatprep.mubr.bf16.mxu0 %v8023_v20  ;;  %4307 = vmatprep.mubr.bf16.mxu1 %v8023_v20  ;;  %v6227_v20 = vld [vmem:[#allocation16 + $0x18] sm:$0xff]  }
 0xb03   : > { %5804 = vmatprep.subr.bf16.mxu1 %v6227_v20 }
 0xb04   : > { %5805 = vmatpush3.bf16.msra.mxu1 %v6227_v20 }
 0xb09   : > { %4205 = vmatmul.mubr.bf16.gmra.mrb[180].mxu0 %v3851_v21  ;;  %4308 = vmatmul.mubr.bf16.gmra.mrb[196].mxu1 %v3851_v21 }
 0xb0a   : > { %4214 = vmatprep.mubr.bf16.mxu0 %v8029_v18  ;;  %4315 = vmatprep.mubr.bf16.mxu1 %v8029_v18  ;;  %v6228_v18 = vld [vmem:[#allocation16 + $0x20] sm:$0xff]  }
 0xb0b   : > { %5806 = vmatprep.subr.bf16.mxu1 %v6228_v18 }
 0xb0c   : > { %5807 = vmatpush3.bf16.msra.mxu1 %v6228_v18 }
 0xb0d   : > { %5808 = vmatprep.subr.bf16.mxu1 %v6229_v24 }
 0xb10   : > { %5809 = vmatpush3.bf16.msra.mxu1 %v6229_v24 }
 0xb11   : > { %4215 = vmatmul.mubr.bf16.gmra.mrb[184].mxu0 %v3852_v13  ;;  %4316 = vmatmul.mubr.bf16.gmra.mrb[200].mxu1 %v3852_v13 }
 0xb12   : > { %4224 = vmatprep.mubr.bf16.mxu0 %v8035_v1  ;;  %4323 = vmatprep.mubr.bf16.mxu1 %v8035_v1  ;;  %v6230_v1 = vld [vmem:[#allocation16 + $0x30] sm:$0xff]  }
 0xb13   : > { %5810 = vmatprep.subr.bf16.mxu1 %v6230_v1 }
 0xb14   : > { %5811 = vmatpush3.bf16.msra.mxu1 %v6230_v1 }
 0xb15   : > { %5812 = vmatprep.subr.bf16.mxu1 %v6231_v10 }
 0xb18   : > { %5813 = vmatpush3.bf16.msra.mxu1 %v6231_v10 }
 0xb19   : > { %4225 = vmatmul.mubr.bf16.gmra.mrb[188].mxu0 %v3853_v55  ;;  %4324 = vmatmul.mubr.bf16.gmra.mrb[204].mxu1 %v3853_v55 }
 0xbb4   : > { %v8151_v23 = vpop.f32.mrb[160].mxu0  ;;  %v5510_v39 = vpop.f32.mrb[176].mxu1 }
 0xbb5   : > { %v8156_v7 = vpop.f32.mrb[161].mxu0  ;;  %v5511_v63 = vpop.f32.mrb[177].mxu1 }
 0xbb6   : > { %v5512_v28 = vadd.f32 %v5511_v63, %v5510_v39  ;;  %v8158_v54 = vpop.f32.mrb[162].mxu0  ;;  %v5513_v44 = vpop.f32.mrb[178].mxu1 }
 0xbb7   : > { %v8160_v15 = vpop.f32.mrb[163].mxu0  ;;  %v5514_v52 = vpop.f32.mrb[179].mxu1 }
 0xbb8   : > { %v4270_v16 = vadd.f32 %v5512_v28, %v8154_v40  ;;  %v5515_v46 = vadd.f32 %v5514_v52, %v5513_v44 }
 0xbba   : > { %v5095_v8 = vmul.f32 -1.442695, %v4270_v16  ;;  %v4273_v5 = vadd.f32 %v5515_v46, %v8154_v40  ;;  %v6492_v46 = vld [vmem:[#allocation17 + $0x8] sm:$0xff] }
 0xbbc   : > { %6424 = vpow2.f32 %v5095_v8  ;;  %v5096_v33 = vmul.f32 -1.442695, %v4273_v5  ;;  %v8164_v53 = vpop.f32.mrb[164].mxu0  ;;  %v5516_v62 = vpop.f32.mrb[180].mxu1  ;;  %v8189_v8 = vrot.slane %v6492_v46, %v8149_v22 }
 0xbbd   : > { %v8166_v50 = vpop.f32.mrb[165].mxu0  ;;  %v5517_v11 = vpop.f32.mrb[181].mxu1 }
 0xbbe   : > { %6426 = vpow2.f32 %v5096_v33  ;;  %v5518_v6 = vadd.f32 %v5517_v11, %v5516_v62  ;;  %v8168_v12 = vpop.f32.mrb[166].mxu0  ;;  %v5519_v19 = vpop.f32.mrb[182].mxu1 }
 0xbbf   : > { %v8170_v30 = vpop.f32.mrb[167].mxu0  ;;  %v5520_v25 = vpop.f32.mrb[183].mxu1 }
 0xbc0   : > { %v4278_v38 = vadd.f32 %v5518_v6, %v8154_v40  ;;  %v5521_v51 = vadd.f32 %v5520_v25, %v5519_v19 }
 0xbc2   : > { %v5097_v37 = vmul.f32 -1.442695, %v4278_v38  ;;  %v4281_v48 = vadd.f32 %v5521_v51, %v8154_v40 }
 0xbc4   : > { %6428 = vpow2.f32 %v5097_v37  ;;  %v5098_v21 = vmul.f32 -1.442695, %v4281_v48  ;;  %v8174_v14 = vpop.f32.mrb[168].mxu0  ;;  %v5522_v17 = vpop.f32.mrb[184].mxu1  ;;  %v8196_v37 = vld [vmem:[#allocation17] sm:$0xff] }
 0xbc5   : > { %v8176_v47 = vpop.f32.mrb[169].mxu0  ;;  %v5523_v36 = vpop.f32.mrb[185].mxu1  ;;  %v8200_v48 = vrot.slane %v8196_v37, %v8149_v22 }
 0xbc6   : > { %v6425_v9 = vpop.eup %6424  ;;  %6430 = vpow2.f32 %v5098_v21  ;;  %v5524_v55 = vadd.f32 %v5523_v36, %v5522_v17  ;;  %v8178_v2 = vpop.f32.mrb[170].mxu0  ;;  %v4159_v17 = vadd.f32 %v8156_v7, %v8189_v8 }
 0xbc7   : > { %v5525_v13 = vpop.f32.mrb[186].mxu1  ;;  %v4380_v59 = vadd.f32 1.0, %v6425_v9  ;;  %v8180_v4 = vpop.f32.mrb[171].mxu0 }
 0xbc8   : > { %v5526_v34 = vpop.f32.mrb[187].mxu1  ;;  %v6427_v20 = vpop.eup %6426  ;;  %v4286_v18 = vadd.f32 %v5524_v55, %v8154_v40 }
 0xbc9   : > { %v5527_v24 = vadd.f32 %v5526_v34, %v5525_v13  ;;  %6432 = vrcp.f32 %v4380_v59  ;;  %v4381_v1 = vadd.f32 1.0, %v6427_v20  ;;  %v4163_v13 = vadd.f32 %v8160_v15, %v8189_v8 }
 0xbca   : > { %v5099_v10 = vmul.f32 -1.442695, %v4286_v18 }
 0xbcb   : > { %v4289_v39 = vadd.f32 %v5527_v24, %v8154_v40  ;;  %6434 = vrcp.f32 %v4381_v1  ;;  %v4157_v24 = vadd.f32 %v8151_v23, %v8200_v48 }
 0xbcc   : > { %6436 = vpow2.f32 %v5099_v10  ;;  %v8184_v63 = vpop.f32.mrb[172].mxu0  ;;  %v5528_v28 = vpop.f32.mrb[188].mxu1 }
 0xbcd   : > { %v5100_v43 = vmul.f32 -1.442695, %v4289_v39  ;;  %v8186_v44 = vpop.f32.mrb[173].mxu0  ;;  %v5529_v52 = vpop.f32.mrb[189].mxu1  ;;  %v4161_v39 = vadd.f32 %v8158_v54, %v8200_v48 }
 0xbce   : > { %v6429_v16 = vpop.eup %6428  ;;  %v5530_v5 = vadd.f32 %v5529_v52, %v5528_v28  ;;  %v8191_v33 = vpop.f32.mrb[174].mxu0 }
 0xbcf   : > { %6438 = vpow2.f32 %v5100_v43  ;;  %v5531_v62 = vpop.f32.mrb[190].mxu1  ;;  %v4382_v11 = vadd.f32 1.0, %v6429_v16  ;;  %v8193_v6 = vpop.f32.mrb[175].mxu0 }
 0xbd0   : > { %v5532_v19 = vpop.f32.mrb[191].mxu1  ;;  %v6431_v25 = vpop.eup %6430  ;;  %v4294_v38 = vadd.f32 %v5530_v5, %v8154_v40 }
 0xbd1   : > { %v5533_v51 = vadd.f32 %v5532_v19, %v5531_v62  ;;  %6440 = vrcp.f32 %v4382_v11  ;;  %v4383_v21 = vadd.f32 1.0, %v6431_v25 }
 0xbd2   : > { %v5101_v36 = vmul.f32 -1.442695, %v4294_v38 }
 0xbd3   : > { %v4297_v9 = vadd.f32 %v5533_v51, %v8154_v40  ;;  %v6433_v55 = vpop.eup %6432  ;;  %6442 = vrcp.f32 %v4383_v21  ;;  %v4169_v51 = vadd.f32 %v8166_v50, %v8189_v8  ;;  %v4167_v50 = vadd.f32 %v8164_v53, %v8200_v48 }
 0xbd4   : > { %6444 = vpow2.f32 %v5101_v36  ;;  %v8207_v34 = vpop.f32.mrb[176].mxu0  ;;  %v5534_v20 = vpop.f32.mrb[192].mxu1  ;;  %v4428_v22 = vmul.f32 %v6433_v55, %v4159_v17  ;;  %v4173_v55 = vadd.f32 %v8170_v30, %v8189_v8 }
 0xbd5   : > { %v5102_v59 = vmul.f32 -1.442695, %v4297_v9  ;;  %v6435_v18 = vpop.eup %6434  ;;  %v8211_v1 = vpop.f32.mrb[177].mxu0 }
 0xbd6   : > { %v5535_v7 = vpop.f32.mrb[193].mxu1  ;;  %v6437_v10 = vpop.eup %6436  ;;  %v4429_v52 = vmul.f32 %v6435_v18, %v4163_v13  ;;  %v4444_v62 = vmul.f32 %v4428_v22, %v4157_v24 }
 0xbd7   : > { %6446 = vpow2.f32 %v5102_v59  ;;  %v5536_v43 = vadd.f32 %v5535_v7, %v5534_v20  ;;  %v8215_v15 = vpop.f32.mrb[178].mxu0  ;;  %v5537_v28 = vpop.f32.mrb[194].mxu1  ;;  %v4384_v16 = vadd.f32 1.0, %v6437_v10  ;;  %v4171_v10 = vadd.f32 %v8168_v12, %v8200_v48 }
 0xbd8   : > { %v8217_v46 = vpop.f32.mrb[179].mxu0  ;;  %v5538_v5 = vpop.f32.mrb[195].mxu1  ;;  %v4445_v25 = vmul.f32 %v4429_v52, %v4161_v39  ;;  %v4460_v54 = vadd.f32 %v4444_v62, %v7842_v56 }
 0xbd9   : > { %v6439_v11 = vpop.eup %6438  ;;  %v4302_v23 = vadd.f32 %v5536_v43, %v8154_v40  ;;  %v5539_v19 = vadd.f32 %v5538_v5, %v5537_v28  ;;  %6448 = vrcp.f32 %v4384_v16 }
 0xbda   : > { %v4385_v38 = vadd.f32 1.0, %v6439_v11  ;;  %v4461_v36 = vadd.f32 %v4445_v25, %v7845_v27 }
 0xbdb   : > { %v5103_v21 = vmul.f32 -1.442695, %v4302_v23  ;;  %v4305_v17 = vadd.f32 %v5539_v19, %v8154_v40  ;;  %v6441_v9 = vpop.eup %6440 }
 0xbdc   : > { %6450 = vrcp.f32 %v4385_v38  ;;  %v4430_v13 = vmul.f32 %v6441_v9, %v4169_v51  ;;  %v8227_v20 = vpop.f32.mrb[180].mxu0  ;;  %v5540_v22 = vpop.f32.mrb[196].mxu1  ;;  %v4476_v56 = vpack.c.bf16 %v4461_v36, %v4460_v54  ;;  %v4179_v38 = vadd.f32 %v8176_v47, %v8189_v8 }
 0xbdd   : > { %6452 = vpow2.f32 %v5103_v21  ;;  %v5104_v59 = vmul.f32 -1.442695, %v4305_v17  ;;  %v6443_v18 = vpop.eup %6442  ;;  %v8231_v24 = vpop.f32.mrb[181].mxu0  ;;  %v4183_v36 = vadd.f32 %v8180_v4, %v8189_v8  ;;  %v4177_v47 = vadd.f32 %v8174_v14, %v8200_v48 }
 0xbde   : > { %v5541_v7 = vpop.f32.mrb[197].mxu1  ;;  %v6445_v27 = vpop.eup %6444  ;;  %v4431_v30 = vmul.f32 %v6443_v18, %v4173_v55  ;;  %5814 = vmatprep.mubr.bf16.mxu1 %v4476_v56  ;;  %v4446_v62 = vmul.f32 %v4430_v13, %v4167_v50  ;;  %v4181_v50 = vadd.f32 %v8178_v2, %v8200_v48 }
 0xbdf   : > { %6454 = vpow2.f32 %v5104_v59  ;;  %v5542_v39 = vadd.f32 %v5541_v7, %v5540_v22  ;;  %v8235_v43 = vpop.f32.mrb[182].mxu0  ;;  %v5543_v28 = vpop.f32.mrb[198].mxu1  ;;  %v4386_v52 = vadd.f32 1.0, %v6445_v27 }
 0xbe0   : > { %v8237_v16 = vpop.f32.mrb[183].mxu0  ;;  %v5544_v5 = vpop.f32.mrb[199].mxu1  ;;  %v4447_v19 = vmul.f32 %v4431_v30, %v4171_v10  ;;  %v4462_v12 = vadd.f32 %v4446_v62, %v7864_v42 }
 0xbe1   : > { %v6447_v53 = vpop.eup %6446  ;;  %v4310_v11 = vadd.f32 %v5542_v39, %v8154_v40  ;;  %v5545_v23 = vadd.f32 %v5544_v5, %v5543_v28  ;;  %6456 = vrcp.f32 %v4386_v52 }
 0xbe2   : > { %v4387_v25 = vadd.f32 1.0, %v6447_v53  ;;  %v4463_v21 = vadd.f32 %v4447_v19, %v7867_v49 }
 0xbe3   : > { %v5105_v54 = vmul.f32 -1.442695, %v4310_v11  ;;  %v4313_v51 = vadd.f32 %v5545_v23, %v8154_v40  ;;  %v6449_v17 = vpop.eup %6448  ;;  %v4189_v23 = vadd.f32 %v8186_v44, %v8189_v8  ;;  %v4187_v44 = vadd.f32 %v8184_v63, %v8200_v48 }
 0xbe4   : > { %6458 = vrcp.f32 %v4387_v25  ;;  %v8247_v55 = vpop.f32.mrb[184].mxu0  ;;  %v5546_v13 = vpop.f32.mrb[200].mxu1  ;;  %v4477_v59 = vpack.c.bf16 %v4463_v21, %v4462_v12  ;;  %v4432_v42 = vmul.f32 %v6449_v17, %v4179_v38 }
 0xbe5   : > { %6460 = vpow2.f32 %v5105_v54  ;;  %v5106_v9 = vmul.f32 -1.442695, %v4313_v51  ;;  %v8251_v56 = vpop.f32.mrb[185].mxu0  ;;  %v5547_v18 = vpop.f32.mrb[201].mxu1  ;;  %v4193_v54 = vadd.f32 %v8193_v6, %v8189_v8 }
 0xbe6   : > { %v6451_v22 = vpop.eup %6450  ;;  %v5548_v4 = vadd.f32 %v5547_v18, %v5546_v13  ;;  %v8255_v7 = vpop.f32.mrb[186].mxu0  ;;  %5815 = vmatmul.mubr.bf16.vlgmr.msra.gmra.mrb[208].mxu1 %v4477_v59  ;;  %v4448_v52 = vmul.f32 %v4432_v42, %v4177_v47  ;;  %v4191_v42 = vadd.f32 %v8191_v33, %v8200_v48 }
 0xbe7   : > { %v6453_v49 = vpop.eup %6452  ;;  %6462 = vpow2.f32 %v5106_v9  ;;  %v5549_v27 = vpop.f32.mrb[202].mxu1  ;;  %v4433_v10 = vmul.f32 %v6451_v22, %v4183_v36 }
 0xbe8   : > { %v4388_v30 = vadd.f32 1.0, %v6453_v49  ;;  %v8257_v39 = vpop.f32.mrb[187].mxu0  ;;  %v5550_v28 = vpop.f32.mrb[203].mxu1  ;;  %v4318_v5 = vadd.f32 %v5548_v4, %v8154_v40  ;;  %v4464_v2 = vadd.f32 %v4448_v52, %v7886_v61 }
 0xbe9   : > { %v6455_v14 = vpop.eup %6454  ;;  %v5551_v62 = vadd.f32 %v5550_v28, %v5549_v27  ;;  %v4449_v53 = vmul.f32 %v4433_v10, %v4181_v50 }
 0xbea   : > { %6464 = vrcp.f32 %v4388_v30  ;;  %v4389_v11 = vadd.f32 1.0, %v6455_v14  ;;  %v5107_v19 = vmul.f32 -1.442695, %v4318_v5  ;;  %v4199_v14 = vadd.f32 %v8211_v1, %v8189_v8 }
 0xbeb   : > { %v4321_v25 = vadd.f32 %v5551_v62, %v8154_v40  ;;  %v4465_v12 = vadd.f32 %v4449_v53, %v7889_v29  ;;  %v6457_v38 = vpop.eup %6456  ;;  %v4201_v1 = vadd.f32 %v8215_v15, %v8200_v48  ;;  %v4207_v15 = vadd.f32 %v8227_v20, %v8200_v48 }
 0xbec   : > { %6466 = vrcp.f32 %v4389_v11  ;;  %v8267_v21 = vpop.f32.mrb[188].mxu0  ;;  %v5552_v17 = vpop.f32.mrb[204].mxu1  ;;  %v4434_v61 = vmul.f32 %v6457_v38, %v4189_v23  ;;  %v4203_v23 = vadd.f32 %v8217_v46, %v8189_v8 }
 0xbed   : > { %6468 = vpow2.f32 %v5107_v19  ;;  %v5108_v51 = vmul.f32 -1.442695, %v4321_v25  ;;  %v4478_v36 = vpack.c.bf16 %v4465_v12, %v4464_v2  ;;  %v8271_v13 = vpop.f32.mrb[189].mxu0  ;;  %v5553_v59 = vpop.f32.mrb[205].mxu1  ;;  %v4197_v2 = vadd.f32 %v8207_v34, %v8200_v48 }
 0xbee   : > { %v6459_v9 = vpop.eup %6458  ;;  %v5554_v6 = vadd.f32 %v5553_v59, %v5552_v17  ;;  %v8275_v22 = vpop.f32.mrb[190].mxu0  ;;  %v4450_v27 = vmul.f32 %v4434_v61, %v4187_v44  ;;  %v4213_v44 = vadd.f32 %v8237_v16, %v8189_v8  ;;  %v4219_v16 = vadd.f32 %v8251_v56, %v8189_v8 }
 0xbef   : > { %v6461_v29 = vpop.eup %6460  ;;  %6470 = vpow2.f32 %v5108_v51  ;;  %v5555_v47 = vpop.f32.mrb[206].mxu1  ;;  %5818 = vmatprep.mubr.bf16.mxu1 %v4478_v36  ;;  %v4435_v18 = vmul.f32 %v6459_v9, %v4193_v54  ;;  %v4209_v36 = vadd.f32 %v8231_v24, %v8189_v8 }
 0xbf0   : > { %v4390_v49 = vadd.f32 1.0, %v6461_v29  ;;  %v8277_v50 = vpop.f32.mrb[191].mxu0  ;;  %v5556_v4 = vpop.f32.mrb[207].mxu1  ;;  %v4326_v10 = vadd.f32 %v5554_v6, %v8154_v40  ;;  %v4466_v33 = vadd.f32 %v4450_v27, %v7909_v35 }
 0xbf1   : > { %v6463_v63 = vpop.eup %6462  ;;  %v5557_v30 = vadd.f32 %v5556_v4, %v5555_v47  ;;  %v4451_v28 = vmul.f32 %v4435_v18, %v4191_v42 }
 0xbf2   : > { %6472 = vrcp.f32 %v4390_v49  ;;  %v4391_v52 = vadd.f32 1.0, %v6463_v63  ;;  %v5109_v5 = vmul.f32 -1.442695, %v4326_v10  ;;  %v4223_v10 = vadd.f32 %v8257_v39, %v8189_v8 }
 0xbf3   : > { %v4329_v62 = vadd.f32 %v5557_v30, %v8154_v40  ;;  %v4467_v53 = vadd.f32 %v4451_v28, %v7912_v31  ;;  %v4227_v39 = vadd.f32 %v8267_v21, %v8200_v48  ;;  %v4502_v21 = vsub.s32 6, %v7442_v58 }
 0xbf4   : > { %v6465_v11 = vpop.eup %6464  ;;  %6474 = vrcp.f32 %v4391_v52 }
 0xbf5   : > { %6476 = vpow2.f32 %v5109_v5  ;;  %v5110_v19 = vmul.f32 -1.442695, %v4329_v62  ;;  %v4479_v25 = vpack.c.bf16 %v4467_v53, %v4466_v33  ;;  %v4436_v35 = vmul.f32 %v6465_v11, %v4199_v14 }
 0xbf6   : > { %v6467_v12 = vpop.eup %6466  ;;  %v4229_v5 = vadd.f32 %v8271_v13, %v8189_v8  ;;  %v4233_v53 = vadd.f32 %v8277_v50, %v8189_v8  ;;  %v4503_v8 = vrot.slane %v8196_v37, %v4502_v21 }
 0xbf7   : > { %v6469_v38 = vpop.eup %6468  ;;  %6478 = vpow2.f32 %v5110_v19  ;;  %5819 = vmatmul.mubr.bf16.gmra.mrb[212].mxu1 %v4479_v25  ;;  %v4437_v31 = vmul.f32 %v6467_v12, %v4203_v23  ;;  %v4452_v40 = vmul.f32 %v4436_v35, %v4197_v2  ;;  %v4231_v23 = vadd.f32 %v8275_v22, %v8200_v48 }
 0xbf8   : > { %v4392_v54 = vadd.f32 1.0, %v6469_v38 }
 0xbf9   : > { %v6471_v51 = vpop.eup %6470  ;;  %v4453_v34 = vmul.f32 %v4437_v31, %v4201_v1  ;;  %v4468_v17 = vadd.f32 %v4452_v40, %v7937_v32  ;;  %v4211_v32 = vadd.f32 %v8235_v43, %v8200_v48  ;;  %v4217_v43 = vadd.f32 %v8247_v55, %v8200_v48 }
 0xbfa   : > { %6480 = vrcp.f32 %v4392_v54  ;;  %v4393_v46 = vadd.f32 1.0, %v6471_v51 }
 0xbfb   : > { %v4469_v61 = vadd.f32 %v4453_v34, %v7942_v3 }
 0xbfc   : > { %v6473_v9 = vpop.eup %6472  ;;  %6482 = vrcp.f32 %v4393_v46 }
 0xbfd   : > { %v4480_v59 = vpack.c.bf16 %v4469_v61, %v4468_v17  ;;  %v4438_v29 = vmul.f32 %v6473_v9, %v4209_v36 }
 0xbfe   : > { %v6475_v42 = vpop.eup %6474 }
 0xbff   : > { %v6477_v6 = vpop.eup %6476  ;;  %5822 = vmatprep.mubr.bf16.mxu1 %v4480_v59  ;;  %v4439_v47 = vmul.f32 %v6475_v42, %v4213_v44  ;;  %v4454_v24 = vmul.f32 %v4438_v29, %v4207_v15 }
 0xc00   : > { %v4394_v18 = vadd.f32 1.0, %v6477_v6 }
 0xc01   : > { %v6479_v3 = vpop.eup %6478  ;;  %v4455_v49 = vmul.f32 %v4439_v47, %v4211_v32  ;;  %v4470_v4 = vadd.f32 %v4454_v24, %v7957_v57  ;;  %v4221_v57 = vadd.f32 %v8255_v7, %v8200_v48 }
 0xc02   : > { %6484 = vrcp.f32 %v4394_v18  ;;  %v4395_v20 = vadd.f32 1.0, %v6479_v3 }
 0xc03   : > { %v4471_v27 = vadd.f32 %v4455_v49, %v7965_v41 }
 0xc04   : > { %v6481_v63 = vpop.eup %6480  ;;  %6486 = vrcp.f32 %v4395_v20 }
 0xc05   : > { %v4481_v30 = vpack.c.bf16 %v4471_v27, %v4470_v4  ;;  %v4440_v28 = vmul.f32 %v6481_v63, %v4219_v16 }
 0xc06   : > { %v6483_v52 = vpop.eup %6482 }
 0xc07   : > { %5823 = vmatmul.mubr.bf16.gmra.mrb[216].mxu1 %v4481_v30  ;;  %v4441_v33 = vmul.f32 %v6483_v52, %v4223_v10  ;;  %v4456_v14 = vmul.f32 %v4440_v28, %v4217_v43 }
 0xc09   : > { %v4457_v56 = vmul.f32 %v4441_v33, %v4221_v57  ;;  %v4472_v41 = vadd.f32 %v4456_v14, %v7978_v60 }
 0xc0b   : > { %v4473_v55 = vadd.f32 %v4457_v56, %v7987_v0 }
 0xc0c   : > { %v6485_v62 = vpop.eup %6484 }
 0xc0d   : > { %v4482_v11 = vpack.c.bf16 %v4473_v55, %v4472_v41  ;;  %v4442_v7 = vmul.f32 %v6485_v62, %v4229_v5 }
 0xc0e   : > { %v6487_v2 = vpop.eup %6486 }
 0xc0f   : > { %5826 = vmatprep.mubr.bf16.mxu1 %v4482_v11  ;;  %v4443_v60 = vmul.f32 %v6487_v2, %v4233_v53  ;;  %v4458_v19 = vmul.f32 %v4442_v7, %v4227_v39 }
 0xc11   : > { %v4459_v13 = vmul.f32 %v4443_v60, %v4231_v23  ;;  %v4474_v0 = vadd.f32 %v4458_v19, %v8000_v26 }
 0xc13   : > { %v4475_v25 = vadd.f32 %v4459_v13, %v8009_v45 }
 0xc15   : > { %v4483_v35 = vpack.c.bf16 %v4475_v25, %v4474_v0 }
 0xc17   : > { %5827 = vmatmul.mubr.bf16.gmra.mrb[220].mxu1 %v4483_v35 }
 0xcb9   : > { %v5816_v50 = vpop.f32.mrb[208].mxu1 }
 0xcba   : > { %v4595_v12 = vadd.f32 %v5816_v50, %v4503_v8  ;;  %v4586_v38 = vpop.f32.mrb[209].mxu1 }
 0xcbb   : > { %v4587_v1 = vadd.f32 %v4586_v38, %v4503_v8  ;;  %v5817_v48 = vpop.f32.mrb[210].mxu1 }
 0xcbc   : > { %4651 = vst [vmem:[%s8327_s21 + $0x10] sm:$0xff] %v4595_v12  ;;  %v4598_v26 = vadd.f32 %v5817_v48, %v4503_v8  ;;  %v4589_v58 = vpop.f32.mrb[211].mxu1 }
 0xcbd   : > { %4649 = vst [vmem:[%s8327_s21] sm:$0xff] %v4587_v1  ;;  %v4590_v45 = vadd.f32 %v4589_v58, %v4503_v8 }
 0xcbe   : > { %4652 = vst [vmem:[%s8327_s21 + $0x18] sm:$0xff] %v4598_v26 }
 0xcbf   : > { %4650 = vst [vmem:[%s8327_s21 + $0x8] sm:$0xff] %v4590_v45 }
 0xcca   : > { %v5820_v37 = vpop.f32.mrb[212].mxu1 }
 0xccb   : > { %v4611_v22 = vadd.f32 %v5820_v37, %v4503_v8  ;;  %v4602_v31 = vpop.f32.mrb[213].mxu1 }
 0xccc   : > { %v4603_v40 = vadd.f32 %v4602_v31, %v4503_v8  ;;  %v5821_v54 = vpop.f32.mrb[214].mxu1 }
 0xccd   : > { %4655 = vst [vmem:[%s8327_s21 + $0x30] sm:$0xff] %v4611_v22  ;;  %v4614_v51 = vadd.f32 %v5821_v54, %v4503_v8  ;;  %v4605_v34 = vpop.f32.mrb[215].mxu1 }
 0xcce   : > { %4653 = vst [vmem:[%s8327_s21 + $0x20] sm:$0xff] %v4603_v40  ;;  %v4606_v17 = vadd.f32 %v4605_v34, %v4503_v8 }
 0xccf   : > { %4656 = vst [vmem:[%s8327_s21 + $0x38] sm:$0xff] %v4614_v51 }
 0xcd0   : > { %4654 = vst [vmem:[%s8327_s21 + $0x28] sm:$0xff] %v4606_v17 }
 0xcda   : > { %v5824_v46 = vpop.f32.mrb[216].mxu1 }
 0xcdb   : > { %v4627_v36 = vadd.f32 %v5824_v46, %v4503_v8  ;;  %v4618_v61 = vpop.f32.mrb[217].mxu1 }
 0xcdc   : > { %v4619_v9 = vadd.f32 %v4618_v61, %v4503_v8  ;;  %v5825_v15 = vpop.f32.mrb[218].mxu1 }
 0xcdd   : > { %4659 = vst [vmem:[%s8327_s21 + $0x50] sm:$0xff] %v4627_v36  ;;  %v4630_v44 = vadd.f32 %v5825_v15, %v4503_v8  ;;  %v4621_v59 = vpop.f32.mrb[219].mxu1 }
 0xcde   : > { %4657 = vst [vmem:[%s8327_s21 + $0x40] sm:$0xff] %v4619_v9  ;;  %v4622_v29 = vadd.f32 %v4621_v59, %v4503_v8 }
 0xcdf   : > { %4660 = vst [vmem:[%s8327_s21 + $0x58] sm:$0xff] %v4630_v44 }
 0xce0   : > { %4658 = vst [vmem:[%s8327_s21 + $0x48] sm:$0xff] %v4622_v29 }
 0xcea   : > { %v5828_v42 = vpop.f32.mrb[220].mxu1 }
 0xceb   : > { %v4643_v6 = vadd.f32 %v5828_v42, %v4503_v8  ;;  %v4634_v32 = vpop.f32.mrb[221].mxu1 }
 0xcec   : > { %v4635_v47 = vadd.f32 %v4634_v32, %v4503_v8  ;;  %v5829_v24 = vpop.f32.mrb[222].mxu1 }
 0xced   : > { %4663 = vst [vmem:[%s8327_s21 + $0x70] sm:$0xff] %v4643_v6  ;;  %v4646_v18 = vadd.f32 %v5829_v24, %v4503_v8  ;;  %v4637_v3 = vpop.f32.mrb[223].mxu1 }
 0xcee   : > { %4661 = vst [vmem:[%s8327_s21 + $0x60] sm:$0xff] %v4635_v47  ;;  %v4638_v49 = vadd.f32 %v4637_v3, %v4503_v8 }
 0xcef   : > { %4664 = vst [vmem:[%s8327_s21 + $0x78] sm:$0xff] %v4646_v18 }
 0xcf0   : > { %4662 = vst [vmem:[%s8327_s21 + $0x68] sm:$0xff] %v4638_v49 }
 0xcf1   : > { %6791 = shalt.err (!%p6788_p1)
}
 0xcf2   : > { %s6792_s28 = scalar_lea.hbm %s8347_s27, 2048  ;;  %s6796_s26 = scalar_lea.hbm %s8450_s20, 8192 }
 0xcf3   : > { %p6793_p11 = scmp.ne.s32.totalorder %s8347_s27, %s6792_s28  ;;  %p6797_p13 = scmp.lt.u32.totalorder %s8347_s27, %s8450_s20 }
 0xcf4   : > { %p6798_p6 = scmp.lt.u32.totalorder %s6796_s26, %s6792_s28  ;;  %p6800_p5 = scmp.lt.u32.totalorder %s6792_s28, %s8347_s27 }
 0xcf5   : > { %p6794_p12 = pnand %p6793_p11, %p8451_p2 }
 0xcf6   : > { %p6799_p8 = por %p6798_p6, %p6797_p13 }
 0xcf7   : > { %p6795_p0 = pneg %p6794_p12 }
 0xcf8   : > { %p6801_p4 = por %p6800_p5, %p6799_p8 }
 0xcfa   : > { %p6802_p7 = pnand %p6801_p4, %p6795_p0 }
 0xcfc   : > { %6805 = shalt.err (!%p6802_p7)
}
 0xcfd   : > { %s6890_s21 = smov 128   ;;  %s6891_s11 = smov 8  }
 0xcfe   : > { %5869 = dma.vmem_to_hbm [thread:$0]  (%p8451_p2), %s8349_s22, 2048, %s8347_s27, %s4666_s19, %s6890_s21, %s6890_s21, %s6891_s11  }
 0xcff PF: > { %p5924_p9 = scmp.ge.s32.totalorder %s6868_s16, 2  ;;  %s4694_s0 = sand.u32 1, %s6856_s13  }
 0xd00   : > { %p8452_p3 = scmp.ne.s32.totalorder %s8434_s18, 0  ;;  %s4695_s3 = scalar_lea.sflag [#allocation4], %s4694_s0 }
 0xd02   : > { %p5904_p10 = pnand %p5924_p9, %p8452_p3 }
 0xd04   : > { %6851 = dma.done.wait (!%p5904_p10), %s4695_s3, 2048  }
 0xd05   : > { %6853 = vsyncadd (!%p5904_p10), %s4695_s3, 4294965248  ;;  %p30_p1 = scmp.ge.s32.totalorder %s7175_s23, 6   ;;  %s8453_s13 = smov %s6860_s14 }
 0xd06   : > { %s8454_s14 = smov %s6864_s15  ;;  %s8455_s15 = smov %s7186_s2 }
 0xd07   : > { %s8456_s16 = smov %s7175_s23  ;;  %32 = sbr.rel (!%p30_p1) target bundleno = 19 (0x13), region = 150 }
 0xd0e   :  { %4700 = vsyncpa [#allocation3], 1 }
 0xd0f   :  { %4702 = vsyncpa [#allocation3 + $0x1], 1 }
 0xd10   :  { %4703 = vsyncpa [#allocation6], 1 }
 0xd11   :  { %4705 = vsyncpa [#allocation6 + $0x1], 1 }
 0xd12   :  { %4706 = vsyncpa [#allocation9], 1 }
 0xd13   :  { %4707 = vsyncpa [#allocation12], 1 }
 0xd14   :  { %4708 = vsyncpa [#allocation15], 1 }
 0xd15   :  { %4709 = vsyncpa [#allocation18], 1 }
 0xd16   :  { %4710 = vsyncpa [#allocation4], 1 }
 0xd17   :  { %4712 = vsyncpa [#allocation4 + $0x1], 1 }

</bundles_post_ra>
